<compile_context>
chip_gen: v7x
topology: tpu7x:2x2x1
jax: 0.10.0
libtpu: 0.0.40
codegen_flags: <defaults>
</compile_context>

<pallas_src>
import functools

import jax
import jax.numpy as jnp
from jax import lax
from jax.experimental import pallas as pl
from jax.experimental.pallas import tpu as pltpu


# ----------------------------------------------------------------------------
# Fused kernel: (conv3x3 + folded-BN + ReLU) x 2 on a flat padded plane
# ----------------------------------------------------------------------------
def _double_conv_kernel(
    xcat_ref,   # (1, Lpad, Ccat)  bf16  padded+concatenated input, flat layout
    w1_ref,     # (9, Ccat, Cmid)  bf16  conv1 taps (BN scale folded in)
    b1_ref,     # (1, Cmid)        f32   conv1 folded-BN bias
    w2_ref,     # (9, Cmid, Cout)  bf16  conv2 taps (BN scale folded in)
    b2_ref,     # (1, Cout)        f32   conv2 folded-BN bias
    mask_ref,   # (L, 1)           f32   1 on valid columns, 0 on the 2 junk
                #                        columns of each over-allocated row
    o_ref,      # (1, L, Cout)     f32   output, flat over-allocated layout
    xmid_ref,   # VMEM (Lpad, Cmid) bf16 padded conv1->conv2 intermediate
    *, H, W,
):
    Wp = W + 2                     # over-allocated row stride (includes pads)
    L = H * Wp                     # flat length of the output rows
    Lpad = L + 2 * Wp + 2          # padded plane + 2 guard rows
    Cmid = w1_ref.shape[2]
    Cout = w2_ref.shape[2]

    # --- conv1: 9 accumulating MXU dots on contiguous flat windows ----------
    acc1 = jnp.zeros((L, Cmid), jnp.float32)
    for tap in range(9):
        ky, kx = divmod(tap, 3)
        off = ky * Wp + kx
        acc1 = acc1 + jnp.dot(xcat_ref[0, off:off + L, :], w1_ref[tap],
                              preferred_element_type=jnp.float32)
    # fused folded-BN bias + ReLU; the mask zeroes the 2 junk columns per row
    # so they land as zeros in xmid's padding columns.
    h1 = jnp.maximum(acc1 + b1_ref[...], 0.0) * mask_ref[...]

    # --- build conv2's zero-padded plane (all in VMEM) -----------------------
    # interior = h1 shifted by a constant flat offset (Wp + 1); only the thin
    # head/tail border ranges need explicit zeros each step.
    xmid_ref[0:Wp + 1, :] = jnp.zeros((Wp + 1, Cmid), jnp.bfloat16)
    xmid_ref[Wp + 1 + L:Lpad, :] = jnp.zeros((Wp + 1, Cmid), jnp.bfloat16)
    xmid_ref[Wp + 1:Wp + 1 + L, :] = h1.astype(jnp.bfloat16)

    # --- conv2: 9 accumulating MXU dots on the VMEM-resident intermediate ---
    acc2 = jnp.zeros((L, Cout), jnp.float32)
    for tap in range(9):
        ky, kx = divmod(tap, 3)
        off = ky * Wp + kx
        acc2 = acc2 + jnp.dot(xmid_ref[off:off + L, :], w2_ref[tap],
                              preferred_element_type=jnp.float32)
    # junk rows get garbage values here; the wrapper slices them away.
    o_ref[0] = jnp.maximum(acc2 + b2_ref[...], 0.0).astype(o_ref.dtype)


# ----------------------------------------------------------------------------
# Wrapper
# ----------------------------------------------------------------------------
def _interp_matrix(out_size, in_size):
    """1-D linear interpolation operator, align_corners=True (rows sum to 1)."""
    if in_size == 1:
        return jnp.ones((out_size, 1), jnp.float32)
    src = jnp.arange(out_size, dtype=jnp.float32) * (in_size - 1) / (out_size - 1)
    i0 = jnp.clip(jnp.floor(src).astype(jnp.int32), 0, in_size - 2)
    frac = src - i0.astype(jnp.float32)
    rows = jnp.arange(out_size)
    m = jnp.zeros((out_size, in_size), jnp.float32)
    m = m.at[rows, i0].add(1.0 - frac)
    m = m.at[rows, i0 + 1].add(frac)
    return m


def up_forward(x1_nchw, x2_nchw, params):
    """Forward pass of `Up` (bilinear=True).  NCHW in, NCHW out."""
    N, C1, Hi, Wi = x1_nchw.shape
    N2, C2, H, W = x2_nchw.shape
    assert N == N2
    Hup, Wup = 2 * Hi, 2 * Wi
    diffY, diffX = H - Hup, W - Wup
    assert diffY >= 0 and diffX >= 0, "x1 (upsampled) larger than x2 unsupported"
    pad_t, pad_b = diffY // 2, diffY - diffY // 2
    pad_l, pad_r = diffX // 2, diffX - diffX // 2

    Wp = W + 2
    L = H * Wp
    Lpad = (H + 2) * Wp + 2                      # + 2 guard rows for last tap
    Ccat = C1 + C2
    Cmid = params["w1"].shape[2]
    Cout = params["w2"].shape[2]
    f32, bf16 = jnp.float32, jnp.bfloat16

    # Exact separable bilinear upsample (align_corners=True): two tiny matmuls.
    ah = _interp_matrix(Hup, Hi)                 # (Hup, Hi)
    aw = _interp_matrix(Wup, Wi)                 # (Wup, Wi)
    x1_nhwc = jnp.transpose(x1_nchw, (0, 2, 3, 1))
    x1_up = jnp.einsum("vh,nhwc->nvwc", ah, x1_nhwc)
    x1_up = jnp.einsum("uw,nvwc->nvuc", aw, x1_up)          # (N, Hup, Wup, C1)

    # F.pad placement + conv zero-padding ring + channel concat with x2, then
    # flatten to the kernel's over-allocated (row stride W+2) bf16 layout.
    x2_nhwc = jnp.transpose(x2_nchw, (0, 2, 3, 1))
    x2_pad = jnp.pad(x2_nhwc, ((0, 0), (1, 1), (1, 1), (0, 0)))
    x1_pad = jnp.pad(x1_up, ((0, 0), (1 + pad_t, 1 + pad_b),
                             (1 + pad_l, 1 + pad_r), (0, 0)))
    xcat = jnp.concatenate([x2_pad, x1_pad], axis=-1)        # (N, H+2, W+2, Ccat)
    xcat = xcat.reshape(N, (H + 2) * Wp, Ccat).astype(bf16)
    xcat = jnp.pad(xcat, ((0, 0), (0, 2), (0, 0)))           # 2 guard rows -> Lpad

    # 0/1 mask over the flat output rows: 0 on the 2 junk columns per row.
    mask = ((jnp.arange(L) % Wp) < W).astype(f32).reshape(L, 1)

    kernel = functools.partial(_double_conv_kernel, H=H, W=W)

    # VMEM footprint estimate (bytes): double-buffered I/O blocks, invariant
    # operands (x2 buffering), scratch, f32 accumulators, tap-window temps.
    est = (2 * (Lpad * Ccat * 2 + L * Cout * 4)
           + 2 * (9 * Ccat * Cmid * 2 + 9 * Cmid * Cout * 2 + (Cmid + Cout + L) * 4)
           + Lpad * Cmid * 2
           + L * (Cmid + Cout) * 4
           + 2 * L * max(Ccat, Cmid) * 2)
    vmem_limit = int(min(max(2 * est, 32 * 1024 * 1024), 100 * 1024 * 1024))

    out_flat = pl.pallas_call(
        kernel,
        out_shape=jax.ShapeDtypeStruct((N, L, Cout), f32),
        grid=(N,),
        in_specs=[
            pl.BlockSpec((1, Lpad, Ccat), lambda n: (n, 0, 0)),
            pl.BlockSpec((9, Ccat, Cmid), lambda n: (0, 0, 0)),
            pl.BlockSpec((1, Cmid), lambda n: (0, 0)),
            pl.BlockSpec((9, Cmid, Cout), lambda n: (0, 0, 0)),
            pl.BlockSpec((1, Cout), lambda n: (0, 0)),
            pl.BlockSpec((L, 1), lambda n: (0, 0)),
        ],
        out_specs=pl.BlockSpec((1, L, Cout), lambda n: (n, 0, 0)),
        scratch_shapes=[pltpu.VMEM((Lpad, Cmid), bf16)],
        compiler_params=pltpu.CompilerParams(
            dimension_semantics=("parallel",),
            vmem_limit_bytes=vmem_limit),
    )(xcat, params["w1"], params["b1"], params["w2"], params["b2"], mask)

    # Drop the 2 junk columns per over-allocated row and return NCHW.
    out = out_flat.reshape(N, H, Wp, Cout)[:, :, :W, :]
    return jnp.transpose(out, (0, 3, 1, 2))


# ----------------------------------------------------------------------------
# Parameters: PyTorch-style raw params + folded kernel-layout params
# ----------------------------------------------------------------------------
def make_raw_params(key, in_channels, out_channels):
    ks = jax.random.split(key, 12)

    def conv_w(k, cout, cin):                   # PyTorch OIHW
        return 0.1 * jax.random.normal(k, (cout, cin, 3, 3), jnp.float32)

    return {
        "w1": conv_w(ks[0], out_channels, in_channels),
        "b1": 0.1 * jax.random.normal(ks[1], (out_channels,), jnp.float32),
        "g1": 1.0 + 0.1 * jax.random.normal(ks[2], (out_channels,), jnp.float32),
        "be1": 0.1 * jax.random.normal(ks[3], (out_channels,), jnp.float32),
        "rm1": 0.05 * jax.random.normal(ks[4], (out_channels,), jnp.float32),
        "rv1": 1.0 + 0.1 * jnp.abs(jax.random.normal(ks[5], (out_channels,), jnp.float32)),
        "w2": conv_w(ks[6], out_channels, out_channels),
        "b2": 0.1 * jax.random.normal(ks[7], (out_channels,), jnp.float32),
        "g2": 1.0 + 0.1 * jax.random.normal(ks[8], (out_channels,), jnp.float32),
        "be2": 0.1 * jax.random.normal(ks[9], (out_channels,), jnp.float32),
        "rm2": 0.05 * jax.random.normal(ks[10], (out_channels,), jnp.float32),
        "rv2": 1.0 + 0.1 * jnp.abs(jax.random.normal(ks[11], (out_channels,), jnp.float32)),
    }


def fold_params(raw, eps=1e-5):
    """Fold inference BatchNorm into the conv weights/bias; reshape to the
    per-tap (9, Cin, Cout) layout the kernel expects; cast weights to bf16."""
    cmid = raw["w1"].shape[0]
    cout = raw["w2"].shape[0]

    s1 = raw["g1"] / jnp.sqrt(raw["rv1"] + eps)
    b1 = (raw["b1"] - raw["rm1"]) * s1 + raw["be1"]
    # OIHW -> (ky, kx, ci, co) -> (9, Cin, Cout); tap index = ky*3 + kx
    w1 = (jnp.transpose(raw["w1"], (2, 3, 1, 0)).reshape(9, -1, cmid)
          * s1[None, None, :]).astype(jnp.bfloat16)

    s2 = raw["g2"] / jnp.sqrt(raw["rv2"] + eps)
    b2 = (raw["b2"] - raw["rm2"]) * s2 + raw["be2"]
    w2 = (jnp.transpose(raw["w2"], (2, 3, 1, 0)).reshape(9, -1, cout)
          * s2[None, None, :]).astype(jnp.bfloat16)

    return {"w1": w1, "b1": b1.reshape(1, cmid),
            "w2": w2, "b2": b2.reshape(1, cout)}


# ----------------------------------------------------------------------------
# Pure-JAX (f32) reference for correctness check
# ----------------------------------------------------------------------------
def _upsample_bilinear_ref(x_nhwc):
    N, H, W, C = x_nhwc.shape
    Ho, Wo = 2 * H, 2 * W

    def idx(out_size, in_size):
        src = jnp.arange(out_size, dtype=jnp.float32) * (in_size - 1) / (out_size - 1)
        i0 = jnp.clip(jnp.floor(src).astype(jnp.int32), 0, in_size - 2)
        return i0, i0 + 1, src - i0.astype(jnp.float32)

    i0, i1, fy = idx(Ho, H)
    j0, j1, fx = idx(Wo, W)
    rows = (x_nhwc[:, i0] * (1.0 - fy)[None, :, None, None]
            + x_nhwc[:, i1] * fy[None, :, None, None])
    return (rows[:, :, j0] * (1.0 - fx)[None, None, :, None]
            + rows[:, :, j1] * fx[None, None, :, None])


def _ref_conv_bn_relu(x_nhwc, w_oihw, b, gamma, beta, mean, var, eps=1e-5):
    w_hwio = jnp.transpose(w_oihw, (2, 3, 1, 0))
    y = lax.conv_general_dilated(x_nhwc, w_hwio, (1, 1), "SAME",
                                 dimension_numbers=("NHWC", "HWIO", "NHWC"))
    y = (y + b - mean) * (gamma / jnp.sqrt(var + eps)) + beta
    return jnp.maximum(y, 0.0)


def up_forward_ref(x1_nchw, x2_nchw, raw):
    x1 = jnp.transpose(x1_nchw, (0, 2, 3, 1))
    x2 = jnp.transpose(x2_nchw, (0, 2, 3, 1))
    x1 = _upsample_bilinear_ref(x1)
    diffY = x2.shape[1] - x1.shape[1]
    diffX = x2.shape[2] - x1.shape[2]
    x1 = jnp.pad(x1, ((0, 0),
                      (diffY // 2, diffY - diffY // 2),
                      (diffX // 2, diffX - diffX // 2),
                      (0, 0)))
    x = jnp.concatenate([x2, x1], axis=-1)
    y = _ref_conv_bn_relu(x, raw["w1"], raw["b1"], raw["g1"], raw["be1"],
                          raw["rm1"], raw["rv1"])
    y = _ref_conv_bn_relu(y, raw["w2"], raw["b2"], raw["g2"], raw["be2"],
                          raw["rm2"], raw["rv2"])
    return jnp.transpose(y, (0, 3, 1, 2))


if __name__ == "__main__":
    key = jax.random.PRNGKey(0)
    k_p, k_a1, k_a2, k_b1, k_b2 = jax.random.split(key, 5)

    in_channels, out_channels = 8, 4           # concat channels = in_channels
    C_half = in_channels // 2

    raw = make_raw_params(k_p, in_channels, out_channels)
    params = fold_params(raw)

    # Case 1: standard decoder step -- x2 is exactly 2x x1 spatially (no F.pad).
    x1 = jax.random.normal(k_a1, (2, C_half, 8, 8), jnp.float32)
    x2 = jax.random.normal(k_a2, (2, C_half, 16, 16), jnp.float32)
    out = jax.block_until_ready(up_forward(x1, x2, params))
    ref = jax.block_until_ready(up_forward_ref(x1, x2, raw))
    assert out.shape == (2, out_channels, 16, 16), out.shape
    err = float(jnp.max(jnp.abs(out - ref)))
    # bf16 weights/activations (f32 accumulation) vs. an all-f32 reference.
    assert jnp.allclose(out, ref, rtol=5e-2, atol=5e-2), err

    # Case 2: odd x1 size -> exercises the asymmetric F.pad placement path.
    x1b = jax.random.normal(k_b1, (1, C_half, 7, 6), jnp.float32)
    x2b = jax.random.normal(k_b2, (1, C_half, 16, 16), jnp.float32)
    outb = jax.block_until_ready(up_forward(x1b, x2b, params))
    refb = jax.block_until_ready(up_forward_ref(x1b, x2b, raw))
    errb = float(jnp.max(jnp.abs(outb - refb)))
    assert jnp.allclose(outb, refb, rtol=5e-2, atol=5e-2), errb

    print("KERNEL_OK")
</pallas_src>

<mosaic_0001>
module attributes {stable_mosaic.version = 11 : i64} {
  func.func @_double_conv_kernel(%arg0: i32, %arg1: memref<1x326x8xbf16, #tpu.memory_space<vmem>>, %arg2: memref<9x8x4xbf16, #tpu.memory_space<vmem>>, %arg3: memref<1x4xf32, #tpu.memory_space<vmem>>, %arg4: memref<9x4x4xbf16, #tpu.memory_space<vmem>>, %arg5: memref<1x4xf32, #tpu.memory_space<vmem>>, %arg6: memref<288x1xf32, #tpu.memory_space<vmem>>, %arg7: memref<1x288x4xf32, #tpu.memory_space<vmem>>, %arg8: memref<326x4xbf16, #tpu.memory_space<vmem>>) attributes {dimension_semantics = [#tpu.dimension_semantics<parallel>], iteration_bounds = array<i64: 2>, scalar_prefetch = 0 : i64, scratch_operands = 1 : i64, tpu.core_type = #tpu.core_type<tc>, window_params = [{transform_indices = @transform_0, window_bounds = array<i64: 1, 326, 8>}, {pipeline_mode = #tpu.pipeline_mode<synchronous>, transform_indices = @transform_1, window_bounds = array<i64: 9, 8, 4>}, {pipeline_mode = #tpu.pipeline_mode<synchronous>, transform_indices = @transform_2, window_bounds = array<i64: 1, 4>}, {pipeline_mode = #tpu.pipeline_mode<synchronous>, transform_indices = @transform_3, window_bounds = array<i64: 9, 4, 4>}, {pipeline_mode = #tpu.pipeline_mode<synchronous>, transform_indices = @transform_4, window_bounds = array<i64: 1, 4>}, {pipeline_mode = #tpu.pipeline_mode<synchronous>, transform_indices = @transform_5, window_bounds = array<i64: 288, 1>}, {transform_indices = @transform_6, window_bounds = array<i64: 1, 288, 4>}]} {
    %cst = arith.constant 0.000000e+00 : f32
    %0 = vector.broadcast %cst : f32 to vector<288x4xf32>
    %c0 = arith.constant 0 : index
    %c0_0 = arith.constant 0 : index
    %c0_1 = arith.constant 0 : index
    %1 = vector.load %arg1[%c0, %c0_0, %c0_1] : memref<1x326x8xbf16, #tpu.memory_space<vmem>>, vector<1x288x8xbf16>
    %2 = vector.shape_cast %1 : vector<1x288x8xbf16> to vector<288x8xbf16>
    %c0_2 = arith.constant 0 : index
    %c0_3 = arith.constant 0 : index
    %c0_4 = arith.constant 0 : index
    %3 = vector.load %arg2[%c0_2, %c0_3, %c0_4] : memref<9x8x4xbf16, #tpu.memory_space<vmem>>, vector<1x8x4xbf16>
    %4 = vector.shape_cast %3 : vector<1x8x4xbf16> to vector<8x4xbf16>
    %cst_5 = arith.constant dense<0.000000e+00> : vector<288x4xf32>
    %5 = tpu.matmul %2, %4, %cst_5 {dimension_numbers = #tpu.dot_dimension_numbers<[1], [0], [0], [1], [0, 0, 1, 1], [], []>} : vector<288x8xbf16>, vector<8x4xbf16>, vector<288x4xf32> -> vector<288x4xf32>
    %6 = arith.addf %0, %5 : vector<288x4xf32>
    %c0_6 = arith.constant 0 : index
    %c1 = arith.constant 1 : index
    %c0_7 = arith.constant 0 : index
    %7 = vector.load %arg1[%c0_6, %c1, %c0_7] : memref<1x326x8xbf16, #tpu.memory_space<vmem>>, vector<1x288x8xbf16>
    %8 = vector.shape_cast %7 : vector<1x288x8xbf16> to vector<288x8xbf16>
    %c1_8 = arith.constant 1 : index
    %c0_9 = arith.constant 0 : index
    %c0_10 = arith.constant 0 : index
    %9 = vector.load %arg2[%c1_8, %c0_9, %c0_10] : memref<9x8x4xbf16, #tpu.memory_space<vmem>>, vector<1x8x4xbf16>
    %10 = vector.shape_cast %9 : vector<1x8x4xbf16> to vector<8x4xbf16>
    %cst_11 = arith.constant dense<0.000000e+00> : vector<288x4xf32>
    %11 = tpu.matmul %8, %10, %cst_11 {dimension_numbers = #tpu.dot_dimension_numbers<[1], [0], [0], [1], [0, 0, 1, 1], [], []>} : vector<288x8xbf16>, vector<8x4xbf16>, vector<288x4xf32> -> vector<288x4xf32>
    %12 = arith.addf %6, %11 : vector<288x4xf32>
    %c0_12 = arith.constant 0 : index
    %c2 = arith.constant 2 : index
    %c0_13 = arith.constant 0 : index
    %13 = vector.load %arg1[%c0_12, %c2, %c0_13] : memref<1x326x8xbf16, #tpu.memory_space<vmem>>, vector<1x288x8xbf16>
    %14 = vector.shape_cast %13 : vector<1x288x8xbf16> to vector<288x8xbf16>
    %c2_14 = arith.constant 2 : index
    %c0_15 = arith.constant 0 : index
    %c0_16 = arith.constant 0 : index
    %15 = vector.load %arg2[%c2_14, %c0_15, %c0_16] : memref<9x8x4xbf16, #tpu.memory_space<vmem>>, vector<1x8x4xbf16>
    %16 = vector.shape_cast %15 : vector<1x8x4xbf16> to vector<8x4xbf16>
    %cst_17 = arith.constant dense<0.000000e+00> : vector<288x4xf32>
    %17 = tpu.matmul %14, %16, %cst_17 {dimension_numbers = #tpu.dot_dimension_numbers<[1], [0], [0], [1], [0, 0, 1, 1], [], []>} : vector<288x8xbf16>, vector<8x4xbf16>, vector<288x4xf32> -> vector<288x4xf32>
    %18 = arith.addf %12, %17 : vector<288x4xf32>
    %c0_18 = arith.constant 0 : index
    %c18 = arith.constant 18 : index
    %c0_19 = arith.constant 0 : index
    %19 = vector.load %arg1[%c0_18, %c18, %c0_19] : memref<1x326x8xbf16, #tpu.memory_space<vmem>>, vector<1x288x8xbf16>
    %20 = vector.shape_cast %19 : vector<1x288x8xbf16> to vector<288x8xbf16>
    %c3 = arith.constant 3 : index
    %c0_20 = arith.constant 0 : index
    %c0_21 = arith.constant 0 : index
    %21 = vector.load %arg2[%c3, %c0_20, %c0_21] : memref<9x8x4xbf16, #tpu.memory_space<vmem>>, vector<1x8x4xbf16>
    %22 = vector.shape_cast %21 : vector<1x8x4xbf16> to vector<8x4xbf16>
    %cst_22 = arith.constant dense<0.000000e+00> : vector<288x4xf32>
    %23 = tpu.matmul %20, %22, %cst_22 {dimension_numbers = #tpu.dot_dimension_numbers<[1], [0], [0], [1], [0, 0, 1, 1], [], []>} : vector<288x8xbf16>, vector<8x4xbf16>, vector<288x4xf32> -> vector<288x4xf32>
    %24 = arith.addf %18, %23 : vector<288x4xf32>
    %c0_23 = arith.constant 0 : index
    %c19 = arith.constant 19 : index
    %c0_24 = arith.constant 0 : index
    %25 = vector.load %arg1[%c0_23, %c19, %c0_24] : memref<1x326x8xbf16, #tpu.memory_space<vmem>>, vector<1x288x8xbf16>
    %26 = vector.shape_cast %25 : vector<1x288x8xbf16> to vector<288x8xbf16>
    %c4 = arith.constant 4 : index
    %c0_25 = arith.constant 0 : index
    %c0_26 = arith.constant 0 : index
    %27 = vector.load %arg2[%c4, %c0_25, %c0_26] : memref<9x8x4xbf16, #tpu.memory_space<vmem>>, vector<1x8x4xbf16>
    %28 = vector.shape_cast %27 : vector<1x8x4xbf16> to vector<8x4xbf16>
    %cst_27 = arith.constant dense<0.000000e+00> : vector<288x4xf32>
    %29 = tpu.matmul %26, %28, %cst_27 {dimension_numbers = #tpu.dot_dimension_numbers<[1], [0], [0], [1], [0, 0, 1, 1], [], []>} : vector<288x8xbf16>, vector<8x4xbf16>, vector<288x4xf32> -> vector<288x4xf32>
    %30 = arith.addf %24, %29 : vector<288x4xf32>
    %c0_28 = arith.constant 0 : index
    %c20 = arith.constant 20 : index
    %c0_29 = arith.constant 0 : index
    %31 = vector.load %arg1[%c0_28, %c20, %c0_29] : memref<1x326x8xbf16, #tpu.memory_space<vmem>>, vector<1x288x8xbf16>
    %32 = vector.shape_cast %31 : vector<1x288x8xbf16> to vector<288x8xbf16>
    %c5 = arith.constant 5 : index
    %c0_30 = arith.constant 0 : index
    %c0_31 = arith.constant 0 : index
    %33 = vector.load %arg2[%c5, %c0_30, %c0_31] : memref<9x8x4xbf16, #tpu.memory_space<vmem>>, vector<1x8x4xbf16>
    %34 = vector.shape_cast %33 : vector<1x8x4xbf16> to vector<8x4xbf16>
    %cst_32 = arith.constant dense<0.000000e+00> : vector<288x4xf32>
    %35 = tpu.matmul %32, %34, %cst_32 {dimension_numbers = #tpu.dot_dimension_numbers<[1], [0], [0], [1], [0, 0, 1, 1], [], []>} : vector<288x8xbf16>, vector<8x4xbf16>, vector<288x4xf32> -> vector<288x4xf32>
    %36 = arith.addf %30, %35 : vector<288x4xf32>
    %c0_33 = arith.constant 0 : index
    %c36 = arith.constant 36 : index
    %c0_34 = arith.constant 0 : index
    %37 = vector.load %arg1[%c0_33, %c36, %c0_34] : memref<1x326x8xbf16, #tpu.memory_space<vmem>>, vector<1x288x8xbf16>
    %38 = vector.shape_cast %37 : vector<1x288x8xbf16> to vector<288x8xbf16>
    %c6 = arith.constant 6 : index
    %c0_35 = arith.constant 0 : index
    %c0_36 = arith.constant 0 : index
    %39 = vector.load %arg2[%c6, %c0_35, %c0_36] : memref<9x8x4xbf16, #tpu.memory_space<vmem>>, vector<1x8x4xbf16>
    %40 = vector.shape_cast %39 : vector<1x8x4xbf16> to vector<8x4xbf16>
    %cst_37 = arith.constant dense<0.000000e+00> : vector<288x4xf32>
    %41 = tpu.matmul %38, %40, %cst_37 {dimension_numbers = #tpu.dot_dimension_numbers<[1], [0], [0], [1], [0, 0, 1, 1], [], []>} : vector<288x8xbf16>, vector<8x4xbf16>, vector<288x4xf32> -> vector<288x4xf32>
    %42 = arith.addf %36, %41 : vector<288x4xf32>
    %c0_38 = arith.constant 0 : index
    %c37 = arith.constant 37 : index
    %c0_39 = arith.constant 0 : index
    %43 = vector.load %arg1[%c0_38, %c37, %c0_39] : memref<1x326x8xbf16, #tpu.memory_space<vmem>>, vector<1x288x8xbf16>
    %44 = vector.shape_cast %43 : vector<1x288x8xbf16> to vector<288x8xbf16>
    %c7 = arith.constant 7 : index
    %c0_40 = arith.constant 0 : index
    %c0_41 = arith.constant 0 : index
    %45 = vector.load %arg2[%c7, %c0_40, %c0_41] : memref<9x8x4xbf16, #tpu.memory_space<vmem>>, vector<1x8x4xbf16>
    %46 = vector.shape_cast %45 : vector<1x8x4xbf16> to vector<8x4xbf16>
    %cst_42 = arith.constant dense<0.000000e+00> : vector<288x4xf32>
    %47 = tpu.matmul %44, %46, %cst_42 {dimension_numbers = #tpu.dot_dimension_numbers<[1], [0], [0], [1], [0, 0, 1, 1], [], []>} : vector<288x8xbf16>, vector<8x4xbf16>, vector<288x4xf32> -> vector<288x4xf32>
    %48 = arith.addf %42, %47 : vector<288x4xf32>
    %c0_43 = arith.constant 0 : index
    %c38 = arith.constant 38 : index
    %c0_44 = arith.constant 0 : index
    %49 = vector.load %arg1[%c0_43, %c38, %c0_44] : memref<1x326x8xbf16, #tpu.memory_space<vmem>>, vector<1x288x8xbf16>
    %50 = vector.shape_cast %49 : vector<1x288x8xbf16> to vector<288x8xbf16>
    %c8 = arith.constant 8 : index
    %c0_45 = arith.constant 0 : index
    %c0_46 = arith.constant 0 : index
    %51 = vector.load %arg2[%c8, %c0_45, %c0_46] : memref<9x8x4xbf16, #tpu.memory_space<vmem>>, vector<1x8x4xbf16>
    %52 = vector.shape_cast %51 : vector<1x8x4xbf16> to vector<8x4xbf16>
    %cst_47 = arith.constant dense<0.000000e+00> : vector<288x4xf32>
    %53 = tpu.matmul %50, %52, %cst_47 {dimension_numbers = #tpu.dot_dimension_numbers<[1], [0], [0], [1], [0, 0, 1, 1], [], []>} : vector<288x8xbf16>, vector<8x4xbf16>, vector<288x4xf32> -> vector<288x4xf32>
    %54 = arith.addf %48, %53 : vector<288x4xf32>
    %c0_48 = arith.constant 0 : index
    %c0_49 = arith.constant 0 : index
    %55 = vector.load %arg3[%c0_48, %c0_49] : memref<1x4xf32, #tpu.memory_space<vmem>>, vector<1x4xf32>
    %56 = vector.broadcast %55 : vector<1x4xf32> to vector<288x4xf32>
    %57 = arith.addf %54, %56 : vector<288x4xf32>
    %cst_50 = arith.constant 0.000000e+00 : f32
    %58 = vector.broadcast %cst_50 : f32 to vector<288x4xf32>
    %59 = arith.maximumf %57, %58 : vector<288x4xf32>
    %c0_51 = arith.constant 0 : index
    %c0_52 = arith.constant 0 : index
    %60 = vector.load %arg6[%c0_51, %c0_52] : memref<288x1xf32, #tpu.memory_space<vmem>>, vector<288x1xf32>
    %61 = vector.broadcast %60 : vector<288x1xf32> to vector<288x4xf32>
    %62 = arith.mulf %59, %61 : vector<288x4xf32>
    %cst_53 = arith.constant 0.000000e+00 : bf16
    %63 = vector.broadcast %cst_53 : bf16 to vector<19x4xbf16>
    %c0_54 = arith.constant 0 : index
    %c0_55 = arith.constant 0 : index
    %64 = vector.load %arg8[%c0_54, %c0_55] : memref<326x4xbf16, #tpu.memory_space<vmem>>, vector<19x4xbf16>
    tpu.vector_store %arg8[%c0_54, %c0_55], %63 {strides = array<i32>} : memref<326x4xbf16, #tpu.memory_space<vmem>>, vector<19x4xbf16>,
    %cst_56 = arith.constant 0.000000e+00 : bf16
    %65 = vector.broadcast %cst_56 : bf16 to vector<19x4xbf16>
    %c307 = arith.constant 307 : index
    %c0_57 = arith.constant 0 : index
    %66 = vector.load %arg8[%c307, %c0_57] : memref<326x4xbf16, #tpu.memory_space<vmem>>, vector<19x4xbf16>
    tpu.vector_store %arg8[%c307, %c0_57], %65 {strides = array<i32>} : memref<326x4xbf16, #tpu.memory_space<vmem>>, vector<19x4xbf16>,
    %67 = arith.truncf %62 : vector<288x4xf32> to vector<288x4xbf16>
    %c19_58 = arith.constant 19 : index
    %c0_59 = arith.constant 0 : index
    %68 = vector.load %arg8[%c19_58, %c0_59] : memref<326x4xbf16, #tpu.memory_space<vmem>>, vector<288x4xbf16>
    tpu.vector_store %arg8[%c19_58, %c0_59], %67 {strides = array<i32>} : memref<326x4xbf16, #tpu.memory_space<vmem>>, vector<288x4xbf16>,
    %cst_60 = arith.constant 0.000000e+00 : f32
    %69 = vector.broadcast %cst_60 : f32 to vector<288x4xf32>
    %c0_61 = arith.constant 0 : index
    %c0_62 = arith.constant 0 : index
    %70 = vector.load %arg8[%c0_61, %c0_62] : memref<326x4xbf16, #tpu.memory_space<vmem>>, vector<288x4xbf16>
    %c0_63 = arith.constant 0 : index
    %c0_64 = arith.constant 0 : index
    %c0_65 = arith.constant 0 : index
    %71 = vector.load %arg4[%c0_63, %c0_64, %c0_65] : memref<9x4x4xbf16, #tpu.memory_space<vmem>>, vector<1x4x4xbf16>
    %72 = vector.shape_cast %71 : vector<1x4x4xbf16> to vector<4x4xbf16>
    %cst_66 = arith.constant dense<0.000000e+00> : vector<288x4xf32>
    %73 = tpu.matmul %70, %72, %cst_66 {dimension_numbers = #tpu.dot_dimension_numbers<[1], [0], [0], [1], [0, 0, 1, 1], [], []>} : vector<288x4xbf16>, vector<4x4xbf16>, vector<288x4xf32> -> vector<288x4xf32>
    %74 = arith.addf %69, %73 : vector<288x4xf32>
    %c1_67 = arith.constant 1 : index
    %c0_68 = arith.constant 0 : index
    %75 = vector.load %arg8[%c1_67, %c0_68] : memref<326x4xbf16, #tpu.memory_space<vmem>>, vector<288x4xbf16>
    %c1_69 = arith.constant 1 : index
    %c0_70 = arith.constant 0 : index
    %c0_71 = arith.constant 0 : index
    %76 = vector.load %arg4[%c1_69, %c0_70, %c0_71] : memref<9x4x4xbf16, #tpu.memory_space<vmem>>, vector<1x4x4xbf16>
    %77 = vector.shape_cast %76 : vector<1x4x4xbf16> to vector<4x4xbf16>
    %cst_72 = arith.constant dense<0.000000e+00> : vector<288x4xf32>
    %78 = tpu.matmul %75, %77, %cst_72 {dimension_numbers = #tpu.dot_dimension_numbers<[1], [0], [0], [1], [0, 0, 1, 1], [], []>} : vector<288x4xbf16>, vector<4x4xbf16>, vector<288x4xf32> -> vector<288x4xf32>
    %79 = arith.addf %74, %78 : vector<288x4xf32>
    %c2_73 = arith.constant 2 : index
    %c0_74 = arith.constant 0 : index
    %80 = vector.load %arg8[%c2_73, %c0_74] : memref<326x4xbf16, #tpu.memory_space<vmem>>, vector<288x4xbf16>
    %c2_75 = arith.constant 2 : index
    %c0_76 = arith.constant 0 : index
    %c0_77 = arith.constant 0 : index
    %81 = vector.load %arg4[%c2_75, %c0_76, %c0_77] : memref<9x4x4xbf16, #tpu.memory_space<vmem>>, vector<1x4x4xbf16>
    %82 = vector.shape_cast %81 : vector<1x4x4xbf16> to vector<4x4xbf16>
    %cst_78 = arith.constant dense<0.000000e+00> : vector<288x4xf32>
    %83 = tpu.matmul %80, %82, %cst_78 {dimension_numbers = #tpu.dot_dimension_numbers<[1], [0], [0], [1], [0, 0, 1, 1], [], []>} : vector<288x4xbf16>, vector<4x4xbf16>, vector<288x4xf32> -> vector<288x4xf32>
    %84 = arith.addf %79, %83 : vector<288x4xf32>
    %c18_79 = arith.constant 18 : index
    %c0_80 = arith.constant 0 : index
    %85 = vector.load %arg8[%c18_79, %c0_80] : memref<326x4xbf16, #tpu.memory_space<vmem>>, vector<288x4xbf16>
    %c3_81 = arith.constant 3 : index
    %c0_82 = arith.constant 0 : index
    %c0_83 = arith.constant 0 : index
    %86 = vector.load %arg4[%c3_81, %c0_82, %c0_83] : memref<9x4x4xbf16, #tpu.memory_space<vmem>>, vector<1x4x4xbf16>
    %87 = vector.shape_cast %86 : vector<1x4x4xbf16> to vector<4x4xbf16>
    %cst_84 = arith.constant dense<0.000000e+00> : vector<288x4xf32>
    %88 = tpu.matmul %85, %87, %cst_84 {dimension_numbers = #tpu.dot_dimension_numbers<[1], [0], [0], [1], [0, 0, 1, 1], [], []>} : vector<288x4xbf16>, vector<4x4xbf16>, vector<288x4xf32> -> vector<288x4xf32>
    %89 = arith.addf %84, %88 : vector<288x4xf32>
    %c19_85 = arith.constant 19 : index
    %c0_86 = arith.constant 0 : index
    %90 = vector.load %arg8[%c19_85, %c0_86] : memref<326x4xbf16, #tpu.memory_space<vmem>>, vector<288x4xbf16>
    %c4_87 = arith.constant 4 : index
    %c0_88 = arith.constant 0 : index
    %c0_89 = arith.constant 0 : index
    %91 = vector.load %arg4[%c4_87, %c0_88, %c0_89] : memref<9x4x4xbf16, #tpu.memory_space<vmem>>, vector<1x4x4xbf16>
    %92 = vector.shape_cast %91 : vector<1x4x4xbf16> to vector<4x4xbf16>
    %cst_90 = arith.constant dense<0.000000e+00> : vector<288x4xf32>
    %93 = tpu.matmul %90, %92, %cst_90 {dimension_numbers = #tpu.dot_dimension_numbers<[1], [0], [0], [1], [0, 0, 1, 1], [], []>} : vector<288x4xbf16>, vector<4x4xbf16>, vector<288x4xf32> -> vector<288x4xf32>
    %94 = arith.addf %89, %93 : vector<288x4xf32>
    %c20_91 = arith.constant 20 : index
    %c0_92 = arith.constant 0 : index
    %95 = vector.load %arg8[%c20_91, %c0_92] : memref<326x4xbf16, #tpu.memory_space<vmem>>, vector<288x4xbf16>
    %c5_93 = arith.constant 5 : index
    %c0_94 = arith.constant 0 : index
    %c0_95 = arith.constant 0 : index
    %96 = vector.load %arg4[%c5_93, %c0_94, %c0_95] : memref<9x4x4xbf16, #tpu.memory_space<vmem>>, vector<1x4x4xbf16>
    %97 = vector.shape_cast %96 : vector<1x4x4xbf16> to vector<4x4xbf16>
    %cst_96 = arith.constant dense<0.000000e+00> : vector<288x4xf32>
    %98 = tpu.matmul %95, %97, %cst_96 {dimension_numbers = #tpu.dot_dimension_numbers<[1], [0], [0], [1], [0, 0, 1, 1], [], []>} : vector<288x4xbf16>, vector<4x4xbf16>, vector<288x4xf32> -> vector<288x4xf32>
    %99 = arith.addf %94, %98 : vector<288x4xf32>
    %c36_97 = arith.constant 36 : index
    %c0_98 = arith.constant 0 : index
    %100 = vector.load %arg8[%c36_97, %c0_98] : memref<326x4xbf16, #tpu.memory_space<vmem>>, vector<288x4xbf16>
    %c6_99 = arith.constant 6 : index
    %c0_100 = arith.constant 0 : index
    %c0_101 = arith.constant 0 : index
    %101 = vector.load %arg4[%c6_99, %c0_100, %c0_101] : memref<9x4x4xbf16, #tpu.memory_space<vmem>>, vector<1x4x4xbf16>
    %102 = vector.shape_cast %101 : vector<1x4x4xbf16> to vector<4x4xbf16>
    %cst_102 = arith.constant dense<0.000000e+00> : vector<288x4xf32>
    %103 = tpu.matmul %100, %102, %cst_102 {dimension_numbers = #tpu.dot_dimension_numbers<[1], [0], [0], [1], [0, 0, 1, 1], [], []>} : vector<288x4xbf16>, vector<4x4xbf16>, vector<288x4xf32> -> vector<288x4xf32>
    %104 = arith.addf %99, %103 : vector<288x4xf32>
    %c37_103 = arith.constant 37 : index
    %c0_104 = arith.constant 0 : index
    %105 = vector.load %arg8[%c37_103, %c0_104] : memref<326x4xbf16, #tpu.memory_space<vmem>>, vector<288x4xbf16>
    %c7_105 = arith.constant 7 : index
    %c0_106 = arith.constant 0 : index
    %c0_107 = arith.constant 0 : index
    %106 = vector.load %arg4[%c7_105, %c0_106, %c0_107] : memref<9x4x4xbf16, #tpu.memory_space<vmem>>, vector<1x4x4xbf16>
    %107 = vector.shape_cast %106 : vector<1x4x4xbf16> to vector<4x4xbf16>
    %cst_108 = arith.constant dense<0.000000e+00> : vector<288x4xf32>
    %108 = tpu.matmul %105, %107, %cst_108 {dimension_numbers = #tpu.dot_dimension_numbers<[1], [0], [0], [1], [0, 0, 1, 1], [], []>} : vector<288x4xbf16>, vector<4x4xbf16>, vector<288x4xf32> -> vector<288x4xf32>
    %109 = arith.addf %104, %108 : vector<288x4xf32>
    %c38_109 = arith.constant 38 : index
    %c0_110 = arith.constant 0 : index
    %110 = vector.load %arg8[%c38_109, %c0_110] : memref<326x4xbf16, #tpu.memory_space<vmem>>, vector<288x4xbf16>
    %c8_111 = arith.constant 8 : index
    %c0_112 = arith.constant 0 : index
    %c0_113 = arith.constant 0 : index
    %111 = vector.load %arg4[%c8_111, %c0_112, %c0_113] : memref<9x4x4xbf16, #tpu.memory_space<vmem>>, vector<1x4x4xbf16>
    %112 = vector.shape_cast %111 : vector<1x4x4xbf16> to vector<4x4xbf16>
    %cst_114 = arith.constant dense<0.000000e+00> : vector<288x4xf32>
    %113 = tpu.matmul %110, %112, %cst_114 {dimension_numbers = #tpu.dot_dimension_numbers<[1], [0], [0], [1], [0, 0, 1, 1], [], []>} : vector<288x4xbf16>, vector<4x4xbf16>, vector<288x4xf32> -> vector<288x4xf32>
    %114 = arith.addf %109, %113 : vector<288x4xf32>
    %c0_115 = arith.constant 0 : index
    %c0_116 = arith.constant 0 : index
    %115 = vector.load %arg5[%c0_115, %c0_116] : memref<1x4xf32, #tpu.memory_space<vmem>>, vector<1x4xf32>
    %116 = vector.broadcast %115 : vector<1x4xf32> to vector<288x4xf32>
    %117 = arith.addf %114, %116 : vector<288x4xf32>
    %cst_117 = arith.constant 0.000000e+00 : f32
    %118 = vector.broadcast %cst_117 : f32 to vector<288x4xf32>
    %119 = arith.maximumf %117, %118 : vector<288x4xf32>
    %c0_118 = arith.constant 0 : index
    %c0_119 = arith.constant 0 : index
    %c0_120 = arith.constant 0 : index
    %120 = vector.load %arg7[%c0_118, %c0_119, %c0_120] : memref<1x288x4xf32, #tpu.memory_space<vmem>>, vector<1x288x4xf32>
    %121 = vector.shape_cast %120 : vector<1x288x4xf32> to vector<288x4xf32>
    %122 = vector.shape_cast %119 : vector<288x4xf32> to vector<1x288x4xf32>
    tpu.vector_store %arg7[%c0_118, %c0_119, %c0_120], %122 {strides = array<i32>} : memref<1x288x4xf32, #tpu.memory_space<vmem>>, vector<1x288x4xf32>,
    return
  }
  func.func @transform_0(%arg0: i32) -> (i32, i32, i32) {
    %c0_i32 = arith.constant 0 : i32
    %c0_i32_0 = arith.constant 0 : i32
    %c0_i32_1 = arith.constant 0 : i32
    return %arg0, %c0_i32, %c0_i32_0 : i32, i32, i32
  }
  func.func @transform_1(%arg0: i32) -> (i32, i32, i32) {
    %c0_i32 = arith.constant 0 : i32
    %c0_i32_0 = arith.constant 0 : i32
    %c0_i32_1 = arith.constant 0 : i32
    %c0_i32_2 = arith.constant 0 : i32
    return %c0_i32, %c0_i32_0, %c0_i32_1 : i32, i32, i32
  }
  func.func @transform_2(%arg0: i32) -> (i32, i32) {
    %c0_i32 = arith.constant 0 : i32
    %c0_i32_0 = arith.constant 0 : i32
    %c0_i32_1 = arith.constant 0 : i32
    return %c0_i32, %c0_i32_0 : i32, i32
  }
  func.func @transform_3(%arg0: i32) -> (i32, i32, i32) {
    %c0_i32 = arith.constant 0 : i32
    %c0_i32_0 = arith.constant 0 : i32
    %c0_i32_1 = arith.constant 0 : i32
    %c0_i32_2 = arith.constant 0 : i32
    return %c0_i32, %c0_i32_0, %c0_i32_1 : i32, i32, i32
  }
  func.func @transform_4(%arg0: i32) -> (i32, i32) {
    %c0_i32 = arith.constant 0 : i32
    %c0_i32_0 = arith.constant 0 : i32
    %c0_i32_1 = arith.constant 0 : i32
    return %c0_i32, %c0_i32_0 : i32, i32
  }
  func.func @transform_5(%arg0: i32) -> (i32, i32) {
    %c0_i32 = arith.constant 0 : i32
    %c0_i32_0 = arith.constant 0 : i32
    %c0_i32_1 = arith.constant 0 : i32
    return %c0_i32, %c0_i32_0 : i32, i32
  }
  func.func @transform_6(%arg0: i32) -> (i32, i32, i32) {
    %c0_i32 = arith.constant 0 : i32
    %c0_i32_0 = arith.constant 0 : i32
    %c0_i32_1 = arith.constant 0 : i32
    return %arg0, %c0_i32, %c0_i32_0 : i32, i32, i32
  }
}

</mosaic_0001>

<bundles_post_ra>
// kernel: tpu_custom_call.1
= control target key start
LH: loop header
LB: loop body
LE: loop exit
PB: predicated region body
PF: predicated region fallthrough
CT: control target
= control target key end

     0   :  { %s10569_s21 = smov 0   ;;  %s12842_s0 = inlined_call_operand.vmem [shape: bf16[2,326,8], index: 0, kind: input, shape index: {}]   ;;  %s12843_s1 = inlined_call_operand.vmem [shape: bf16[9,8,4], index: 1, kind: input, shape index: {}]   ;;  %s12844_s2 = inlined_call_operand.vmem [shape: f32[1,4], index: 2, kind: input, shape index: {}]   ;;  %s12845_s3 = inlined_call_operand.vmem [shape: bf16[9,4,4], index: 3, kind: input, shape index: {}]   ;;  %s12846_s4 = inlined_call_operand.vmem [shape: f32[1,4], index: 4, kind: input, shape index: {}]   ;;  %s12847_s5 = inlined_call_operand.vmem [shape: f32[288,1], index: 5, kind: input, shape index: {}]   ;;  %s12848_s6 = inlined_call_operand.vmem [shape: f32[2,288,4], index: 6, kind: output, shape index: {}]  }
   0x1 LB: > { %s8209_s22 = sadd.s32 4294967295, %s10531_s21   ;;  %p8213_p0 = scmp.ge.s32.totalorder %s10531_s21, 1  ;;  %s10531_s21 = sphi %s10569_s21, %s16_s21  }
   0x2   : > { %p212_p1 = scmp.lt.s32.totalorder %s10531_s21, 3 }
   0x4   : > { %p213_p2 = pnand %p8213_p0, %p212_p1 }
   0x6   : > { %216 = sbr.rel (%p213_p2) target bundleno = 1758 (0x6de), region = 44 }
   0xd   : > { %v8216_v0 = vld [vmem:[%s12843_s1 + $0x4] sm:$0xf]  ;;  %vm590_vm0 = vcmask 1043456   ;;  %p242_p3 = scmp.lt.s32.totalorder %s8209_s22, 1  ;;  %v289_v2 = vld [vmem:[%s12843_s1] sm:$0xf] }
   0xe   : > { %10358 = vmatprep.subr.msk.bf16.mxu0 %vm590_vm0, %v8216_v0  ;;  %v592_v1 = vsel %vm590_vm0, %v8216_v0, 0  ;;  %vm386_vm1 = vsmask.f32 7424  ;;  %vm535_vm2 = vcmask 64512   ;;  %v808_v24 = vsel %vm590_vm0, %v289_v2, 0 }
   0xf   : > { %9099 = vmatpush3.bf16.msra.mxu0 %v592_v1  ;;  %s13005_s22 = smov (!%p242_p3, %s8209_s22), 1  ;;  %v10635_v33 = vld [vmem:[%s12843_s1 + $0x8] sm:$0xf]  ;;  %vm993_vm3 = vcmask 1046528   ;;  %vm1746_vm4 = vsmask.f32 6400 }
  0x10   : > { %10359 = vmatprep.subr.msk.bf16.mxu0 %vm590_vm0, %v289_v2  ;;  %s10376_s27 = smul.u32 164, %s13005_s22  ;;  %vm2193_vm5 = vcmask 1045504   ;;  %vm4032_vm6 = vcmask 27648   ;;  %vm4048_vm7 = vcmask 26624   ;;  %vm2946_vm8 = vsmask.f32 5376 }
  0x11   : > { %vm3393_vm9 = vcmask 1044480   ;;  %vm4035_vm10 = vcmask 25600   ;;  %vm4036_vm11 = vsmask.f32 1280  ;;  %vm4041_vm13 = vcmask 27649  }
  0x12   : > { %s10592_s30 = scalar_lea.vmem %s12842_s0, %s10376_s27  ;;  %vm11484_vm12 = vmand %vm4035_vm10, %vm4036_vm11  ;;  %vm4042_vm14 = vsmask.f32 7942  ;;  %vm4878_vm10 = vcmask 31744  }
  0x13   : > { %v253_v3 = vld [vmem:[%s10592_s30] sm:$0xf]  ;;  %v10596_v4 = vld [vmem:[%s10592_s30 + $0x4] sm:$0xf]  ;;  %v10602_v6 = vld [vmem:[%s10592_s30 + $0x8] sm:$0xff]  }
  0x14   : > { %v10599_v5 = vcombine.low %v253_v3, %v10596_v4  ;;  %v10605_v7 = vld [vmem:[%s10592_s30 + $0x10] sm:$0xff]   ;;  %v395_v10 = vshll.u32 %v10602_v6, 16  ;;  %v399_v11 = vshrl.u32 %v10602_v6, 16  ;;  %v10613_v13 = vld [vmem:[%s10592_s30 + $0x18] sm:$0xff]   ;;  %v10617_v15 = vld [vmem:[%s10592_s30 + $0x20] sm:$0xff]  }
  0x15   : > { %v403_v12 = vshll.u32 %v10605_v7, 16  ;;  %v407_v14 = vshrl.u32 %v10605_v7, 16  ;;  %v411_v19 = vshll.u32 %v10613_v13, 16  ;;  %v419_v22 = vshll.u32 %v10617_v15, 16  ;;  %v10622_v23 = vld [vmem:[%s10592_s30 + $0x28] sm:$0xff]   ;;  %v10639_v35 = vld [vmem:[%s10592_s30 + $0x30] sm:$0xff]   ;;  %vm11490_vm15 = vmand %vm4041_vm13, %vm4042_vm14 }
  0x16   : > { %v388_v8 = vshrl.u32 %v10599_v5, 16  ;;  %v390_v9 = vshll.u32 %v10599_v5, 16  ;;  %v397_v17 = vrot.slane %v395_v10, 1  ;;  %v415_v27 = vshrl.u32 %v10613_v13, 16  ;;  %v10643_v39 = vld [vmem:[%s10592_s30 + $0x38] sm:$0xff]   ;;  %v10655_v47 = vld [vmem:[%s10592_s30 + $0x40] sm:$0xff]  }
  0x17   : > { %v405_v18 = vrot.slane %v403_v12, 1  ;;  %v413_v26 = vrot.slane %v411_v19, 1  ;;  %v423_v30 = vshrl.u32 %v10617_v15, 16  ;;  %v427_v31 = vshll.u32 %v10622_v23, 16  ;;  %v10658_v48 = vld [vmem:[%s10592_s30 + $0x48] sm:$0xff]   ;;  %v10662_v50 = vld [vmem:[%s10592_s30 + $0x50] sm:$0xff]  }
  0x18   : > { %v392_v16 = vrot.slane %v390_v9, 1  ;;  %v401_v21 = vor.u32 %v399_v11, %v397_v17  ;;  %v421_v34 = vrot.slane %v419_v22, 1  ;;  %v435_v40 = vshll.u32 %v10639_v35, 16  ;;  %v10665_v53 = vld [vmem:[%s10592_s30 + $0x58] sm:$0xff]   ;;  %v10676_v62 = vld [vmem:[%s10592_s30 + $0x60] sm:$0xff]  }
  0x19   : > { %v409_v25 = vor.u32 %v407_v14, %v405_v18  ;;  %v417_v36 = vor.u32 %v415_v27, %v413_v26  ;;  %v429_v38 = vrot.slane %v427_v31, 1  ;;  %v431_v42 = vshrl.u32 %v10622_v23, 16  ;;  %v10685_v14 = vld [vmem:[%s10592_s30 + $0x68] sm:$0xff]  }
  0x1a   : > { %v393_v20 = vor.u32 %v392_v16, %v388_v8  ;;  %v406_v29 = vsel %vm386_vm1, %v401_v21, %v405_v18  ;;  %v425_v37 = vor.u32 %v423_v30, %v421_v34  ;;  %v439_v44 = vshrl.u32 %v10639_v35, 16 }
  0x1b   : > { %v414_v32 = vsel %vm386_vm1, %v409_v25, %v413_v26  ;;  %v422_v41 = vsel %vm386_vm1, %v417_v36, %v421_v34  ;;  %v443_v45 = vshll.u32 %v10643_v39, 16  ;;  %v437_v46 = vrot.slane %v435_v40, 1  ;;  %v10695_v25 = vld [vmem:[%s10592_s30 + $0x70] sm:$0xff]   ;;  %v10698_v26 = vld [vmem:[%s10592_s30 + $0x78] sm:$0xff]  }
  0x1c   : > { %v398_v28 = vsel %vm386_vm1, %v393_v20, %v397_v17  ;;  %v430_v43 = vsel %vm386_vm1, %v425_v37, %v429_v38  ;;  %v433_v49 = vor.u32 %v431_v42, %v429_v38  ;;  %v447_v54 = vshrl.u32 %v10643_v39, 16 }
  0x1d   : > { %9100 = vmatprep.mubr.msk.bf16.mxu0 %vm535_vm2, %v398_v28  ;;  %v441_v51 = vor.u32 %v439_v44, %v437_v46  ;;  %v445_v52 = vrot.slane %v443_v45, 1  ;;  %v451_v55 = vshll.u32 %v10655_v47, 16  ;;  %v459_v57 = vshll.u32 %v10658_v48, 16  ;;  %v10715_v45 = vld [vmem:[%s10592_s30 + $0x88] sm:$0xff]  }
  0x1e   : > { %9101 = vmatmul.mubr.msk.bf16.vlgmr.msra.gmra.mrb[0].mxu0 %vm535_vm2, %v406_v29  ;;  %v438_v56 = vsel %vm386_vm1, %v433_v49, %v437_v46  ;;  %v467_v58 = vshll.u32 %v10662_v50, 16  ;;  %v455_v60 = vshrl.u32 %v10655_v47, 16  ;;  %v475_v61 = vshll.u32 %v10665_v53, 16 }
  0x1f   : > { %9137 = vmatpush3.bf16.msra.mxu0 %v808_v24  ;;  %9104 = vmatprep.mubr.msk.bf16.mxu0 %vm535_vm2, %v414_v32  ;;  %v446_v59 = vsel %vm386_vm1, %v441_v51, %v445_v52  ;;  %v449_v63 = vor.u32 %v447_v54, %v445_v52  ;;  %v453_v0 = vrot.slane %v451_v55, 1  ;;  %v463_v1 = vshrl.u32 %v10658_v48, 16 }
  0x20   : > { %10360 = vmatprep.subr.msk.bf16.mxu0 %vm590_vm0, %v10635_v33  ;;  %v461_v2 = vrot.slane %v459_v57, 1  ;;  %v469_v3 = vrot.slane %v467_v58, 1  ;;  %v471_v8 = vshrl.u32 %v10662_v50, 16  ;;  %v479_v9 = vshrl.u32 %v10665_v53, 16 }
  0x21   : > { %v457_v10 = vor.u32 %v455_v60, %v453_v0  ;;  %v477_v11 = vrot.slane %v475_v61, 1  ;;  %v483_v12 = vshll.u32 %v10676_v62, 16  ;;  %v454_v16 = vsel %vm386_vm1, %v449_v63, %v453_v0  ;;  %v10726_v58 = vld [vmem:[%s10592_s30 + $0x90] ss:$0 sps:$4 sm:$0x11]  }
  0x22   : > { %v487_v18 = vshrl.u32 %v10676_v62, 16  ;;  %v491_v19 = vshll.u32 %v10685_v14, 16  ;;  %v465_v20 = vor.u32 %v463_v1, %v461_v2  ;;  %v495_v22 = vshrl.u32 %v10685_v14, 16 }
  0x23   : > { %v462_v17 = vsel %vm386_vm1, %v457_v10, %v461_v2  ;;  %v485_v21 = vrot.slane %v483_v12, 1  ;;  %v473_v24 = vor.u32 %v471_v8, %v469_v3  ;;  %v499_v30 = vshll.u32 %v10695_v25, 16  ;;  %v8292_v10 = vld [vmem:[%s12843_s1 + $0xc] sm:$0xf] }
  0x24   : > { %v470_v27 = vsel %vm386_vm1, %v465_v20, %v469_v3  ;;  %v493_v29 = vrot.slane %v491_v19, 1  ;;  %v481_v31 = vor.u32 %v479_v9, %v477_v11  ;;  %v503_v32 = vshrl.u32 %v10695_v25, 16 }
  0x25   : > { %v478_v28 = vsel %vm386_vm1, %v473_v24, %v477_v11  ;;  %v507_v34 = vshll.u32 %v10698_v26, 16  ;;  %v489_v36 = vor.u32 %v487_v18, %v485_v21  ;;  %v501_v40 = vrot.slane %v499_v30, 1 }
  0x26   : > { %9105 = vmatmul.mubr.msk.bf16.gmra.mrb[4].mxu0 %vm535_vm2, %v422_v41  ;;  %v486_v37 = vsel %vm386_vm1, %v481_v31, %v485_v21  ;;  %v10711_v41 = vld [vmem:[%s10592_s30 + $0x80] sm:$0xff]   ;;  %v497_v42 = vor.u32 %v495_v22, %v493_v29  ;;  %v511_v51 = vshrl.u32 %v10698_v26, 16  ;;  %v523_v55 = vshll.u32 %v10715_v45, 16 }
  0x27   : > { %9108 = vmatprep.mubr.msk.bf16.mxu0 %vm535_vm2, %v430_v43  ;;  %v494_v38 = vsel %vm386_vm1, %v489_v36, %v493_v29  ;;  %v505_v43 = vor.u32 %v503_v32, %v501_v40  ;;  %v509_v44 = vrot.slane %v507_v34, 1  ;;  %v515_v46 = vshll.u32 %v10711_v41, 16 }
  0x28   : > { %v502_v49 = vsel %vm386_vm1, %v497_v42, %v501_v40  ;;  %v519_v54 = vshrl.u32 %v10711_v41, 16  ;;  %v525_v60 = vrot.slane %v523_v55, 1  ;;  %v527_v63 = vshrl.u32 %v10715_v45, 16  ;;  %v1301_v42 = vld [vmem:[%s10592_s30 + $0x8] sm:$0xe]  ;;  %v10858_v55 = vld [vmem:[%s10592_s30 + $0x20] sm:$0xff]  }
  0x29   : > { %v510_v52 = vsel %vm386_vm1, %v505_v43, %v509_v44  ;;  %v513_v57 = vor.u32 %v511_v51, %v509_v44  ;;  %v531_v0 = vshll.u32 %v10726_v58, 16  ;;  %v1086_v9 = vsel %vm590_vm0, %v10635_v33, 0  ;;  %v10837_v43 = vld [vmem:[%s10592_s30 + $0xc] sm:$0xf] }
  0x2a   : > { %v529_v2 = vor.u32 %v527_v63, %v525_v60  ;;  %v995_v12 = vrot.slane %v10602_v6, 1  ;;  %v1525_v19 = vsel %vm590_vm0, %v8292_v10, 0  ;;  %v1005_v24 = vrot.slane %v10639_v35, 1  ;;  %v10872_v63 = vld [vmem:[%s10592_s30 + $0x30] sm:$0xff]  }
  0x2b   : > { %v533_v3 = vrot.slane %v531_v0, 1  ;;  %v1011_v29 = vrot.slane %v10658_v48, 1  ;;  %v10842_v44 = vcombine.low %v1301_v42, %v10837_v43  ;;  %v10877_v0 = vld [vmem:[%s12843_s1 + $0x14] sm:$0xf] }
  0x2d   : > { %v534_v8 = vsel %vm386_vm1, %v529_v2, %v533_v3  ;;  %v1442_v2 = vrot.slane %v10872_v63, 1 }
  0x2e   : > { %9109 = vmatmul.mubr.msk.bf16.gmra.mrb[8].mxu0 %vm535_vm2, %v438_v56  ;;  %v517_v56 = vrot.slane %v515_v46, 1  ;;  %v10845_v46 = vld [vmem:[%s10592_s30 + $0x10] sm:$0xff]  }
  0x2f   : > { %9112 = vmatprep.mubr.msk.bf16.mxu0 %vm535_vm2, %v446_v59 }
  0x30   : > { %v521_v59 = vor.u32 %v519_v54, %v517_v56  ;;  %v518_v61 = vsel %vm386_vm1, %v513_v57, %v517_v56  ;;  %v1438_v57 = vrot.slane %v10858_v55, 1 }
  0x32   : > { %v526_v1 = vsel %vm386_vm1, %v521_v59, %v525_v60  ;;  %v10866_v59 = vld [vmem:[%s10592_s30 + $0x28] sm:$0xff]  }
  0x36   : > { %9113 = vmatmul.mubr.msk.bf16.gmra.mrb[12].mxu0 %vm535_vm2, %v454_v16 }
  0x37   : > { %9116 = vmatprep.mubr.msk.bf16.mxu0 %vm535_vm2, %v462_v17  ;;  %v997_v17 = vrot.slane %v10605_v7, 1 }
  0x39   : > { %v998_v18 = vsel %vm993_vm3, %v995_v12, %v997_v17 }
  0x3e   : > { %9117 = vmatmul.mubr.msk.bf16.gmra.mrb[16].mxu0 %vm535_vm2, %v470_v27  ;;  %v1007_v27 = vrot.slane %v10643_v39, 1 }
  0x3f   : > { %9120 = vmatprep.mubr.msk.bf16.mxu0 %vm535_vm2, %v478_v28 }
  0x46   : > { %9121 = vmatmul.mubr.msk.bf16.gmra.mrb[20].mxu0 %vm535_vm2, %v486_v37  ;;  %v1023_v37 = vrot.slane %v10698_v26, 1 }
  0x47   : > { %9124 = vmatprep.mubr.msk.bf16.mxu0 %vm535_vm2, %v494_v38 }
  0x4e   : > { %9125 = vmatmul.mubr.msk.bf16.gmra.mrb[24].mxu0 %vm535_vm2, %v502_v49  ;;  %v1434_v49 = vrot.slane %v10845_v46, 1 }
  0x4f   : > { %9128 = vmatprep.mubr.msk.bf16.mxu0 %vm535_vm2, %v510_v52  ;;  %v10854_v52 = vld [vmem:[%s10592_s30 + $0x18] sm:$0xff]  }
  0x50   : > { %v1436_v56 = vrot.slane %v10854_v52, 1 }
  0x56   : > { %9129 = vmatmul.mubr.msk.bf16.gmra.mrb[28].mxu0 %vm535_vm2, %v518_v61  ;;  %v1439_v61 = vsel %vm993_vm3, %v1436_v56, %v1438_v57 }
  0x57   : > { %9132 = vmatprep.mubr.msk.bf16.mxu0 %vm535_vm2, %v526_v1  ;;  %v1440_v1 = vrot.slane %v10866_v59, 1 }
  0x59   : > { %v1441_v3 = vsel %vm993_vm3, %v1438_v57, %v1440_v1 }
  0x5e   : > { %9133 = vmatmul.mubr.msk.bf16.gmra.mrb[32].mxu0 %vm535_vm2, %v534_v8  ;;  %v10887_v8 = vld [vmem:[%s10592_s30 + $0x38] sm:$0xff]  }
  0x5f   : > { %9138 = vmatprep.mubr.msk.bf16.mxu0 %vm535_vm2, %v10599_v5  ;;  %v987_v5 = vld [vmem:[%s10592_s30] sm:$0xe] }
  0x60   : > { %v8273_v33 = vcombine.low %v987_v5, %v10596_v4  ;;  %v999_v4 = vrot.slane %v10613_v13, 1  ;;  %v1444_v5 = vrot.slane %v10887_v8, 1 }
  0x62   : > { %v994_v11 = vrot.slane %v8273_v33, 1  ;;  %v1000_v20 = vsel %vm993_vm3, %v997_v17, %v999_v4  ;;  %v10903_v17 = vld [vmem:[%s10592_s30 + $0x50] sm:$0xff]  }
  0x64   : > { %v996_v16 = vsel %vm993_vm3, %v994_v11, %v995_v12  ;;  %v1445_v11 = vsel %vm993_vm3, %v1442_v2, %v1444_v5  ;;  %v10899_v12 = vld [vmem:[%s10592_s30 + $0x48] sm:$0xff]  }
  0x66   : > { %9139 = vmatmul.mubr.msk.bf16.vlgmr.msra.gmra.mrb[0].mxu0 %vm535_vm2, %v10602_v6  ;;  %v10791_v6 = vld [vmem:[%s12843_s1 + $0x10] sm:$0xf] }
  0x67   : > { %9175 = vmatpush3.bf16.msra.mxu0 %v1086_v9  ;;  %9142 = vmatprep.mubr.msk.bf16.mxu0 %vm535_vm2, %v10605_v7  ;;  %v1001_v7 = vrot.slane %v10617_v15, 1  ;;  %v1972_v60 = vsel %vm590_vm0, %v10791_v6, 0  ;;  %v1443_v9 = vsel %vm993_vm3, %v1440_v1, %v1442_v2 }
  0x68   : > { %10361 = vmatprep.subr.msk.bf16.mxu0 %vm590_vm0, %v8292_v10  ;;  %v10891_v10 = vld [vmem:[%s10592_s30 + $0x40] sm:$0xff]  }
  0x69   : > { %v1002_v21 = vsel %vm993_vm3, %v999_v4, %v1001_v7  ;;  %v1446_v33 = vrot.slane %v10891_v10, 1  ;;  %v1448_v4 = vrot.slane %v10899_v12, 1 }
  0x6e   : > { %9143 = vmatmul.mubr.msk.bf16.gmra.mrb[4].mxu0 %vm535_vm2, %v10613_v13  ;;  %v1003_v13 = vrot.slane %v10622_v23, 1 }
  0x6f   : > { %9146 = vmatprep.mubr.msk.bf16.mxu0 %vm535_vm2, %v10617_v15  ;;  %v1008_v15 = vsel %vm993_vm3, %v1005_v24, %v1007_v27 }
  0x70   : > { %v1004_v22 = vsel %vm993_vm3, %v1001_v7, %v1003_v13  ;;  %v1006_v28 = vsel %vm993_vm3, %v1003_v13, %v1005_v24  ;;  %v10915_v7 = vld [vmem:[%s10592_s30 + $0x60] sm:$0xff]   ;;  %v10923_v24 = vld [vmem:[%s10592_s30 + $0x68] sm:$0xff]  }
  0x76   : > { %9147 = vmatmul.mubr.msk.bf16.gmra.mrb[8].mxu0 %vm535_vm2, %v10622_v23  ;;  %v1009_v23 = vrot.slane %v10655_v47, 1 }
  0x77   : > { %9150 = vmatprep.mubr.msk.bf16.mxu0 %vm535_vm2, %v10639_v35  ;;  %v1013_v35 = vrot.slane %v10662_v50, 1 }
  0x78   : > { %v1010_v30 = vsel %vm993_vm3, %v1007_v27, %v1009_v23  ;;  %v1012_v31 = vsel %vm993_vm3, %v1009_v23, %v1011_v29 }
  0x79   : > { %v1014_v32 = vsel %vm993_vm3, %v1011_v29, %v1013_v35 }
  0x7e   : > { %9151 = vmatmul.mubr.msk.bf16.gmra.mrb[12].mxu0 %vm535_vm2, %v10643_v39  ;;  %v1015_v39 = vrot.slane %v10665_v53, 1 }
  0x7f   : > { %9154 = vmatprep.mubr.msk.bf16.mxu0 %vm535_vm2, %v10655_v47  ;;  %v1017_v47 = vrot.slane %v10676_v62, 1 }
  0x80   : > { %v1016_v34 = vsel %vm993_vm3, %v1013_v35, %v1015_v39  ;;  %v10939_v35 = vld [vmem:[%s10592_s30 + $0x80] sm:$0xff]  }
  0x81   : > { %v1018_v36 = vsel %vm993_vm3, %v1015_v39, %v1017_v47 }
  0x86   : > { %9155 = vmatmul.mubr.msk.bf16.gmra.mrb[16].mxu0 %vm535_vm2, %v10658_v48  ;;  %v1019_v48 = vrot.slane %v10685_v14, 1 }
  0x87   : > { %9158 = vmatprep.mubr.msk.bf16.mxu0 %vm535_vm2, %v10662_v50 }
  0x88   : > { %v1020_v50 = vsel %vm993_vm3, %v1017_v47, %v1019_v48  ;;  %v10947_v47 = vld [vmem:[%s10592_s30 + $0x88] sm:$0xff]  }
  0x8e   : > { %9159 = vmatmul.mubr.msk.bf16.gmra.mrb[20].mxu0 %vm535_vm2, %v10665_v53  ;;  %v1021_v53 = vrot.slane %v10695_v25, 1 }
  0x8f   : > { %9162 = vmatprep.mubr.msk.bf16.mxu0 %vm535_vm2, %v10676_v62  ;;  %v1025_v62 = vrot.slane %v10711_v41, 1 }
  0x90   : > { %v1022_v38 = vsel %vm993_vm3, %v1019_v48, %v1021_v53  ;;  %v1024_v40 = vsel %vm993_vm3, %v1021_v53, %v1023_v37  ;;  %v10950_v48 = vld [vmem:[%s10592_s30 + $0x90] sm:$0xff]  }
  0x91   : > { %v1466_v53 = vrot.slane %v10950_v48, 1 }
  0x96   : > { %9163 = vmatmul.mubr.msk.bf16.gmra.mrb[24].mxu0 %vm535_vm2, %v10685_v14  ;;  %v1027_v14 = vrot.slane %v10715_v45, 1 }
  0x97   : > { %9166 = vmatprep.mubr.msk.bf16.mxu0 %vm535_vm2, %v10695_v25  ;;  %v1026_v25 = vsel %vm993_vm3, %v1023_v37, %v1025_v62  ;;  %v1748_v37 = vshrl.u32 %v10842_v44, 16 }
  0x9e   : > { %9167 = vmatmul.mubr.msk.bf16.gmra.mrb[28].mxu0 %vm535_vm2, %v10698_v26  ;;  %v1028_v26 = vsel %vm993_vm3, %v1025_v62, %v1027_v14  ;;  %v1759_v62 = vshll.u32 %v10845_v46, 16 }
  0x9f   : > { %9170 = vmatprep.mubr.msk.bf16.mxu0 %vm535_vm2, %v10711_v41  ;;  %v1029_v41 = vrot.slane %v10726_v58, 1  ;;  %v1437_v58 = vsel %vm993_vm3, %v1434_v49, %v1436_v56 }
  0xa1   : > { %v1030_v51 = vsel %vm993_vm3, %v1027_v14, %v1029_v41 }
  0xa6   : > { %9171 = vmatmul.mubr.msk.bf16.gmra.mrb[32].mxu0 %vm535_vm2, %v10715_v45  ;;  %v1433_v45 = vrot.slane %v10842_v44, 1 }
  0xa7   : > { %9176 = vmatprep.mubr.msk.bf16.mxu0 %vm535_vm2, %v996_v16  ;;  %v1447_v16 = vsel %vm993_vm3, %v1444_v5, %v1446_v33 }
  0xa8   : > { %v1435_v54 = vsel %vm993_vm3, %v1433_v45, %v1434_v49  ;;  %v1761_v49 = vrot.slane %v1759_v62, 2 }
  0xae   : > { %9177 = vmatmul.mubr.msk.bf16.vlgmr.msra.gmra.mrb[0].mxu0 %vm535_vm2, %v998_v18  ;;  %v1450_v18 = vrot.slane %v10903_v17, 1 }
  0xaf   : > { %9213 = vmatpush3.bf16.msra.mxu0 %v1525_v19  ;;  %9180 = vmatprep.mubr.msk.bf16.mxu0 %vm535_vm2, %v1000_v20  ;;  %v1449_v19 = vsel %vm993_vm3, %v1446_v33, %v1448_v4  ;;  %v10911_v20 = vld [vmem:[%s10592_s30 + $0x58] sm:$0xff]  }
  0xb0   : > { %10362 = vmatprep.subr.msk.bf16.mxu0 %vm590_vm0, %v10791_v6  ;;  %v1451_v6 = vsel %vm993_vm3, %v1448_v4, %v1450_v18  ;;  %v1452_v13 = vrot.slane %v10911_v20, 1 }
  0xb6   : > { %9181 = vmatmul.mubr.msk.bf16.gmra.mrb[4].mxu0 %vm535_vm2, %v1002_v21  ;;  %v1454_v21 = vrot.slane %v10915_v7, 1 }
  0xb7   : > { %9184 = vmatprep.mubr.msk.bf16.mxu0 %vm535_vm2, %v1004_v22  ;;  %v1453_v22 = vsel %vm993_vm3, %v1450_v18, %v1452_v13  ;;  %v1792_v18 = vshrl.u32 %v10872_v63, 16 }
  0xb8   : > { %v1455_v27 = vsel %vm993_vm3, %v1452_v13, %v1454_v21 }
  0xbe   : > { %9185 = vmatmul.mubr.msk.bf16.gmra.mrb[8].mxu0 %vm535_vm2, %v1006_v28  ;;  %v10927_v28 = vld [vmem:[%s10592_s30 + $0x70] sm:$0xff]  }
  0xbf   : > { %9188 = vmatprep.mubr.msk.bf16.mxu0 %vm535_vm2, %v1008_v15  ;;  %v1456_v15 = vrot.slane %v10923_v24, 1  ;;  %v1458_v23 = vrot.slane %v10927_v28, 1 }
  0xc1   : > { %v1457_v29 = vsel %vm993_vm3, %v1454_v21, %v1456_v15 }
  0xc6   : > { %9189 = vmatmul.mubr.msk.bf16.gmra.mrb[12].mxu0 %vm535_vm2, %v1010_v30  ;;  %v10935_v30 = vld [vmem:[%s10592_s30 + $0x78] sm:$0xff]  }
  0xc7   : > { %9192 = vmatprep.mubr.msk.bf16.mxu0 %vm535_vm2, %v1012_v31  ;;  %v1459_v31 = vsel %vm993_vm3, %v1456_v15, %v1458_v23  ;;  %v1460_v39 = vrot.slane %v10935_v30, 1  ;;  %v1794_v15 = vrot.slane %v1792_v18, 1 }
  0xce   : > { %9193 = vmatmul.mubr.msk.bf16.gmra.mrb[16].mxu0 %vm535_vm2, %v1014_v32  ;;  %v1462_v32 = vrot.slane %v10939_v35, 1 }
  0xcf   : > { %9196 = vmatprep.mubr.msk.bf16.mxu0 %vm535_vm2, %v1016_v34  ;;  %v1461_v34 = vsel %vm993_vm3, %v1458_v23, %v1460_v39 }
  0xd6   : > { %9197 = vmatmul.mubr.msk.bf16.gmra.mrb[20].mxu0 %vm535_vm2, %v1018_v36  ;;  %v1463_v36 = vsel %vm993_vm3, %v1460_v39, %v1462_v32  ;;  %v1801_v39 = vshrl.u32 %v10887_v8, 16 }
  0xd7   : > { %9200 = vmatprep.mubr.msk.bf16.mxu0 %vm535_vm2, %v1020_v50  ;;  %v1464_v50 = vrot.slane %v10947_v47, 1 }
  0xd9   : > { %v1465_v14 = vsel %vm993_vm3, %v1462_v32, %v1464_v50  ;;  %v1467_v42 = vsel %vm993_vm3, %v1464_v50, %v1466_v53  ;;  %v1804_v32 = vshll.u32 %v10887_v8, 16 }
  0xde   : > { %9201 = vmatmul.mubr.msk.bf16.gmra.mrb[24].mxu0 %vm535_vm2, %v1022_v38  ;;  %v1751_v38 = vshll.u32 %v10842_v44, 16  ;;  %v1765_v44 = vshrl.u32 %v10854_v52, 16 }
  0xdf   : > { %9204 = vmatprep.mubr.msk.bf16.mxu0 %vm535_vm2, %v1024_v40  ;;  %v1756_v40 = vshrl.u32 %v10845_v46, 16 }
  0xe0   : > { %v1753_v41 = vrot.slane %v1751_v38, 2  ;;  %v1767_v1 = vrot.slane %v1765_v44, 1 }
  0xe1   : > { %v1758_v45 = vrot.slane %v1756_v40, 1 }
  0xe3   : > { %v1762_v57 = vor.u32 %v1761_v49, %v1758_v45  ;;  %v1831_v45 = vshll.u32 %v10903_v17, 16 }
  0xe6   : > { %9205 = vmatmul.mubr.msk.bf16.gmra.mrb[28].mxu0 %vm535_vm2, %v1026_v25  ;;  %v10427_v25 = vld [vmem:[%s10592_s30 + $0x98] ss:$0 sps:$4 sm:$0x11]  }
  0xe7   : > { %9208 = vmatprep.mubr.msk.bf16.mxu0 %vm535_vm2, %v1028_v26  ;;  %v1750_v26 = vrot.slane %v1748_v37, 1  ;;  %v1806_v37 = vrot.slane %v1804_v32, 2 }
  0xe9   : > { %v1754_v56 = vor.u32 %v1753_v41, %v1750_v26  ;;  %v1828_v41 = vshrl.u32 %v10903_v17, 16 }
  0xee   : > { %9209 = vmatmul.mubr.msk.bf16.gmra.mrb[32].mxu0 %vm535_vm2, %v1030_v51  ;;  %v1468_v51 = vrot.slane %v10427_v25, 1  ;;  %v1822_v25 = vshll.u32 %v10899_v12, 16 }
  0xef   : > { %9214 = vmatprep.mubr.msk.bf16.mxu0 %vm535_vm2, %v1435_v54  ;;  %v1768_v54 = vshll.u32 %v10854_v52, 16 }
  0xf0   : > { %v1824_v44 = vrot.slane %v1822_v25, 2 }
  0xf1   : > { %v1770_v2 = vrot.slane %v1768_v54, 2 }
  0xf3   : > { %v1771_v33 = vor.u32 %v1770_v2, %v1767_v1  ;;  %v1846_v2 = vshrl.u32 %v10915_v7, 16 }
  0xf6   : > { %9215 = vmatmul.mubr.msk.bf16.vlgmr.msra.gmra.mrb[0].mxu0 %vm535_vm2, %v1437_v58  ;;  %v1774_v58 = vshrl.u32 %v10858_v55, 16 }
  0xf7   : > { %9251 = vmatpush3.bf16.msra.mxu0 %v1972_v60  ;;  %9218 = vmatprep.mubr.msk.bf16.mxu0 %vm535_vm2, %v1439_v61  ;;  %v1777_v60 = vshll.u32 %v10858_v55, 16  ;;  %v1469_v61 = vsel %vm993_vm3, %v1466_v53, %v1468_v51  ;;  %v1803_v53 = vrot.slane %v1801_v39, 1 }
  0xf8   : > { %10363 = vmatprep.subr.msk.bf16.mxu0 %vm590_vm0, %v10877_v0 }
  0xf9   : > { %v1779_v5 = vrot.slane %v1777_v60, 2  ;;  %v1837_v60 = vshrl.u32 %v10911_v20, 16 }
  0xfe   : > { %9219 = vmatmul.mubr.msk.bf16.gmra.mrb[4].mxu0 %vm535_vm2, %v1441_v3  ;;  %v1763_v3 = vsel %vm1746_vm4, %v1754_v56, %v1762_v57  ;;  %v1830_v56 = vrot.slane %v1828_v41, 1  ;;  %v1891_v41 = vshrl.u32 %v10947_v47, 16 }
  0xff   : > { %9222 = vmatprep.mubr.msk.bf16.mxu0 %vm535_vm2, %v1443_v9  ;;  %v1776_v9 = vrot.slane %v1774_v58, 1 }
 0x101   : > { %v1780_v4 = vor.u32 %v1779_v5, %v1776_v9  ;;  %v1839_v5 = vrot.slane %v1837_v60, 1 }
 0x106   : > { %9223 = vmatmul.mubr.msk.bf16.gmra.mrb[8].mxu0 %vm535_vm2, %v1445_v11  ;;  %v1783_v11 = vshrl.u32 %v10866_v59, 16 }
 0x107   : > { %9226 = vmatprep.mubr.msk.bf16.mxu0 %vm535_vm2, %v1447_v16  ;;  %v1786_v16 = vshll.u32 %v10866_v59, 16 }
 0x108   : > { %v1785_v13 = vrot.slane %v1783_v11, 1 }
 0x109   : > { %v1788_v21 = vrot.slane %v1786_v16, 2  ;;  %v1848_v16 = vrot.slane %v1846_v2, 1 }
 0x10e   : > { %9227 = vmatmul.mubr.msk.bf16.gmra.mrb[12].mxu0 %vm535_vm2, %v1449_v19  ;;  %v1795_v19 = vshll.u32 %v10872_v63, 16 }
 0x10f   : > { %9230 = vmatprep.mubr.msk.bf16.mxu0 %vm535_vm2, %v1451_v6  ;;  %v1772_v6 = vsel %vm1746_vm4, %v1762_v57, %v1771_v33  ;;  %v1833_v57 = vrot.slane %v1831_v45, 2  ;;  %v1894_v45 = vshll.u32 %v10947_v47, 16 }
 0x110   : > { %v1797_v23 = vrot.slane %v1795_v19, 2  ;;  %v1855_v19 = vshrl.u32 %v10923_v24, 16 }
 0x111   : > { %v1834_v1 = vor.u32 %v1833_v57, %v1830_v56  ;;  %v1893_v56 = vrot.slane %v1891_v41, 1  ;;  %v1896_v57 = vrot.slane %v1894_v45, 2  ;;  %v11110_v41 = vld [vmem:[%s10592_s30 + $0x14] sm:$0xf] }
 0x113   : > { %v1897_v2 = vor.u32 %v1896_v57, %v1893_v56  ;;  %v11131_v57 = vld [vmem:[%s10592_s30 + $0x28] sm:$0xff]  }
 0x116   : > { %9231 = vmatmul.mubr.msk.bf16.gmra.mrb[16].mxu0 %vm535_vm2, %v1453_v22  ;;  %v2286_v22 = vsel %vm590_vm0, %v10877_v0, 0  ;;  %v1798_v0 = vor.u32 %v1797_v23, %v1794_v15  ;;  %v1857_v15 = vrot.slane %v1855_v19, 1 }
 0x117   : > { %9234 = vmatprep.mubr.msk.bf16.mxu0 %vm535_vm2, %v1455_v27  ;;  %v1781_v27 = vsel %vm1746_vm4, %v1771_v33, %v1780_v4 }
 0x11e   : > { %9235 = vmatmul.mubr.msk.bf16.gmra.mrb[20].mxu0 %vm535_vm2, %v1457_v29  ;;  %v10985_v29 = vld [vmem:[%s12843_s1 + $0x18] sm:$0xf] }
 0x11f   : > { %9238 = vmatprep.mubr.msk.bf16.mxu0 %vm535_vm2, %v1459_v31  ;;  %v1789_v31 = vor.u32 %v1788_v21, %v1785_v13  ;;  %v1864_v21 = vshrl.u32 %v10927_v28, 16 }
 0x121   : > { %v1790_v50 = vsel %vm1746_vm4, %v1780_v4, %v1789_v31  ;;  %v1799_v38 = vsel %vm1746_vm4, %v1789_v31, %v1798_v0  ;;  %v1866_v39 = vrot.slane %v1864_v21, 1  ;;  %v2195_v21 = vrot.slane %v10845_v46, 2 }
 0x126   : > { %9239 = vmatmul.mubr.msk.bf16.gmra.mrb[24].mxu0 %vm535_vm2, %v1461_v34  ;;  %v1810_v34 = vshrl.u32 %v10891_v10, 16 }
 0x127   : > { %9242 = vmatprep.mubr.msk.bf16.mxu0 %vm535_vm2, %v1463_v36  ;;  %v1813_v36 = vshll.u32 %v10891_v10, 16 }
 0x128   : > { %v1812_v40 = vrot.slane %v1810_v34, 1  ;;  %v1873_v34 = vshrl.u32 %v10935_v30, 16 }
 0x129   : > { %v1815_v62 = vrot.slane %v1813_v36, 2  ;;  %v1876_v36 = vshll.u32 %v10935_v30, 16 }
 0x12b   : > { %v1816_v26 = vor.u32 %v1815_v62, %v1812_v40  ;;  %v1875_v40 = vrot.slane %v1873_v34, 1  ;;  %v1878_v62 = vrot.slane %v1876_v36, 2  ;;  %v2207_v34 = vrot.slane %v10891_v10, 2 }
 0x12c   : > { %v2215_v10 = vrot.slane %v10915_v7, 2 }
 0x12e   : > { %9243 = vmatmul.mubr.msk.bf16.gmra.mrb[28].mxu0 %vm535_vm2, %v1465_v14  ;;  %v1807_v14 = vor.u32 %v1806_v37, %v1803_v53  ;;  %v1882_v53 = vshrl.u32 %v10939_v35, 16  ;;  %v1885_v37 = vshll.u32 %v10939_v35, 16 }
 0x12f   : > { %9246 = vmatprep.mubr.msk.bf16.mxu0 %vm535_vm2, %v1467_v42  ;;  %v1819_v42 = vshrl.u32 %v10899_v12, 16 }
 0x130   : > { %v1808_v49 = vsel %vm1746_vm4, %v1798_v0, %v1807_v14  ;;  %v1817_v54 = vsel %vm1746_vm4, %v1807_v14, %v1816_v26  ;;  %v1887_v25 = vrot.slane %v1885_v37, 2 }
 0x131   : > { %v1821_v51 = vrot.slane %v1819_v42, 1  ;;  %v1884_v42 = vrot.slane %v1882_v53, 1 }
 0x133   : > { %v1825_v58 = vor.u32 %v1824_v44, %v1821_v51  ;;  %v1900_v51 = vshrl.u32 %v10950_v48, 16  ;;  %v1903_v44 = vshll.u32 %v10950_v48, 16 }
 0x135   : > { %v1826_v9 = vsel %vm1746_vm4, %v1816_v26, %v1825_v58  ;;  %v1835_v11 = vsel %vm1746_vm4, %v1825_v58, %v1834_v1  ;;  %v1879_v26 = vor.u32 %v1878_v62, %v1875_v40  ;;  %v11037_v58 = vld [vmem:[%s10592_s30 + $0x98] ss:$0 sps:$4 sm:$0x33]  }
 0x136   : > { %9247 = vmatmul.mubr.msk.bf16.gmra.mrb[32].mxu0 %vm535_vm2, %v1469_v61  ;;  %v1840_v61 = vshll.u32 %v10911_v20, 16 }
 0x137   : > { %9252 = vmatprep.mubr.msk.bf16.mxu0 %vm535_vm2, %v1763_v3  ;;  %v1849_v3 = vshll.u32 %v10915_v7, 16  ;;  %v2221_v7 = vrot.slane %v10935_v30, 2 }
 0x138   : > { %v1842_v33 = vrot.slane %v1840_v61, 2  ;;  %v1902_v61 = vrot.slane %v1900_v51, 1 }
 0x139   : > { %v1851_v4 = vrot.slane %v1849_v3, 2  ;;  %v1909_v3 = vshrl.u32 %v11037_v58, 16 }
 0x13a   : > { %v1843_v18 = vor.u32 %v1842_v33, %v1839_v5  ;;  %v2187_v33 = vld [vmem:[%s10592_s30 + $0x8] sm:$0xc] }
 0x13b   : > { %v1852_v13 = vor.u32 %v1851_v4, %v1848_v16  ;;  %v1911_v16 = vrot.slane %v1909_v3, 1  ;;  %v8351_v19 = vcombine.low %v2187_v33, %v10837_v43  ;;  %v2199_v43 = vrot.slane %v10858_v55, 2 }
 0x13c   : > { %v2203_v55 = vrot.slane %v10872_v63, 2  ;;  %v2209_v63 = vrot.slane %v10899_v12, 2  ;;  %v2217_v12 = vrot.slane %v10923_v24, 2 }
 0x13d   : > { %v1853_v31 = vsel %vm1746_vm4, %v1843_v18, %v1852_v13 }
 0x13e   : > { %9253 = vmatmul.mubr.msk.bf16.vlgmr.msra.gmra.mrb[0].mxu0 %vm535_vm2, %v1772_v6  ;;  %v1858_v6 = vshll.u32 %v10923_v24, 16  ;;  %v2210_v53 = vsel %vm2193_vm5, %v2207_v34, %v2209_v63  ;;  %v2218_v62 = vsel %vm2193_vm5, %v2215_v10, %v2217_v12  ;;  %v2225_v24 = vrot.slane %v10947_v47, 2 }
 0x13f   : > { %9289 = vmatpush3.bf16.msra.mxu0 %v2286_v22  ;;  %9256 = vmatprep.mubr.msk.bf16.mxu0 %vm535_vm2, %v1781_v27  ;;  %v1867_v22 = vshll.u32 %v10927_v28, 16  ;;  %v1844_v27 = vsel %vm1746_vm4, %v1834_v1, %v1843_v18  ;;  %v1905_v1 = vrot.slane %v1903_v44, 2  ;;  %v2229_v47 = vrot.slane %v11037_v58, 2 }
 0x140   : > { %10364 = vmatprep.subr.msk.bf16.mxu0 %vm590_vm0, %v10985_v29  ;;  %v1860_v23 = vrot.slane %v1858_v6, 2 }
 0x141   : > { %v1869_v32 = vrot.slane %v1867_v22, 2  ;;  %v1906_v5 = vor.u32 %v1905_v1, %v1902_v61  ;;  %v11139_v1 = vld [vmem:[%s10592_s30 + $0x30] sm:$0xff]  }
 0x142   : > { %v1861_v0 = vor.u32 %v1860_v23, %v1857_v15  ;;  %v2197_v15 = vrot.slane %v10854_v52, 2  ;;  %v2201_v52 = vrot.slane %v10866_v59, 2  ;;  %v2640_v33 = vrot.slane %v11139_v1, 2 }
 0x143   : > { %v1907_v18 = vsel %vm1746_vm4, %v1897_v2, %v1906_v5 }
 0x144   : > { %v2198_v23 = vsel %vm2193_vm5, %v2195_v21, %v2197_v15  ;;  %v2200_v46 = vsel %vm2193_vm5, %v2197_v15, %v2199_v43  ;;  %v11176_v15 = vld [vmem:[%s10592_s30 + $0x58] sm:$0xff]  }
 0x146   : > { %9257 = vmatmul.mubr.msk.bf16.gmra.mrb[4].mxu0 %vm535_vm2, %v1790_v50  ;;  %v1870_v50 = vor.u32 %v1869_v32, %v1866_v39  ;;  %v11064_v39 = vld [vmem:[%s12843_s1 + $0x1c] sm:$0xf]  ;;  %v2204_v32 = vsel %vm2193_vm5, %v2201_v52, %v2203_v55 }
 0x147   : > { %9260 = vmatprep.mubr.msk.bf16.mxu0 %vm535_vm2, %v1799_v38  ;;  %v1862_v38 = vsel %vm1746_vm4, %v1852_v13, %v1861_v0  ;;  %v2194_v13 = vrot.slane %v8351_v19, 2  ;;  %v11164_v19 = vld [vmem:[%s10592_s30 + $0x48] sm:$0xff]  }
 0x148   : > { %v1871_v14 = vsel %vm1746_vm4, %v1861_v0, %v1870_v50  ;;  %v2205_v0 = vrot.slane %v10887_v8, 2  ;;  %v2213_v8 = vrot.slane %v10911_v20, 2 }
 0x14a   : > { %v2206_v36 = vsel %vm2193_vm5, %v2203_v55, %v2205_v0  ;;  %v2208_v59 = vsel %vm2193_vm5, %v2205_v0, %v2207_v34  ;;  %v2216_v40 = vsel %vm2193_vm5, %v2213_v8, %v2215_v10  ;;  %v11196_v0 = vld [vmem:[%s10592_s30 + $0x70] sm:$0xff]  }
 0x14e   : > { %9261 = vmatmul.mubr.msk.bf16.gmra.mrb[8].mxu0 %vm535_vm2, %v1808_v49  ;;  %v1888_v49 = vor.u32 %v1887_v25, %v1884_v42 }
 0x14f   : > { %9264 = vmatprep.mubr.msk.bf16.mxu0 %vm535_vm2, %v1817_v54  ;;  %v1880_v54 = vsel %vm1746_vm4, %v1870_v50, %v1879_v26  ;;  %v2211_v50 = vrot.slane %v10903_v17, 2  ;;  %v2219_v17 = vrot.slane %v10927_v28, 2  ;;  %v2227_v28 = vrot.slane %v10950_v48, 2 }
 0x150   : > { %v1889_v60 = vsel %vm1746_vm4, %v1879_v26, %v1888_v49  ;;  %v2501_v26 = vld [vmem:[%s10592_s30 + $0x10] sm:$0xc] }
 0x151   : > { %v2212_v37 = vsel %vm2193_vm5, %v2209_v63, %v2211_v50  ;;  %v2220_v20 = vsel %vm2193_vm5, %v2217_v12, %v2219_v17  ;;  %v2222_v42 = vsel %vm2193_vm5, %v2219_v17, %v2221_v7  ;;  %v11115_v45 = vcombine.low %v2501_v26, %v11110_v41  ;;  %v3782_v63 = vld [vmem:[%s12847_s5 + $0x10] sm:$0xff]  ;;  %v11224_v12 = vld [vmem:[%s10592_s30 + $0x88] sm:$0xff]   ;;  %v3783_v17 = vld [vmem:[%s12847_s5 + $0x18] sm:$0xff] }
 0x152   : > { %v2230_v44 = vsel %vm2193_vm5, %v2227_v28, %v2229_v47 }
 0x153   : > { %v2633_v48 = vrot.slane %v11115_v45, 2 }
 0x156   : > { %9265 = vmatmul.mubr.msk.bf16.gmra.mrb[12].mxu0 %vm535_vm2, %v1826_v9  ;;  %v1912_v9 = vshll.u32 %v11037_v58, 16  ;;  %v2638_v58 = vrot.slane %v11131_v57, 2 }
 0x157   : > { %9268 = vmatprep.mubr.msk.bf16.mxu0 %vm535_vm2, %v1835_v11  ;;  %v1898_v11 = vsel %vm1746_vm4, %v1888_v49, %v1897_v2  ;;  %v11118_v49 = vld [vmem:[%s10592_s30 + $0x18] sm:$0xff]   ;;  %v3172_v2 = vsel %vm590_vm0, %v11064_v39, 0 }
 0x158   : > { %v1914_v4 = vrot.slane %v1912_v9, 2  ;;  %v2634_v51 = vrot.slane %v11118_v49, 2  ;;  %v11145_v9 = vld [vmem:[%s10592_s30 + $0x38] sm:$0xff]  }
 0x15a   : > { %v1915_v6 = vor.u32 %v1914_v4, %v1911_v16  ;;  %v2635_v56 = vsel %vm2193_vm5, %v2633_v48, %v2634_v51  ;;  %v2641_v16 = vsel %vm2193_vm5, %v2638_v58, %v2640_v33  ;;  %v11160_v4 = vld [vmem:[%s10592_s30 + $0x40] sm:$0xff]  }
 0x15c   : > { %v1916_v22 = vsel %vm1746_vm4, %v1906_v5, %v1915_v6  ;;  %v11150_v5 = vld [vmem:[%s12843_s1 + $0x20] sm:$0xf]  ;;  %v2644_v6 = vrot.slane %v11160_v4, 2 }
 0x15e   : > { %9269 = vmatmul.mubr.msk.bf16.gmra.mrb[16].mxu0 %vm535_vm2, %v1844_v27  ;;  %v2196_v27 = vsel %vm2193_vm5, %v2194_v13, %v2195_v21  ;;  %v2646_v13 = vrot.slane %v11164_v19, 2 }
 0x15f   : > { %9272 = vmatprep.mubr.msk.bf16.mxu0 %vm535_vm2, %v1853_v31  ;;  %v2725_v31 = vsel %vm590_vm0, %v10985_v29, 0  ;;  %v2202_v29 = vsel %vm2193_vm5, %v2199_v43, %v2201_v52  ;;  %v11188_v52 = vld [vmem:[%s10592_s30 + $0x68] sm:$0xff]  }
 0x166   : > { %9273 = vmatmul.mubr.msk.bf16.gmra.mrb[20].mxu0 %vm535_vm2, %v1862_v38  ;;  %v2214_v38 = vsel %vm2193_vm5, %v2211_v50, %v2213_v8  ;;  %v2656_v50 = vrot.slane %v11196_v0, 2  ;;  %v3781_v8 = vld [vmem:[%s12847_s5 + $0x8] sm:$0xff] }
 0x167   : > { %9276 = vmatprep.mubr.msk.bf16.mxu0 %vm535_vm2, %v1871_v14  ;;  %v2223_v14 = vrot.slane %v10939_v35, 2  ;;  %v2228_v35 = vsel %vm2193_vm5, %v2225_v24, %v2227_v28  ;;  %v11247_v28 = vld [vmem:[%s10592_s30 + $0x98] sm:$0xff]  }
 0x168   : > { %v2666_v48 = vrot.slane %v11247_v28, 2 }
 0x169   : > { %v2224_v25 = vsel %vm2193_vm5, %v2221_v7, %v2223_v14  ;;  %v2226_v30 = vsel %vm2193_vm5, %v2223_v14, %v2225_v24  ;;  %v2662_v7 = vrot.slane %v11224_v12, 2  ;;  %v3785_v14 = vld [vmem:[%s12847_s5 + $0x28] sm:$0xff]  ;;  %v11244_v24 = vld [vmem:[%s10592_s30 + $0x90] sm:$0xff]  }
 0x16a   : > { %v2664_v47 = vrot.slane %v11244_v24, 2 }
 0x16e   : > { %9277 = vmatmul.mubr.msk.bf16.gmra.mrb[24].mxu0 %vm535_vm2, %v1880_v54  ;;  %v11127_v54 = vld [vmem:[%s10592_s30 + $0x20] sm:$0xff]  }
 0x16f   : > { %9280 = vmatprep.mubr.msk.bf16.mxu0 %vm535_vm2, %v1889_v60  ;;  %v2636_v60 = vrot.slane %v11127_v54, 2 }
 0x171   : > { %v2637_v61 = vsel %vm2193_vm5, %v2634_v51, %v2636_v60  ;;  %v2639_v3 = vsel %vm2193_vm5, %v2636_v60, %v2638_v58  ;;  %v2948_v51 = vshrl.u32 %v11115_v45, 16  ;;  %v2959_v60 = vshll.u32 %v11118_v49, 16  ;;  %v3789_v58 = vld [vmem:[%s12847_s5 + $0x48] sm:$0xff] }
 0x176   : > { %9281 = vmatmul.mubr.msk.bf16.gmra.mrb[28].mxu0 %vm535_vm2, %v1898_v11  ;;  %v2642_v11 = vrot.slane %v11145_v9, 2 }
 0x177   : > { %9284 = vmatprep.mubr.msk.bf16.mxu0 %vm535_vm2, %v1907_v18 }
 0x178   : > { %v2643_v18 = vsel %vm2193_vm5, %v2640_v33, %v2642_v11  ;;  %v2645_v21 = vsel %vm2193_vm5, %v2642_v11, %v2644_v6  ;;  %v10448_v33 = vld [vmem:[%s10592_s30 + $0xa0] ss:$0 sps:$4 sm:$0x33]  }
 0x17e   : > { %9285 = vmatmul.mubr.msk.bf16.gmra.mrb[32].mxu0 %vm535_vm2, %v1916_v22  ;;  %v11172_v22 = vld [vmem:[%s10592_s30 + $0x50] sm:$0xff]  }
 0x17f   : > { %9290 = vmatprep.mubr.msk.bf16.mxu0 %vm535_vm2, %v2196_v27  ;;  %v2647_v27 = vsel %vm2193_vm5, %v2644_v6, %v2646_v13  ;;  %v2648_v43 = vrot.slane %v11172_v22, 2  ;;  %v3791_v6 = vld [vmem:[%s12847_s5 + $0x58] sm:$0xff] }
 0x186   : > { %9291 = vmatmul.mubr.msk.bf16.vlgmr.msra.gmra.mrb[0].mxu0 %vm535_vm2, %v2198_v23  ;;  %v2650_v23 = vrot.slane %v11176_v15, 2 }
 0x187   : > { %9327 = vmatpush3.bf16.msra.mxu0 %v2725_v31  ;;  %9294 = vmatprep.mubr.msk.bf16.mxu0 %vm535_vm2, %v2200_v46  ;;  %v2649_v31 = vsel %vm2193_vm5, %v2646_v13, %v2648_v43  ;;  %v11184_v46 = vld [vmem:[%s10592_s30 + $0x60] sm:$0xff]  }
 0x188   : > { %10365 = vmatprep.subr.msk.bf16.mxu0 %vm590_vm0, %v11064_v39  ;;  %v2651_v39 = vsel %vm2193_vm5, %v2648_v43, %v2650_v23  ;;  %v2652_v55 = vrot.slane %v11184_v46, 2  ;;  %v3792_v13 = vld [vmem:[%s12847_s5 + $0x60] sm:$0xff]  ;;  %v2968_v43 = vshll.u32 %v11127_v54, 16 }
 0x18e   : > { %9295 = vmatmul.mubr.msk.bf16.gmra.mrb[4].mxu0 %vm535_vm2, %v2202_v29  ;;  %v2654_v29 = vrot.slane %v11188_v52, 2 }
 0x18f   : > { %9298 = vmatprep.mubr.msk.bf16.mxu0 %vm535_vm2, %v2204_v32  ;;  %v2653_v32 = vsel %vm2193_vm5, %v2650_v23, %v2652_v55 }
 0x190   : > { %v2655_v34 = vsel %vm2193_vm5, %v2652_v55, %v2654_v29  ;;  %v2657_v10 = vsel %vm2193_vm5, %v2654_v29, %v2656_v50  ;;  %v2977_v55 = vshll.u32 %v11131_v57, 16  ;;  %v3793_v29 = vld [vmem:[%s12847_s5 + $0x68] sm:$0xff] }
 0x196   : > { %9299 = vmatmul.mubr.msk.bf16.gmra.mrb[8].mxu0 %vm535_vm2, %v2206_v36  ;;  %v11200_v36 = vld [vmem:[%s10592_s30 + $0x78] sm:$0xff]  }
 0x197   : > { %9302 = vmatprep.mubr.msk.bf16.mxu0 %vm535_vm2, %v2208_v59  ;;  %v3780_v59 = vld [vmem:[%s12847_s5] sm:$0xff] }
 0x19e   : > { %9303 = vmatmul.mubr.msk.bf16.gmra.mrb[12].mxu0 %vm535_vm2, %v2210_v53  ;;  %v10533_v53 = vmov 0  }
 0x19f   : > { %9306 = vmatprep.mubr.msk.bf16.mxu0 %vm535_vm2, %v2212_v37  ;;  %10387 = vset.pattern.permute.xlu0 %v10533_v53  ;;  %4033 = vst.msk [vmem:[#allocation2] sm:$0xf] %vm4032_vm6, %v10533_v53  ;;  %4034 = vst.msk [vmem:[#allocation2 + $0x4] sm:$0xf] %vm4032_vm6, %v10533_v53  ;;  %v2658_v37 = vrot.slane %v11200_v36, 2 }
 0x1a0   : > { %4047 = vst.msk [vmem:[#allocation2 + $0x9c] sm:$0xf] %vm4032_vm6, %v10533_v53  ;;  %3818 = vperm.xlu0 %10387, %v3780_v59   ;;  %10388 = vset.pattern.permute.xlu1 %v10533_v53 }
 0x1a1   : > { %4049 = vst.msk [vmem:[#allocation2 + $0xa0] sm:$0x7] %vm4048_vm7, %v10533_v53  ;;  %3828 = vperm.xlu1 %10388, %v3782_v63   ;;  %v2970_v63 = vrot.slane %v2968_v43, 3  ;;  %v3803_v43 = vld [vmem:[%s12847_s5 + $0xb8] sm:$0xff] }
 0x1a4   : > { %3823 = vperm.xlu0 %10387, %v3781_v8   ;;  %v3795_v8 = vld [vmem:[%s12847_s5 + $0x78] sm:$0xff] }
 0x1a5   : > { %3833 = vperm.xlu1 %10388, %v3783_v17   ;;  %v2983_v17 = vshrl.u32 %v11139_v1, 16 }
 0x1a6   : > { %9307 = vmatmul.mubr.msk.bf16.gmra.mrb[16].mxu0 %vm535_vm2, %v2214_v38  ;;  %v11220_v38 = vld [vmem:[%s10592_s30 + $0x80] sm:$0xff]  }
 0x1a7   : > { %9310 = vmatprep.mubr.msk.bf16.mxu0 %vm535_vm2, %v2216_v40  ;;  %v2659_v40 = vsel %vm2193_vm5, %v2656_v50, %v2658_v37 }
 0x1a9   : > { %3843 = vperm.xlu1 %10388, %v3785_v14   ;;  %v2995_v14 = vshll.u32 %v11145_v9, 16 }
 0x1ae   : > { %9311 = vmatmul.mubr.msk.bf16.gmra.mrb[20].mxu0 %vm535_vm2, %v2218_v62  ;;  %v3784_v62 = vld [vmem:[%s12847_s5 + $0x20] sm:$0xff] }
 0x1af   : > { %9314 = vmatprep.mubr.msk.bf16.mxu0 %vm535_vm2, %v2220_v20  ;;  %v2660_v20 = vrot.slane %v11220_v38, 2  ;;  %3838 = vperm.xlu0 %10387, %v3784_v62   ;;  %v2986_v62 = vshll.u32 %v11139_v1, 16 }
 0x1b1   : > { %v2663_v26 = vsel %vm2193_vm5, %v2660_v20, %v2662_v7 }
 0x1b6   : > { %9315 = vmatmul.mubr.msk.bf16.gmra.mrb[24].mxu0 %vm535_vm2, %v2222_v42  ;;  %v3786_v42 = vld [vmem:[%s12847_s5 + $0x30] sm:$0xff] }
 0x1b7   : > { %9318 = vmatprep.mubr.msk.bf16.mxu0 %vm535_vm2, %v2224_v25  ;;  %v2661_v25 = vsel %vm2193_vm5, %v2658_v37, %v2660_v20  ;;  %3848 = vperm.xlu0 %10387, %v3786_v42   ;;  %v2979_v37 = vrot.slane %v2977_v55, 3  ;;  %v3797_v42 = vld [vmem:[%s12847_s5 + $0x88] sm:$0xff]  ;;  %v3022_v55 = vshll.u32 %v11172_v22, 16 }
 0x1be   : > { %9319 = vmatmul.mubr.msk.bf16.gmra.mrb[28].mxu0 %vm535_vm2, %v2226_v30  ;;  %v3787_v30 = vld [vmem:[%s12847_s5 + $0x38] sm:$0xff] }
 0x1bf   : > { %9322 = vmatprep.mubr.msk.bf16.mxu0 %vm535_vm2, %v2228_v35  ;;  %v3788_v35 = vld [vmem:[%s12847_s5 + $0x40] sm:$0xff]  ;;  %3853 = vperm.xlu1 %10388, %v3787_v30   ;;  %v2985_v30 = vrot.slane %v2983_v17, 2  ;;  %v3807_v17 = vld [vmem:[%s12847_s5 + $0xd8] sm:$0xff] }
 0x1c0   : > { %3858 = vperm.xlu0 %10387, %v3788_v35   ;;  %v2988_v35 = vrot.slane %v2986_v62, 3  ;;  %v3808_v62 = vld [vmem:[%s12847_s5 + $0xe0] sm:$0xff] }
 0x1c3   : > { %3863 = vperm.xlu1 %10388, %v3789_v58   ;;  %v2989_v58 = vor.u32 %v2988_v35, %v2985_v30  ;;  %v3809_v30 = vld [vmem:[%s12847_s5 + $0xe8] sm:$0xff]  ;;  %v3810_v35 = vld [vmem:[%s12847_s5 + $0xf0] sm:$0xff] }
 0x1c6   : > { %9323 = vmatmul.mubr.msk.bf16.gmra.mrb[32].mxu0 %vm535_vm2, %v2230_v44  ;;  %v2951_v44 = vshll.u32 %v11115_v45, 16  ;;  %v2950_v45 = vrot.slane %v2948_v51, 2 }
 0x1c7   : > { %9328 = vmatprep.mubr.msk.bf16.mxu0 %vm535_vm2, %v2635_v56  ;;  %v2956_v56 = vshrl.u32 %v11118_v49, 16  ;;  %3873 = vperm.xlu1 %10388, %v3791_v6  }
 0x1c8   : > { %v2953_v11 = vrot.slane %v2951_v44, 3  ;;  %v2997_v44 = vrot.slane %v2995_v14, 3  ;;  %v3040_v14 = vshll.u32 %v11184_v46, 16 }
 0x1ca   : > { %v2954_v23 = vor.u32 %v2953_v11, %v2950_v45  ;;  %v3801_v45 = vld [vmem:[%s12847_s5 + $0xa8] sm:$0xff]  ;;  %v3802_v11 = vld [vmem:[%s12847_s5 + $0xb0] sm:$0xff] }
 0x1cb   : > { %3883 = vperm.xlu1 %10388, %v3793_v29  }
 0x1ce   : > { %9329 = vmatmul.mubr.msk.bf16.vlgmr.msra.gmra.mrb[0].mxu0 %vm535_vm2, %v2637_v61  ;;  %v3790_v61 = vld [vmem:[%s12847_s5 + $0x50] sm:$0xff] }
 0x1cf   : > { %9365 = vmatpush3.bf16.msra.mxu0 %v3172_v2  ;;  %9332 = vmatprep.mubr.msk.bf16.mxu0 %vm535_vm2, %v2639_v3  ;;  %v2665_v2 = vsel %vm2193_vm5, %v2662_v7, %v2664_v47  ;;  %v2667_v3 = vsel %vm2193_vm5, %v2664_v47, %v2666_v48  ;;  %v2992_v7 = vshrl.u32 %v11145_v9, 16  ;;  %v3486_v47 = vsel %vm590_vm0, %v11150_v5, 0 }
 0x1d0   : > { %10366 = vmatprep.subr.msk.bf16.mxu0 %vm590_vm0, %v11150_v5  ;;  %3868 = vperm.xlu0 %10387, %v3790_v61   ;;  %v3001_v5 = vshrl.u32 %v11160_v4, 16  ;;  %v3004_v61 = vshll.u32 %v11160_v4, 16  ;;  %vm4933_vm0 = vcmask 1041408  }
 0x1d1   : > { %3893 = vperm.xlu1 %10388, %v3795_v8   ;;  %v2994_v51 = vrot.slane %v2992_v7, 2  ;;  %v3037_v7 = vshrl.u32 %v11184_v46, 16 }
 0x1d2   : > { %v3006_v6 = vrot.slane %v3004_v61, 3 }
 0x1d4   : > { %3878 = vperm.xlu0 %10387, %v3792_v13  }
 0x1d5   : > { %3903 = vperm.xlu1 %10388, %v3797_v42  }
 0x1d6   : > { %9333 = vmatmul.mubr.msk.bf16.gmra.mrb[4].mxu0 %vm535_vm2, %v2641_v16  ;;  %v2958_v16 = vrot.slane %v2956_v56, 2  ;;  %v3799_v56 = vld [vmem:[%s12847_s5 + $0x98] sm:$0xff] }
 0x1d7   : > { %9336 = vmatprep.mubr.msk.bf16.mxu0 %vm535_vm2, %v2643_v18  ;;  %v2961_v18 = vrot.slane %v2959_v60, 3  ;;  %v3800_v60 = vld [vmem:[%s12847_s5 + $0xa0] sm:$0xff] }
 0x1d9   : > { %3913 = vperm.xlu1 %10388, %v3799_v56  }
 0x1dd   : > { %3923 = vperm.xlu1 %10388, %v3801_v45   ;;  %v3064_v45 = vshrl.u32 %v11200_v36, 16 }
 0x1de   : > { %9337 = vmatmul.mubr.msk.bf16.gmra.mrb[8].mxu0 %vm535_vm2, %v2645_v21  ;;  %v2668_v21 = vrot.slane %v10448_v33, 2  ;;  %v3013_v33 = vshll.u32 %v11164_v19, 16 }
 0x1df   : > { %9340 = vmatprep.mubr.msk.bf16.mxu0 %vm535_vm2, %v2647_v27  ;;  %v2965_v27 = vshrl.u32 %v11127_v54, 16 }
 0x1e1   : > { %v2967_v59 = vrot.slane %v2965_v27, 2  ;;  %v3015_v27 = vrot.slane %v3013_v33, 3  ;;  %3933 = vperm.xlu1 %10388, %v3803_v43   ;;  %v3066_v43 = vrot.slane %v3064_v45, 2 }
 0x1e6   : > { %9341 = vmatmul.mubr.msk.bf16.gmra.mrb[12].mxu0 %vm535_vm2, %v2649_v31  ;;  %v2962_v31 = vor.u32 %v2961_v18, %v2958_v16  ;;  %v3003_v18 = vrot.slane %v3001_v5, 2  ;;  %v3812_v5 = vld [vmem:[%s12847_s5 + $0x100] sm:$0xff] }
 0x1e7   : > { %9344 = vmatprep.mubr.msk.bf16.mxu0 %vm535_vm2, %v2651_v39  ;;  %v2974_v39 = vshrl.u32 %v11131_v57, 16 }
 0x1e8   : > { %v2963_v50 = vsel %vm2946_vm8, %v2954_v23, %v2962_v31  ;;  %v3804_v23 = vld [vmem:[%s12847_s5 + $0xc0] sm:$0xff] }
 0x1e9   : > { %v2976_v53 = vrot.slane %v2974_v39, 2  ;;  %v3019_v39 = vshrl.u32 %v11172_v22, 16 }
 0x1eb   : > { %v2980_v20 = vor.u32 %v2979_v37, %v2976_v53  ;;  %v3021_v53 = vrot.slane %v3019_v39, 2  ;;  %v3024_v37 = vrot.slane %v3022_v55, 3  ;;  %v3073_v55 = vshrl.u32 %v11220_v38, 16 }
 0x1ed   : > { %v2990_v16 = vsel %vm2946_vm8, %v2980_v20, %v2989_v58 }
 0x1ee   : > { %9345 = vmatmul.mubr.msk.bf16.gmra.mrb[16].mxu0 %vm535_vm2, %v2653_v32  ;;  %v3794_v32 = vld [vmem:[%s12847_s5 + $0x70] sm:$0xff] }
 0x1ef   : > { %9348 = vmatprep.mubr.msk.bf16.mxu0 %vm535_vm2, %v2655_v34  ;;  %v2669_v34 = vsel %vm2193_vm5, %v2666_v48, %v2668_v21  ;;  %3888 = vperm.xlu0 %10387, %v3794_v32   ;;  %v3028_v32 = vshrl.u32 %v11176_v15, 16 }
 0x1f6   : > { %9349 = vmatmul.mubr.msk.bf16.gmra.mrb[20].mxu0 %vm535_vm2, %v2657_v10  ;;  %v3796_v10 = vld [vmem:[%s12847_s5 + $0x80] sm:$0xff] }
 0x1f7   : > { %9352 = vmatprep.mubr.msk.bf16.mxu0 %vm535_vm2, %v2659_v40  ;;  %v2971_v40 = vor.u32 %v2970_v63, %v2967_v59  ;;  %3898 = vperm.xlu0 %10387, %v3796_v10   ;;  %v3805_v59 = vld [vmem:[%s12847_s5 + $0xc8] sm:$0xff]  ;;  %v3806_v63 = vld [vmem:[%s12847_s5 + $0xd0] sm:$0xff]  ;;  %v3030_v10 = vrot.slane %v3028_v32, 2 }
 0x1f8   : > { %3943 = vperm.xlu1 %10388, %v3805_v59   ;;  %v3085_v59 = vshll.u32 %v11224_v12, 16 }
 0x1f9   : > { %v2981_v48 = vsel %vm2946_vm8, %v2971_v40, %v2980_v20  ;;  %v3025_v20 = vor.u32 %v3024_v37, %v3021_v53 }
 0x1fc   : > { %3953 = vperm.xlu1 %10388, %v3807_v17   ;;  %v3091_v17 = vshrl.u32 %v11244_v24, 16 }
 0x1fe   : > { %9353 = vmatmul.mubr.msk.bf16.gmra.mrb[24].mxu0 %vm535_vm2, %v2661_v25  ;;  %v3798_v25 = vld [vmem:[%s12847_s5 + $0x90] sm:$0xff] }
 0x1ff   : > { %9356 = vmatprep.mubr.msk.bf16.mxu0 %vm535_vm2, %v2663_v26  ;;  %v2972_v26 = vsel %vm2946_vm8, %v2962_v31, %v2971_v40  ;;  %3908 = vperm.xlu0 %10387, %v3798_v25   ;;  %v3007_v31 = vor.u32 %v3006_v6, %v3003_v18  ;;  %v3046_v25 = vshrl.u32 %v11188_v52, 16  ;;  %v3814_v18 = vld [vmem:[%s12847_s5 + $0x110] sm:$0xff] }
 0x200   : > { %3963 = vperm.xlu1 %10388, %v3809_v30   ;;  %v11414_v30 = vld [vmem:[%s10592_s30 + $0xa0] ss:$0 sps:$4 sm:$0x77]  }
 0x201   : > { %v3048_v56 = vrot.slane %v3046_v25, 2  ;;  %v3093_v25 = vrot.slane %v3091_v17, 2 }
 0x203   : > { %3918 = vperm.xlu0 %10387, %v3800_v60  }
 0x206   : > { %9357 = vmatmul.mubr.msk.bf16.gmra.mrb[28].mxu0 %vm535_vm2, %v2665_v2  ;;  %v2998_v2 = vor.u32 %v2997_v44, %v2994_v51  ;;  %v3042_v51 = vrot.slane %v3040_v14, 3  ;;  %v3103_v14 = vshll.u32 %v11247_v28, 16 }
 0x207   : > { %9360 = vmatprep.mubr.msk.bf16.mxu0 %vm535_vm2, %v2667_v3  ;;  %v3010_v3 = vshrl.u32 %v11164_v19, 16  ;;  %3928 = vperm.xlu0 %10387, %v3802_v11   ;;  %v3067_v11 = vshll.u32 %v11200_v36, 16 }
 0x208   : > { %v2999_v13 = vsel %vm2946_vm8, %v2989_v58, %v2998_v2  ;;  %v3811_v58 = vld [vmem:[%s12847_s5 + $0xf8] sm:$0xff] }
 0x209   : > { %v3012_v21 = vrot.slane %v3010_v3, 2  ;;  %v3058_v3 = vshll.u32 %v11196_v0, 16  ;;  %3973 = vperm.xlu1 %10388, %v3811_v58   ;;  %v3387_v58 = vld [vmem:[%s10592_s30 + $0x10] sm:$0x8]  ;;  %s10377_s30 = smul.u32 288, %s13005_s22 }
 0x20b   : > { %v3016_v29 = vor.u32 %v3015_v27, %v3012_v21  ;;  %3938 = vperm.xlu0 %10387, %v3804_v23   ;;  %v3060_v21 = vrot.slane %v3058_v3, 3  ;;  %v3069_v23 = vrot.slane %v3067_v11, 3  ;;  %s12730_s13 = scalar_lea.vmem %s12848_s6, %s10377_s30 }
 0x20d   : > { %v3017_v8 = vsel %vm2946_vm8, %v3007_v31, %v3016_v29  ;;  %v3070_v32 = vor.u32 %v3069_v23, %v3066_v43  ;;  %v3403_v43 = vrot.slane %v11145_v9, 3  ;;  %v3411_v9 = vrot.slane %v11176_v15, 3 }
 0x20e   : > { %9361 = vmatmul.mubr.msk.bf16.gmra.mrb[32].mxu0 %vm535_vm2, %v2669_v34  ;;  %v3031_v34 = vshll.u32 %v11176_v15, 16  ;;  %v3419_v15 = vrot.slane %v11200_v36, 3  ;;  %v3427_v36 = vrot.slane %v11247_v28, 3 }
 0x20f   : > { %9366 = vmatprep.mubr.msk.bf16.mxu0 %vm535_vm2, %v2963_v50  ;;  %v3008_v50 = vsel %vm2946_vm8, %v2998_v2, %v3007_v31  ;;  %3948 = vperm.xlu0 %10387, %v3806_v63   ;;  %v3055_v2 = vshrl.u32 %v11196_v0, 16  ;;  %v3815_v31 = vld [vmem:[%s12847_s5 + $0x118] sm:$0xff] }
 0x210   : > { %v3033_v40 = vrot.slane %v3031_v34, 3  ;;  %v3082_v34 = vshrl.u32 %v11224_v12, 16 }
 0x212   : > { %v3034_v42 = vor.u32 %v3033_v40, %v3030_v10  ;;  %v3087_v10 = vrot.slane %v3085_v59, 3 }
 0x213   : > { %3958 = vperm.xlu0 %10387, %v3808_v62   ;;  %v3094_v62 = vshll.u32 %v11244_v24, 16 }
 0x214   : > { %v3035_v44 = vsel %vm2946_vm8, %v3025_v20, %v3034_v42 }
 0x216   : > { %9367 = vmatmul.mubr.msk.bf16.vlgmr.msra.gmra.mrb[0].mxu0 %vm535_vm2, %v2972_v26  ;;  %v3049_v26 = vshll.u32 %v11188_v52, 16 }
 0x217   : > { %9403 = vmatpush3.bf16.msra.mxu0 %v3486_v47  ;;  %9370 = vmatprep.mubr.msk.bf16.mxu0 %vm535_vm2, %v2981_v48  ;;  %v3026_v47 = vsel %vm2946_vm8, %v3016_v29, %v3025_v20  ;;  %v3039_v48 = vrot.slane %v3037_v7, 2  ;;  %v3076_v29 = vshll.u32 %v11220_v38, 16  ;;  %v3100_v7 = vshrl.u32 %v11247_v28, 16  ;;  %v4038_v28 = vld [vmem:[#allocation2 + $0x8] sm:$0x3] }
 0x218   : > { %v3051_v60 = vrot.slane %v3049_v26, 3  ;;  %3968 = vperm.xlu0 %10387, %v3810_v35   ;;  %v3096_v26 = vrot.slane %v3094_v62, 3  ;;  %v4044_v62 = vld [vmem:[#allocation2 + $0x98] sm:$0xe] }
 0x219   : > { %v3043_v61 = vor.u32 %v3042_v51, %v3039_v48  ;;  %v3078_v53 = vrot.slane %v3076_v29, 3  ;;  %v3105_v48 = vrot.slane %v3103_v14, 3 }
 0x21a   : > { %v3052_v33 = vor.u32 %v3051_v60, %v3048_v56  ;;  %v3097_v51 = vor.u32 %v3096_v26, %v3093_v25  ;;  %v3112_v56 = vshll.u32 %v11414_v30, 16  ;;  %v4597_v26 = vld [vmem:[#allocation2] sm:$0xf] }
 0x21b   : > { %v3044_v6 = vsel %vm2946_vm8, %v3034_v42, %v3043_v61 }
 0x21c   : > { %3978 = vperm.xlu0 %10387, %v3812_v5   ;;  %v3053_v27 = vsel %vm2946_vm8, %v3043_v61, %v3052_v33 }
 0x21e   : > { %9371 = vmatmul.mubr.msk.bf16.gmra.mrb[4].mxu0 %vm535_vm2, %v2990_v16  ;;  %v3813_v16 = vld [vmem:[%s12847_s5 + $0x108] sm:$0xff] }
 0x21f   : > { %9374 = vmatprep.mubr.msk.bf16.mxu0 %vm535_vm2, %v2999_v13  ;;  %v3057_v13 = vrot.slane %v3055_v2, 2  ;;  %3983 = vperm.xlu1 %10388, %v3813_v16   ;;  %v3114_v2 = vrot.slane %v3112_v56, 3  ;;  %v3395_v16 = vrot.slane %v11118_v49, 3  ;;  %v3401_v49 = vrot.slane %v11139_v1, 3  ;;  %v3819_v25 = vpop.permute.xlu0 %3818 }
 0x220   : > { %3988 = vperm.xlu0 %10387, %v3814_v18   ;;  %v3409_v1 = vrot.slane %v11172_v22, 3  ;;  %v3417_v22 = vrot.slane %v11196_v0, 3  ;;  %v3425_v0 = vrot.slane %v11244_v24, 3 }
 0x221   : > { %v3061_v39 = vor.u32 %v3060_v21, %v3057_v13  ;;  %v3397_v13 = vrot.slane %v11127_v54, 3  ;;  %v3405_v54 = vrot.slane %v11160_v4, 3  ;;  %v3413_v4 = vrot.slane %v11184_v46, 3 }
 0x222   : > { %v3421_v46 = vrot.slane %v11220_v38, 3  ;;  %v3429_v38 = vrot.slane %v11414_v30, 3 }
 0x223   : > { %3993 = vperm.xlu1 %10388, %v3815_v31   ;;  %v3062_v63 = vsel %vm2946_vm8, %v3052_v33, %v3061_v39  ;;  %v3071_v37 = vsel %vm2946_vm8, %v3061_v39, %v3070_v32  ;;  %v8429_v33 = vcombine.low %v3387_v58, %v11110_v41  ;;  %v3399_v41 = vrot.slane %v11131_v57, 3 }
 0x224   : > { %v3398_v21 = vsel %vm3393_vm9, %v3395_v16, %v3397_v13  ;;  %v3404_v31 = vsel %vm3393_vm9, %v3401_v49, %v3403_v43  ;;  %v3407_v57 = vrot.slane %v11164_v19, 3  ;;  %v3406_v39 = vsel %vm3393_vm9, %v3403_v43, %v3405_v54 }
 0x225   : > { %v3394_v11 = vrot.slane %v8429_v33, 3  ;;  %v3402_v23 = vsel %vm3393_vm9, %v3399_v41, %v3401_v49  ;;  %v3415_v19 = vrot.slane %v11188_v52, 3  ;;  %v3423_v52 = vrot.slane %v11224_v12, 3 }
 0x226   : > { %9375 = vmatmul.mubr.msk.bf16.gmra.mrb[8].mxu0 %vm535_vm2, %v3008_v50  ;;  %v3075_v50 = vrot.slane %v3073_v55, 2  ;;  %v3408_v55 = vsel %vm3393_vm9, %v3405_v54, %v3407_v57  ;;  %v3410_v29 = vsel %vm3393_vm9, %v3407_v57, %v3409_v1  ;;  %v3430_v12 = vsel %vm3393_vm9, %v3427_v36, %v3429_v38 }
 0x227   : > { %9378 = vmatprep.mubr.msk.bf16.mxu0 %vm535_vm2, %v3017_v8  ;;  %v3084_v8 = vrot.slane %v3082_v34, 2  ;;  %v3414_v34 = vsel %vm3393_vm9, %v3411_v9, %v3413_v4  ;;  %v3416_v59 = vsel %vm3393_vm9, %v3413_v4, %v3415_v19 }
 0x228   : > { %v3079_v40 = vor.u32 %v3078_v53, %v3075_v50  ;;  %v3420_v50 = vsel %vm3393_vm9, %v3417_v22, %v3419_v15  ;;  %v3422_v53 = vsel %vm3393_vm9, %v3419_v15, %v3421_v46 }
 0x229   : > { %v3088_v20 = vor.u32 %v3087_v10, %v3084_v8  ;;  %v3426_v8 = vsel %vm3393_vm9, %v3423_v52, %v3425_v0  ;;  %v3428_v10 = vsel %vm3393_vm9, %v3425_v0, %v3427_v36 }
 0x22a   : > { %v3080_v42 = vsel %vm2946_vm8, %v3070_v32, %v3079_v40  ;;  %v3412_v32 = vsel %vm3393_vm9, %v3409_v1, %v3411_v9 }
 0x22b   : > { %v3089_v35 = vsel %vm2946_vm8, %v3079_v40, %v3088_v20  ;;  %v3098_v5 = vsel %vm2946_vm8, %v3088_v20, %v3097_v51  ;;  %v4039_v40 = vsel %vm11484_vm12, 0, %v4038_v28  ;;  %v4045_v20 = vsel %vm11490_vm15, 0, %v4044_v62 }
 0x22c   : > { %4040 = vst [vmem:[#allocation2 + $0x8] sm:$0x3] %v4039_v40  ;;  %4046 = vst [vmem:[#allocation2 + $0x98] sm:$0xe] %v4045_v20 }
 0x22e   : > { %9379 = vmatmul.mubr.msk.bf16.gmra.mrb[12].mxu0 %vm535_vm2, %v3026_v47  ;;  %v3102_v47 = vrot.slane %v3100_v7, 2  ;;  %v8485_v7 = vld [vmem:[%s12845_s3 + $0x2] sm:$0x3] }
 0x22f   : > { %9382 = vmatprep.mubr.msk.bf16.mxu0 %vm535_vm2, %v3035_v44  ;;  %v3109_v44 = vshrl.u32 %v11414_v30, 16  ;;  %10367 = vmatprep.subr.msk.bf16.mxu1 %vm4933_vm0, %v8485_v7  ;;  %v4935_v14 = vsel %vm4933_vm0, %v8485_v7, 0  ;;  %v4598_v30 = vld [vmem:[#allocation2 + $0x4] sm:$0xf] }
 0x230   : > { %v3106_v60 = vor.u32 %v3105_v48, %v3102_v47  ;;  %9441 = vmatpush3.bf16.msra.mxu1 %v4935_v14  ;;  %v11505_v47 = vcombine.low %v4597_v26, %v4598_v30  ;;  %v3824_v48 = vpop.permute.xlu0 %3823 }
 0x231   : > { %v3111_v61 = vrot.slane %v3109_v44, 2 }
 0x232   : > { %v3107_v3 = vsel %vm2946_vm8, %v3097_v51, %v3106_v60  ;;  %v11510_v51 = vld [vmem:[%s12844_s2] ss:$0 sm:$0xff]  ;;  %v4733_v56 = vshll.u32 %v11505_v47, 16 }
 0x233   : > { %v3115_v45 = vor.u32 %v3114_v2, %v3111_v61  ;;  %v4556_v28 = vld [vmem:[#allocation2 + $0x8] sm:$0xe] }
 0x235   : > { %v3116_v18 = vsel %vm2946_vm8, %v3106_v60, %v3115_v45 }
 0x236   : > { %9383 = vmatmul.mubr.msk.bf16.gmra.mrb[16].mxu0 %vm535_vm2, %v3044_v6  ;;  %v3396_v6 = vsel %vm3393_vm9, %v3394_v11, %v3395_v16  ;;  %v3839_v11 = vpop.permute.xlu0 %3838 }
 0x237   : > { %9386 = vmatprep.mubr.msk.bf16.mxu0 %vm535_vm2, %v3053_v27  ;;  %v3400_v27 = vsel %vm3393_vm9, %v3397_v13, %v3399_v41  ;;  %v4735_v13 = vrot.slane %v4733_v56, 1 }
 0x23e   : > { %9387 = vmatmul.mubr.msk.bf16.gmra.mrb[20].mxu0 %vm535_vm2, %v3062_v63  ;;  %v3418_v63 = vsel %vm3393_vm9, %v3415_v19, %v3417_v22 }
 0x23f   : > { %9390 = vmatprep.mubr.msk.bf16.mxu0 %vm535_vm2, %v3071_v37  ;;  %v3424_v37 = vsel %vm3393_vm9, %v3421_v46, %v3423_v52 }
 0x246   : > { %9391 = vmatmul.mubr.msk.bf16.gmra.mrb[24].mxu0 %vm535_vm2, %v3080_v42  ;;  %v4633_v42 = vld [vmem:[%s12845_s3] sm:$0x3] }
 0x247   : > { %9394 = vmatprep.mubr.msk.bf16.mxu0 %vm535_vm2, %v3089_v35  ;;  %10368 = vmatprep.subr.msk.bf16.mxu1 %vm4933_vm0, %v4633_v42  ;;  %v3829_v35 = vpop.permute.xlu1 %3828  ;;  %v11523_v1 = vsel %vm4933_vm0, %v4633_v42, 0 }
 0x24e   : > { %9395 = vmatmul.mubr.msk.bf16.gmra.mrb[28].mxu0 %vm535_vm2, %v3098_v5  ;;  %v3834_v5 = vpop.permute.xlu1 %3833 }
 0x24f   : > { %9398 = vmatprep.mubr.msk.bf16.mxu0 %vm535_vm2, %v3107_v3 }
 0x256   : > { %9399 = vmatmul.mubr.msk.bf16.gmra.mrb[32].mxu0 %vm535_vm2, %v3116_v18 }
 0x257   : > { %9404 = vmatprep.mubr.msk.bf16.mxu0 %vm535_vm2, %v3396_v6  ;;  %v4731_v6 = vshrl.u32 %v11505_v47, 16 }
 0x25e   : > { %9405 = vmatmul.mubr.msk.bf16.vlgmr.msra.gmra.mrb[0].mxu0 %vm535_vm2, %v3398_v21 }
 0x25f   : > { %9408 = vmatprep.mubr.msk.bf16.mxu0 %vm535_vm2, %v3400_v27 }
 0x266   : > { %9409 = vmatmul.mubr.msk.bf16.gmra.mrb[4].mxu0 %vm535_vm2, %v3402_v23 }
 0x267   : > { %9412 = vmatprep.mubr.msk.bf16.mxu0 %vm535_vm2, %v3404_v31  ;;  %v11518_v31 = vpop.permute.xlu1 %3843 }
 0x26b   : > { %v3854_v7 = vpop.permute.xlu1 %3853 }
 0x26e   : > { %9413 = vmatmul.mubr.msk.bf16.gmra.mrb[8].mxu0 %vm535_vm2, %v3406_v39 }
 0x26f   : > { %9416 = vmatprep.mubr.msk.bf16.mxu0 %vm535_vm2, %v3408_v55  ;;  %v11520_v55 = vor.u32 %v4735_v13, %v4731_v6 }
 0x276   : > { %9417 = vmatmul.mubr.msk.bf16.gmra.mrb[12].mxu0 %vm535_vm2, %v3410_v29 }
 0x277   : > { %9420 = vmatprep.mubr.msk.bf16.mxu0 %vm535_vm2, %v3412_v32 }
 0x27e   : > { %9421 = vmatmul.mubr.msk.bf16.gmra.mrb[16].mxu0 %vm535_vm2, %v3414_v34  ;;  %v3849_v34 = vpop.permute.xlu0 %3848 }
 0x27f   : > { %9424 = vmatprep.mubr.msk.bf16.mxu0 %vm535_vm2, %v3416_v59 }
 0x286   : > { %9425 = vmatmul.mubr.msk.bf16.gmra.mrb[20].mxu0 %vm535_vm2, %v3418_v63 }
 0x287   : > { %9428 = vmatprep.mubr.msk.bf16.mxu0 %vm535_vm2, %v3420_v50 }
 0x28e   : > { %9429 = vmatmul.mubr.msk.bf16.gmra.mrb[24].mxu0 %vm535_vm2, %v3422_v53 }
 0x28f   : > { %9432 = vmatprep.mubr.msk.bf16.mxu0 %vm535_vm2, %v3424_v37 }
 0x296   : > { %9433 = vmatmul.mubr.msk.bf16.gmra.mrb[28].mxu0 %vm535_vm2, %v3426_v8 }
 0x297   : > { %9436 = vmatprep.mubr.msk.bf16.mxu0 %vm535_vm2, %v3428_v10 }
 0x29e   : > { %9437 = vmatmul.mubr.msk.bf16.gmra.mrb[32].mxu0 %vm535_vm2, %v3430_v12  ;;  %vm4158_vm2 = vsmask.f32 5392 }
 0x29f   : > { %vm11529_vm7 = vmor %vm4036_vm11, %vm4158_vm2 }
 0x331   : > { %v9406_v44 = vpop.f32.mrb[0].mxu0 }
 0x332   : > { %v3710_v60 = vadd.f32 %v9406_v44, %v11510_v51  ;;  %v3522_v58 = vpop.f32.mrb[1].mxu0 }
 0x333   : > { %v3708_v61 = vadd.f32 %v11510_v51, %v3522_v58  ;;  %v9407_v2 = vpop.f32.mrb[2].mxu0 }
 0x334   : > { %v3746_v3 = vmax.f32 %v3710_v60, 0.0  ;;  %v3711_v33 = vadd.f32 %v9407_v2, %v11510_v51  ;;  %v3525_v45 = vpop.f32.mrb[3].mxu0  ;;  %v11534_v60 = vpop.permute.xlu0 %3858 }
 0x335   : > { %v3744_v16 = vmax.f32 %v3708_v61, 0.0  ;;  %v3709_v18 = vadd.f32 %v11510_v51, %v3525_v45 }
 0x336   : > { %v3998_v41 = vmul.f32 %v3829_v35, %v3746_v3  ;;  %v3747_v21 = vmax.f32 %v3711_v33, 0.0 }
 0x337   : > { %v3996_v27 = vmul.f32 %v3819_v25, %v3744_v16  ;;  %v3745_v49 = vmax.f32 %v3709_v18, 0.0 }
 0x338   : > { %v8722_v43 = vpack.c.bf16 %v3998_v41, %v3998_v41  ;;  %v3999_v23 = vmul.f32 %v3834_v5, %v3747_v21 }
 0x339   : > { %v8720_v54 = vpack.c.bf16 %v3996_v27, %v3996_v27  ;;  %v3997_v57 = vmul.f32 %v3824_v48, %v3745_v49  ;;  %v9410_v39 = vpop.f32.mrb[4].mxu0 }
 0x33a   : > { %v4180_v9 = vshrl.u32 %v8722_v43, 16  ;;  %v4183_v29 = vshll.u32 %v8722_v43, 16  ;;  %v8723_v32 = vpack.c.bf16 %v3999_v23, %v3999_v23  ;;  %v3714_v4 = vadd.f32 %v9410_v39, %v11510_v51  ;;  %v3538_v19 = vpop.f32.mrb[5].mxu0 }
 0x33b   : > { %v4161_v59 = vshrl.u32 %v8720_v54, 16  ;;  %v4164_v22 = vshll.u32 %v8720_v54, 16  ;;  %v8721_v15 = vpack.c.bf16 %v3997_v57, %v3997_v57  ;;  %v3712_v63 = vadd.f32 %v11510_v51, %v3538_v19  ;;  %v9411_v50 = vpop.f32.mrb[6].mxu0  ;;  %v11546_v57 = vpop.permute.xlu1 %3863 }
 0x33c   : > { %v4182_v46 = vrot.slane %v4180_v9, 6  ;;  %v4185_v52 = vrot.slane %v4183_v29, 7  ;;  %v4190_v53 = vshrl.u32 %v8723_v32, 16  ;;  %v4193_v37 = vshll.u32 %v8723_v32, 16  ;;  %v3541_v0 = vpop.f32.mrb[7].mxu0 }
 0x33d   : > { %v4163_v36 = vrot.slane %v4161_v59, 6  ;;  %v4166_v8 = vrot.slane %v4164_v22, 7  ;;  %v4170_v10 = vshrl.u32 %v8721_v15, 16  ;;  %v4173_v38 = vshll.u32 %v8721_v15, 16  ;;  %v3869_v22 = vpop.permute.xlu0 %3868 }
 0x33e   : > { %v4186_v12 = vor.u32 %v4185_v52, %v4182_v46  ;;  %v4192_v40 = vrot.slane %v4190_v53, 6  ;;  %v4195_v62 = vrot.slane %v4193_v37, 7  ;;  %v3750_v20 = vmax.f32 %v3714_v4, 0.0 }
 0x33f   : > { %v4167_v42 = vor.u32 %v4166_v8, %v4163_v36  ;;  %v4172_v25 = vrot.slane %v4170_v10, 6  ;;  %v4175_v26 = vrot.slane %v4173_v38, 7  ;;  %v3748_v30 = vmax.f32 %v3712_v63, 0.0 }
 0x340   : > { %v4188_v35 = vrot.slane %v4186_v12, 4  ;;  %v4196_v48 = vor.u32 %v4195_v62, %v4192_v40  ;;  %v4002_v44 = vmul.f32 %v3849_v34, %v3750_v20  ;;  %v3715_v56 = vadd.f32 %v9411_v50, %v11510_v51 }
 0x341   : > { %v4168_v58 = vrot.slane %v4167_v42, 4  ;;  %v4557_v5 = vsel %vm11490_vm15, %v4167_v42, %v4556_v28  ;;  %v4176_v61 = vor.u32 %v4175_v26, %v4172_v25  ;;  %v4000_v2 = vmul.f32 %v3839_v11, %v3748_v30  ;;  %v9414_v3 = vpop.f32.mrb[8].mxu0  ;;  %v3874_v42 = vpop.permute.xlu1 %3873 }
 0x342   : > { %4558 = vst [vmem:[#allocation2 + $0x8] sm:$0xe] %v4557_v5  ;;  %v4197_v33 = vsel %vm11529_vm7, %v4188_v35, %v4196_v48  ;;  %v4198_v45 = vrot.slane %v4196_v48, 4  ;;  %v8726_v16 = vpack.c.bf16 %v4002_v44, %v4002_v44  ;;  %v3751_v18 = vmax.f32 %v3715_v56, 0.0  ;;  %v3554_v6 = vpop.f32.mrb[9].mxu0 }
 0x343   : > { %4561 = vst.msk [vmem:[#allocation2 + $0x14] sm:$0xf] %vm4032_vm6, %v4197_v33  ;;  %v4177_v13 = vsel %vm11529_vm7, %v4168_v58, %v4176_v61  ;;  %v4178_v41 = vrot.slane %v4176_v61, 4  ;;  %v8724_v21 = vpack.c.bf16 %v4000_v2, %v4000_v2  ;;  %v3713_v17 = vadd.f32 %v11510_v51, %v3541_v0  ;;  %v9415_v27 = vpop.f32.mrb[10].mxu0  ;;  %v3879_v61 = vpop.permute.xlu0 %3878 }
 0x344   : > { %4559 = vst.msk [vmem:[#allocation2 + $0xc] sm:$0xf] %vm4032_vm6, %v4177_v13  ;;  %v4220_v11 = vshrl.u32 %v8726_v16, 16  ;;  %v4223_v49 = vshll.u32 %v8726_v16, 16  ;;  %v4003_v43 = vmul.f32 %v3854_v7, %v3751_v18  ;;  %v3718_v23 = vadd.f32 %v9414_v3, %v11510_v51  ;;  %v3557_v54 = vpop.f32.mrb[11].mxu0 }
 0x345   : > { %v4187_v39 = vsel %vm11529_vm7, %v4178_v41, %v4186_v12  ;;  %v4200_v9 = vshrl.u32 %v8724_v21, 16  ;;  %v4203_v29 = vshll.u32 %v8724_v21, 16  ;;  %v3749_v32 = vmax.f32 %v3713_v17, 0.0 }
 0x346   : > { %4560 = vst.msk [vmem:[#allocation2 + $0x10] sm:$0xf] %vm4032_vm6, %v4187_v39  ;;  %v4222_v4 = vrot.slane %v4220_v11, 6  ;;  %v4225_v19 = vrot.slane %v4223_v49, 7  ;;  %v8727_v34 = vpack.c.bf16 %v4003_v43, %v4003_v43  ;;  %v3754_v59 = vmax.f32 %v3718_v23, 0.0  ;;  %v11567_v23 = vpop.permute.xlu1 %3883 }
 0x347   : > { %v4202_v15 = vrot.slane %v4200_v9, 6  ;;  %v4205_v63 = vrot.slane %v4203_v29, 7  ;;  %v4001_v50 = vmul.f32 %v11518_v31, %v3749_v32  ;;  %v3716_v46 = vadd.f32 %v11510_v51, %v3554_v6 }
 0x348   : > { %v4226_v52 = vor.u32 %v4225_v19, %v4222_v4  ;;  %v4230_v53 = vshrl.u32 %v8727_v34, 16  ;;  %v4233_v37 = vshll.u32 %v8727_v34, 16  ;;  %v4006_v0 = vmul.f32 %v3869_v22, %v3754_v59 }
 0x349   : > { %v4206_v36 = vor.u32 %v4205_v63, %v4202_v15  ;;  %v8725_v8 = vpack.c.bf16 %v4001_v50, %v4001_v50  ;;  %v3752_v10 = vmax.f32 %v3716_v46, 0.0  ;;  %v3719_v38 = vadd.f32 %v9415_v27, %v11510_v51  ;;  %v9418_v12 = vpop.f32.mrb[12].mxu0  ;;  %v3889_v15 = vpop.permute.xlu0 %3888 }
 0x34a   : > { %v4228_v28 = vrot.slane %v4226_v52, 4  ;;  %v4232_v40 = vrot.slane %v4230_v53, 6  ;;  %v4235_v62 = vrot.slane %v4233_v37, 7  ;;  %v8730_v20 = vpack.c.bf16 %v4006_v0, %v4006_v0  ;;  %v3570_v7 = vpop.f32.mrb[13].mxu0 }
 0x34b   : > { %v4207_v31 = vsel %vm11529_vm7, %v4198_v45, %v4206_v36  ;;  %v4208_v25 = vrot.slane %v4206_v36, 4  ;;  %v4210_v26 = vshrl.u32 %v8725_v8, 16  ;;  %v4213_v30 = vshll.u32 %v8725_v8, 16  ;;  %v9419_v35 = vpop.f32.mrb[14].mxu0 }
 0x34c   : > { %4562 = vst.msk [vmem:[#allocation2 + $0x18] sm:$0xf] %vm4032_vm6, %v4207_v31  ;;  %v4236_v48 = vor.u32 %v4235_v62, %v4232_v40  ;;  %v4260_v44 = vshrl.u32 %v8730_v20, 16  ;;  %v4263_v56 = vshll.u32 %v8730_v20, 16  ;;  %v4004_v58 = vmul.f32 %v11534_v60, %v3752_v10  ;;  %v3573_v5 = vpop.f32.mrb[15].mxu0 }
 0x34d   : > { %v4212_v2 = vrot.slane %v4210_v26, 6  ;;  %v4215_v3 = vrot.slane %v4213_v30, 7  ;;  %v3755_v33 = vmax.f32 %v3719_v38, 0.0  ;;  %v3717_v16 = vadd.f32 %v11510_v51, %v3557_v54 }
 0x34e   : > { %v4237_v45 = vsel %vm11529_vm7, %v4228_v28, %v4236_v48  ;;  %v4238_v18 = vrot.slane %v4236_v48, 4  ;;  %v4262_v6 = vrot.slane %v4260_v44, 6  ;;  %v4265_v13 = vrot.slane %v4263_v56, 7 }
 0x34f   : > { %4565 = vst.msk [vmem:[#allocation2 + $0x24] sm:$0xf] %vm4032_vm6, %v4237_v45  ;;  %v4216_v41 = vor.u32 %v4215_v3, %v4212_v2  ;;  %v8728_v21 = vpack.c.bf16 %v4004_v58, %v4004_v58  ;;  %v4007_v17 = vmul.f32 %v3874_v42, %v3755_v33  ;;  %v3753_v27 = vmax.f32 %v3717_v16, 0.0  ;;  %v3894_v42 = vpop.permute.xlu1 %3893 }
 0x350   : > { %v11562_v60 = vor.u32 %v4265_v13, %v4262_v6  ;;  %v3722_v11 = vadd.f32 %v9418_v12, %v11510_v51  ;;  %v3720_v49 = vadd.f32 %v11510_v51, %v3570_v7  ;;  %v3723_v43 = vadd.f32 %v9419_v35, %v11510_v51  ;;  %v3899_v13 = vpop.permute.xlu0 %3898 }
 0x351   : > { %v4217_v54 = vsel %vm11529_vm7, %v4208_v25, %v4216_v41  ;;  %v4218_v39 = vrot.slane %v4216_v41, 4  ;;  %v4240_v9 = vshrl.u32 %v8728_v21, 16  ;;  %v4243_v29 = vshll.u32 %v8728_v21, 16  ;;  %v11571_v32 = vpop.f32.mrb[16].mxu0 }
 0x352   : > { %4563 = vst.msk [vmem:[#allocation2 + $0x1c] sm:$0xf] %vm4032_vm6, %v4217_v54  ;;  %v4268_v4 = vrot.slane %v11562_v60, 4  ;;  %v8731_v19 = vpack.c.bf16 %v4007_v17, %v4007_v17  ;;  %v4005_v34 = vmul.f32 %v11546_v57, %v3753_v27  ;;  %v3758_v59 = vmax.f32 %v3722_v11, 0.0  ;;  %v11576_v22 = vpop.f32.mrb[17].mxu0 }
 0x353   : > { %v4227_v63 = vsel %vm11529_vm7, %v4218_v39, %v4226_v52  ;;  %v4242_v50 = vrot.slane %v4240_v9, 6  ;;  %v4245_v46 = vrot.slane %v4243_v29, 7  ;;  %v3756_v53 = vmax.f32 %v3720_v49, 0.0  ;;  %v11580_v37 = vpop.f32.mrb[18].mxu0 }
 0x354   : > { %4564 = vst.msk [vmem:[#allocation2 + $0x20] sm:$0xf] %vm4032_vm6, %v4227_v63  ;;  %v4270_v0 = vshrl.u32 %v8731_v19, 16  ;;  %v4273_v36 = vshll.u32 %v8731_v19, 16  ;;  %v8729_v8 = vpack.c.bf16 %v4005_v34, %v4005_v34  ;;  %v4010_v10 = vmul.f32 %v3889_v15, %v3758_v59  ;;  %v11583_v38 = vpop.f32.mrb[19].mxu0  ;;  %v10452_v59 = vld [vmem:[#allocation2 + $0x8] sm:$0xff]   ;;  %v3904_v15 = vpop.permute.xlu1 %3903 }
 0x355   : > { %v4246_v57 = vor.u32 %v4245_v46, %v4242_v50  ;;  %v4008_v12 = vmul.f32 %v3879_v61, %v3756_v53  ;;  %v3759_v28 = vmax.f32 %v3723_v43, 0.0  ;;  %v3721_v40 = vadd.f32 %v11510_v51, %v3573_v5 }
 0x356   : > { %v4272_v62 = vrot.slane %v4270_v0, 6  ;;  %v4275_v52 = vrot.slane %v4273_v36, 7  ;;  %v4250_v20 = vshrl.u32 %v8729_v8, 16  ;;  %v4253_v7 = vshll.u32 %v8729_v8, 16  ;;  %v11614_v0 = vld [vmem:[#allocation2 + $0x10] sm:$0xff]  }
 0x357   : > { %v4247_v31 = vsel %vm11529_vm7, %v4238_v18, %v4246_v57  ;;  %v4248_v25 = vrot.slane %v4246_v57, 4  ;;  %v8734_v26 = vpack.c.bf16 %v4010_v10, %v4010_v10  ;;  %v8732_v30 = vpack.c.bf16 %v4008_v12, %v4008_v12 }
 0x358   : > { %4566 = vst.msk [vmem:[#allocation2 + $0x28] sm:$0xf] %vm4032_vm6, %v4247_v31  ;;  %v4276_v35 = vor.u32 %v4275_v52, %v4272_v62  ;;  %v4252_v48 = vrot.slane %v4250_v20, 6  ;;  %v4255_v44 = vrot.slane %v4253_v7, 7  ;;  %v4011_v56 = vmul.f32 %v3894_v42, %v3759_v28  ;;  %v3909_v28 = vpop.permute.xlu0 %3908 }
 0x359   : > { %v4300_v58 = vshrl.u32 %v8734_v26, 16  ;;  %v4303_v61 = vshll.u32 %v8734_v26, 16  ;;  %v4280_v5 = vshrl.u32 %v8732_v30, 16  ;;  %v4283_v2 = vshll.u32 %v8732_v30, 16  ;;  %v11589_v3 = vpop.f32.mrb[20].mxu0 }
 0x35a   : > { %v4277_v33 = vsel %vm11529_vm7, %v4268_v4, %v4276_v35  ;;  %v4278_v16 = vrot.slane %v4276_v35, 4  ;;  %v4256_v45 = vor.u32 %v4255_v44, %v4252_v48  ;;  %v8735_v18 = vpack.c.bf16 %v4011_v56, %v4011_v56  ;;  %v11593_v6 = vpop.f32.mrb[21].mxu0 }
 0x35b   : > { %4569 = vst.msk [vmem:[#allocation2 + $0x34] sm:$0xf] %vm4032_vm6, %v4277_v33  ;;  %v4302_v41 = vrot.slane %v4300_v58, 6  ;;  %v4305_v21 = vrot.slane %v4303_v61, 7  ;;  %v4282_v17 = vrot.slane %v4280_v5, 6  ;;  %v4285_v27 = vrot.slane %v4283_v2, 7 }
 0x35c   : > { %v11596_v11 = vpop.f32.mrb[22].mxu0  ;;  %v4257_v49 = vsel %vm11529_vm7, %v4248_v25, %v4256_v45  ;;  %v4258_v43 = vrot.slane %v4256_v45, 4  ;;  %v4310_v54 = vshrl.u32 %v8735_v18, 16  ;;  %v4313_v39 = vshll.u32 %v8735_v18, 16 }
 0x35d   : > { %v11600_v9 = vpop.f32.mrb[23].mxu0  ;;  %4567 = vst.msk [vmem:[#allocation2 + $0x2c] sm:$0xf] %vm4032_vm6, %v4257_v49  ;;  %v11603_v29 = vor.u32 %v4305_v21, %v4302_v41  ;;  %v11605_v4 = vor.u32 %v4285_v27, %v4282_v17  ;;  %v3757_v19 = vmax.f32 %v3721_v40, 0.0  ;;  %v3726_v34 = vadd.f32 %v11571_v32, %v11510_v51 }
 0x35e   : > { %v4267_v63 = vsel %vm11529_vm7, %v4258_v43, %v11562_v60  ;;  %v4312_v50 = vrot.slane %v4310_v54, 6  ;;  %v4315_v46 = vrot.slane %v4313_v39, 7  ;;  %v3724_v53 = vadd.f32 %v11510_v51, %v11576_v22  ;;  %v3919_v39 = vpop.permute.xlu0 %3918 }
 0x35f   : > { %4568 = vst.msk [vmem:[#allocation2 + $0x30] sm:$0xf] %vm4032_vm6, %v4267_v63  ;;  %v4308_v36 = vrot.slane %v11603_v29, 4  ;;  %v4287_v32 = vsel %vm11529_vm7, %v4278_v16, %v11605_v4  ;;  %v4288_v8 = vrot.slane %v11605_v4, 4  ;;  %v4009_v10 = vmul.f32 %v11567_v23, %v3757_v19 }
 0x360   : > { %4570 = vst.msk [vmem:[#allocation2 + $0x38] sm:$0xf] %vm4032_vm6, %v4287_v32  ;;  %v11624_v60 = vor.u32 %v4315_v46, %v4312_v50  ;;  %v3762_v57 = vmax.f32 %v3726_v34, 0.0  ;;  %v3760_v22 = vmax.f32 %v3724_v53, 0.0  ;;  %v3727_v12 = vadd.f32 %v11580_v37, %v11510_v51 }
 0x361   : > { %v8733_v40 = vpack.c.bf16 %v4009_v10, %v4009_v10  ;;  %v4738_v62 = vshll.u32 %v10452_v59, 16  ;;  %v4742_v52 = vshrl.u32 %v10452_v59, 16  ;;  %v3725_v20 = vadd.f32 %v11510_v51, %v11583_v38  ;;  %v11630_v7 = vpop.f32.mrb[24].mxu0  ;;  %v3914_v38 = vpop.permute.xlu1 %3913 }
 0x362   : > { %v4317_v23 = vsel %vm11529_vm7, %v4308_v36, %v11624_v60  ;;  %v4318_v42 = vrot.slane %v11624_v60, 4  ;;  %v4014_v31 = vmul.f32 %v3909_v28, %v3762_v57  ;;  %v4012_v25 = vmul.f32 %v3899_v13, %v3760_v22  ;;  %v11636_v26 = vpop.f32.mrb[25].mxu0 }
 0x363   : > { %4573 = vst.msk [vmem:[#allocation2 + $0x44] sm:$0xf] %vm4032_vm6, %v4317_v23  ;;  %v4290_v37 = vshrl.u32 %v8733_v40, 16  ;;  %v4293_v30 = vshll.u32 %v8733_v40, 16  ;;  %v3763_v35 = vmax.f32 %v3727_v12, 0.0  ;;  %v4740_v48 = vrot.slane %v4738_v62, 1 }
 0x364   : > { %v11639_v44 = vpop.f32.mrb[26].mxu0  ;;  %v8738_v56 = vpack.c.bf16 %v4014_v31, %v4014_v31  ;;  %v8736_v58 = vpack.c.bf16 %v4012_v25, %v4012_v25  ;;  %v3761_v61 = vmax.f32 %v3725_v20, 0.0  ;;  %v4746_v5 = vshll.u32 %v11614_v0, 16  ;;  %v11668_v62 = vld [vmem:[%s12845_s3 + $0x4] sm:$0x3]  ;;  %v11674_v31 = vld [vmem:[#allocation2 + $0x18] sm:$0xff]  }
 0x365   : > { %v11642_v2 = vpop.f32.mrb[27].mxu0  ;;  %v4292_v33 = vrot.slane %v4290_v37, 6  ;;  %v4295_v16 = vrot.slane %v4293_v30, 7  ;;  %v4015_v45 = vmul.f32 %v3914_v38, %v3763_v35  ;;  %v4741_v18 = vsel %vm386_vm1, %v11520_v55, %v4740_v48  ;;  %v11656_v57 = vpop.permute.xlu1 %3923 }
 0x366   : > { %v4340_v13 = vshrl.u32 %v8738_v56, 16  ;;  %v4343_v41 = vshll.u32 %v8738_v56, 16  ;;  %v4320_v21 = vshrl.u32 %v8736_v58, 16  ;;  %v4323_v17 = vshll.u32 %v8736_v58, 16  ;;  %9442 = vmatprep.mubr.msk.bf16.mxu1 %vm4878_vm10, %v4741_v18 }
 0x367   : > { %v4296_v27 = vor.u32 %v4295_v16, %v4292_v33  ;;  %v8739_v49 = vpack.c.bf16 %v4015_v45, %v4015_v45  ;;  %v4744_v43 = vor.u32 %v4742_v52, %v4740_v48  ;;  %v4013_v54 = vmul.f32 %v3904_v15, %v3761_v61  ;;  %v3929_v48 = vpop.permute.xlu0 %3928  ;;  %v11688_v61 = vld [vmem:[#allocation2 + $0x20] sm:$0xff]  }
 0x368   : > { %v4342_v4 = vrot.slane %v4340_v13, 6  ;;  %v4345_v19 = vrot.slane %v4343_v41, 7  ;;  %v4322_v34 = vrot.slane %v4320_v21, 6  ;;  %v4325_v59 = vrot.slane %v4323_v17, 7 }
 0x369   : > { %v4297_v63 = vsel %vm11529_vm7, %v4288_v8, %v4296_v27  ;;  %v4298_v50 = vrot.slane %v4296_v27, 4  ;;  %v4350_v55 = vshrl.u32 %v8739_v49, 16  ;;  %v4353_v46 = vshll.u32 %v8739_v49, 16  ;;  %v11649_v53 = vpop.f32.mrb[28].mxu0 }
 0x36a   : > { %4571 = vst.msk [vmem:[#allocation2 + $0x3c] sm:$0xf] %vm4032_vm6, %v4297_v63  ;;  %v11652_v36 = vor.u32 %v4345_v19, %v4342_v4  ;;  %v4326_v32 = vor.u32 %v4325_v59, %v4322_v34  ;;  %v8737_v10 = vpack.c.bf16 %v4013_v54, %v4013_v54  ;;  %v4748_v15 = vrot.slane %v4746_v5, 1  ;;  %v11654_v60 = vpop.f32.mrb[29].mxu0 }
 0x36b   : > { %v4307_v8 = vsel %vm11529_vm7, %v4298_v50, %v11603_v29  ;;  %v4352_v22 = vrot.slane %v4350_v55, 6  ;;  %v4355_v12 = vrot.slane %v4353_v46, 7  ;;  %v3730_v28 = vadd.f32 %v11589_v3, %v11510_v51  ;;  %v11663_v40 = vpop.f32.mrb[30].mxu0  ;;  %v3939_v55 = vpop.permute.xlu0 %3938 }
 0x36c   : > { %4572 = vst.msk [vmem:[#allocation2 + $0x40] sm:$0xf] %vm4032_vm6, %v4307_v8  ;;  %v4348_v52 = vrot.slane %v11652_v36, 4  ;;  %v4327_v20 = vsel %vm11529_vm7, %v4318_v42, %v4326_v32  ;;  %v4328_v29 = vrot.slane %v4326_v32, 4  ;;  %v4330_v23 = vshrl.u32 %v8737_v10, 16  ;;  %v11676_v25 = vpop.f32.mrb[31].mxu0 }
 0x36d   : > { %4574 = vst.msk [vmem:[#allocation2 + $0x48] sm:$0xf] %vm4032_vm6, %v4327_v20  ;;  %v11679_v3 = vor.u32 %v4355_v12, %v4352_v22  ;;  %v4333_v37 = vshll.u32 %v8737_v10, 16  ;;  %v4749_v30 = vsel %vm386_vm1, %v4744_v43, %v4748_v15  ;;  %v3766_v35 = vmax.f32 %v3730_v28, 0.0 }
 0x36e   : > { %v4332_v38 = vrot.slane %v4330_v23, 6  ;;  %9443 = vmatmul.mubr.msk.bf16.vlgmr.msra.gmra.mrb[0].mxu1 %vm4878_vm10, %v4749_v30  ;;  %v3728_v42 = vadd.f32 %v11510_v51, %v11593_v6  ;;  %v3731_v56 = vadd.f32 %v11596_v11, %v11510_v51  ;;  %v4750_v58 = vshrl.u32 %v11614_v0, 16  ;;  %v3934_v0 = vpop.permute.xlu1 %3933 }
 0x36f   : > { %v4357_v5 = vsel %vm11529_vm7, %v4348_v52, %v11679_v3  ;;  %v4358_v33 = vrot.slane %v11679_v3, 4  ;;  %v4335_v16 = vrot.slane %v4333_v37, 7  ;;  %9479 = vmatpush3.bf16.msra.mxu1 %v11523_v1  ;;  %v4018_v45 = vmul.f32 %v3929_v48, %v3766_v35 }
 0x370   : > { %4577 = vst.msk [vmem:[#allocation2 + $0x54] sm:$0xf] %vm4032_vm6, %v4357_v5  ;;  %v3764_v6 = vmax.f32 %v3728_v42, 0.0  ;;  %v3767_v18 = vmax.f32 %v3731_v56, 0.0  ;;  %v4752_v13 = vor.u32 %v4750_v58, %v4748_v15  ;;  %v4754_v11 = vshll.u32 %v11674_v31, 16  ;;  %10369 = vmatprep.subr.msk.bf16.mxu1 %vm4933_vm0, %v11668_v62 }
 0x371   : > { %v4336_v41 = vor.u32 %v4335_v16, %v4332_v38  ;;  %v8742_v21 = vpack.c.bf16 %v4018_v45, %v4018_v45  ;;  %v3729_v17 = vadd.f32 %v11510_v51, %v11600_v9  ;;  %v4758_v27 = vshrl.u32 %v11674_v31, 16  ;;  %v11702_v1 = vpop.f32.mrb[32].mxu0 }
 0x372   : > { %v4016_v49 = vmul.f32 %v3919_v39, %v3764_v6  ;;  %v4019_v43 = vmul.f32 %v3934_v0, %v3767_v18  ;;  %v4756_v54 = vrot.slane %v4754_v11, 1  ;;  %v4762_v4 = vshll.u32 %v11688_v61, 16  ;;  %v11705_v19 = vpop.f32.mrb[33].mxu0  ;;  %v3944_v58 = vpop.permute.xlu1 %3943  ;;  %v11731_v0 = vld [vmem:[#allocation2 + $0x28] sm:$0xff]  }
 0x373   : > { %v4337_v34 = vsel %vm11529_vm7, %v4328_v29, %v4336_v41  ;;  %v4338_v59 = vrot.slane %v4336_v41, 4  ;;  %v4380_v63 = vshrl.u32 %v8742_v21, 16  ;;  %v4383_v50 = vshll.u32 %v8742_v21, 16  ;;  %v11711_v10 = vpop.f32.mrb[34].mxu0  ;;  %v3949_v18 = vpop.permute.xlu0 %3948 }
 0x374   : > { %4575 = vst.msk [vmem:[#allocation2 + $0x4c] sm:$0xf] %vm4032_vm6, %v4337_v34  ;;  %v8740_v9 = vpack.c.bf16 %v4016_v49, %v4016_v49  ;;  %v8743_v46 = vpack.c.bf16 %v4019_v43, %v4019_v43  ;;  %v4757_v32 = vsel %vm386_vm1, %v4752_v13, %v4756_v54  ;;  %v3765_v39 = vmax.f32 %v3729_v17, 0.0  ;;  %v11717_v28 = vpop.f32.mrb[35].mxu0 }
 0x375   : > { %v4347_v15 = vsel %vm11529_vm7, %v4338_v59, %v11652_v36  ;;  %v4382_v8 = vrot.slane %v4380_v63, 6  ;;  %v4385_v22 = vrot.slane %v4383_v50, 7  ;;  %9446 = vmatprep.mubr.msk.bf16.mxu1 %vm4878_vm10, %v4757_v32  ;;  %v4760_v12 = vor.u32 %v4758_v27, %v4756_v54 }
 0x376   : > { %4576 = vst.msk [vmem:[#allocation2 + $0x50] sm:$0xf] %vm4032_vm6, %v4347_v15  ;;  %v4360_v52 = vshrl.u32 %v8740_v9, 16  ;;  %v4363_v20 = vshll.u32 %v8740_v9, 16  ;;  %v4390_v29 = vshrl.u32 %v8743_v46, 16  ;;  %v4393_v23 = vshll.u32 %v8743_v46, 16  ;;  %v3954_v46 = vpop.permute.xlu1 %3953 }
 0x377   : > { %v4386_v37 = vor.u32 %v4385_v22, %v4382_v8  ;;  %v4017_v30 = vmul.f32 %v11656_v57, %v3765_v39  ;;  %v4764_v35 = vrot.slane %v4762_v4, 1  ;;  %v3734_v36 = vadd.f32 %v11630_v7, %v11510_v51  ;;  %v11747_v9 = vld [vmem:[#allocation2 + $0x30] sm:$0xff]  }
 0x378   : > { %v4362_v48 = vrot.slane %v4360_v52, 6  ;;  %v4365_v38 = vrot.slane %v4363_v20, 7  ;;  %v4392_v42 = vrot.slane %v4390_v29, 6  ;;  %v4395_v56 = vrot.slane %v4393_v23, 7 }
 0x379   : > { %v4388_v5 = vrot.slane %v4386_v37, 4  ;;  %v8741_v16 = vpack.c.bf16 %v4017_v30, %v4017_v30  ;;  %v4765_v45 = vsel %vm386_vm1, %v4760_v12, %v4764_v35  ;;  %v3770_v6 = vmax.f32 %v3734_v36, 0.0  ;;  %v11752_v36 = vpop.permute.xlu0 %3958 }
 0x37a   : > { %v4366_v13 = vor.u32 %v4365_v38, %v4362_v48  ;;  %v11724_v11 = vor.u32 %v4395_v56, %v4392_v42  ;;  %9447 = vmatmul.mubr.msk.bf16.gmra.mrb[4].mxu1 %vm4878_vm10, %v4765_v45  ;;  %v3732_v57 = vadd.f32 %v11510_v51, %v11636_v26  ;;  %v3735_v7 = vadd.f32 %v11639_v44, %v11510_v51 }
 0x37b   : > { %v4370_v41 = vshrl.u32 %v8741_v16, 16  ;;  %v4373_v21 = vshll.u32 %v8741_v16, 16  ;;  %v4022_v17 = vmul.f32 %v3949_v18, %v3770_v6  ;;  %v4766_v27 = vshrl.u32 %v11688_v61, 16 }
 0x37c   : > { %v4367_v49 = vsel %vm11529_vm7, %v4358_v33, %v4366_v13  ;;  %v4368_v43 = vrot.slane %v4366_v13, 4  ;;  %v4397_v26 = vsel %vm11529_vm7, %v4388_v5, %v11724_v11  ;;  %v4398_v54 = vrot.slane %v11724_v11, 4 }
 0x37d   : > { %4578 = vst.msk [vmem:[#allocation2 + $0x58] sm:$0xf] %vm4032_vm6, %v4367_v49  ;;  %4581 = vst.msk [vmem:[#allocation2 + $0x64] sm:$0xf] %vm4032_vm6, %v4397_v26  ;;  %v4372_v44 = vrot.slane %v4370_v41, 6  ;;  %v4375_v4 = vrot.slane %v4373_v21, 7  ;;  %v8746_v34 = vpack.c.bf16 %v4022_v17, %v4022_v17  ;;  %v4768_v3 = vor.u32 %v4766_v27, %v4764_v35  ;;  %v3964_v49 = vpop.permute.xlu1 %3963 }
 0x37e   : > { %v3768_v59 = vmax.f32 %v3732_v57, 0.0  ;;  %v3771_v63 = vmax.f32 %v3735_v7, 0.0  ;;  %v4770_v50 = vshll.u32 %v11731_v0, 16  ;;  %v3733_v33 = vadd.f32 %v11510_v51, %v11642_v2 }
 0x37f   : > { %v4376_v32 = vor.u32 %v4375_v4, %v4372_v44  ;;  %v4420_v39 = vshrl.u32 %v8746_v34, 16  ;;  %v4423_v15 = vshll.u32 %v8746_v34, 16  ;;  %v4774_v20 = vshrl.u32 %v11731_v0, 16  ;;  %v3969_v34 = vpop.permute.xlu0 %3968 }
 0x380   : > { %v4020_v8 = vmul.f32 %v3939_v55, %v3768_v59  ;;  %v4023_v22 = vmul.f32 %v3954_v46, %v3771_v63  ;;  %v4772_v12 = vrot.slane %v4770_v50, 1  ;;  %v3769_v52 = vmax.f32 %v3733_v33, 0.0  ;;  %v11771_v50 = vld [vmem:[#allocation2 + $0x38] sm:$0xff]  }
 0x381   : > { %v4377_v29 = vsel %vm11529_vm7, %v4368_v43, %v4376_v32  ;;  %v4378_v23 = vrot.slane %v4376_v32, 4  ;;  %v4422_v30 = vrot.slane %v4420_v39, 6  ;;  %v4425_v35 = vrot.slane %v4423_v15, 7 }
 0x382   : > { %4579 = vst.msk [vmem:[#allocation2 + $0x5c] sm:$0xf] %vm4032_vm6, %v4377_v29  ;;  %v8744_v2 = vpack.c.bf16 %v4020_v8, %v4020_v8  ;;  %v8747_v48 = vpack.c.bf16 %v4023_v22, %v4023_v22  ;;  %v4773_v38 = vsel %vm386_vm1, %v4768_v3, %v4772_v12  ;;  %v4021_v55 = vmul.f32 %v3944_v58, %v3769_v52  ;;  %v11790_v29 = vld [vmem:[%s12844_s2] ss:$0 sm:$0xff] }
 0x383   : > { %v4387_v42 = vsel %vm11529_vm7, %v4378_v23, %v4386_v37  ;;  %v4426_v56 = vor.u32 %v4425_v35, %v4422_v30  ;;  %9450 = vmatprep.mubr.msk.bf16.mxu1 %vm4878_vm10, %v4773_v38  ;;  %v4776_v5 = vor.u32 %v4774_v20, %v4772_v12  ;;  %v4778_v16 = vshll.u32 %v11747_v9, 16  ;;  %v11784_v20 = vld [vmem:[#allocation2 + $0x40] sm:$0xff]   ;;  %v3974_v35 = vpop.permute.xlu1 %3973 }
 0x384   : > { %4580 = vst.msk [vmem:[#allocation2 + $0x60] sm:$0xf] %vm4032_vm6, %v4387_v42  ;;  %v4400_v45 = vshrl.u32 %v8744_v2, 16  ;;  %v4403_v6 = vshll.u32 %v8744_v2, 16  ;;  %v4430_v18 = vshrl.u32 %v8747_v48, 16  ;;  %v4433_v13 = vshll.u32 %v8747_v48, 16  ;;  %v3979_v42 = vpop.permute.xlu0 %3978 }
 0x385   : > { %v4428_v57 = vrot.slane %v4426_v56, 4  ;;  %v8745_v7 = vpack.c.bf16 %v4021_v55, %v4021_v55  ;;  %v4780_v41 = vrot.slane %v4778_v16, 1  ;;  %v3738_v58 = vadd.f32 %v11649_v53, %v11510_v51 }
 0x386   : > { %v4402_v21 = vrot.slane %v4400_v45, 6  ;;  %v4405_v37 = vrot.slane %v4403_v6, 7  ;;  %v4432_v17 = vrot.slane %v4430_v18, 6  ;;  %v4435_v27 = vrot.slane %v4433_v13, 7 }
 0x387   : > { %v4410_v43 = vshrl.u32 %v8745_v7, 16  ;;  %v4413_v26 = vshll.u32 %v8745_v7, 16  ;;  %v4781_v44 = vsel %vm386_vm1, %v4776_v5, %v4780_v41  ;;  %v3774_v4 = vmax.f32 %v3738_v58, 0.0 }
 0x388   : > { %v4406_v59 = vor.u32 %v4405_v37, %v4402_v21  ;;  %v11764_v63 = vor.u32 %v4435_v27, %v4432_v17  ;;  %9451 = vmatmul.mubr.msk.bf16.gmra.mrb[8].mxu1 %vm4878_vm10, %v4781_v44  ;;  %v3736_v3 = vadd.f32 %v11510_v51, %v11654_v60  ;;  %v3739_v53 = vadd.f32 %v11663_v40, %v11510_v51 }
 0x389   : > { %v4412_v33 = vrot.slane %v4410_v43, 6  ;;  %v4415_v46 = vrot.slane %v4413_v26, 7  ;;  %v4026_v32 = vmul.f32 %v3969_v34, %v3774_v4  ;;  %v4782_v39 = vshrl.u32 %v11747_v9, 16 }
 0x38a   : > { %v4407_v15 = vsel %vm11529_vm7, %v4398_v54, %v4406_v59  ;;  %v4408_v8 = vrot.slane %v4406_v59, 4  ;;  %v4437_v60 = vsel %vm11529_vm7, %v4428_v57, %v11764_v63  ;;  %v4438_v22 = vrot.slane %v11764_v63, 4 }
 0x38b   : > { %4582 = vst.msk [vmem:[#allocation2 + $0x68] sm:$0xf] %vm4032_vm6, %v4407_v15  ;;  %4585 = vst.msk [vmem:[#allocation2 + $0x74] sm:$0xf] %vm4032_vm6, %v4437_v60  ;;  %v4416_v51 = vor.u32 %v4415_v46, %v4412_v33  ;;  %v8750_v40 = vpack.c.bf16 %v4026_v32, %v4026_v32  ;;  %v3772_v12 = vmax.f32 %v3736_v3, 0.0  ;;  %v3775_v52 = vmax.f32 %v3739_v53, 0.0  ;;  %v3989_v53 = vpop.permute.xlu0 %3988 }
 0x38c   : > { %v4784_v11 = vor.u32 %v4782_v39, %v4780_v41  ;;  %v4786_v54 = vshll.u32 %v11771_v50, 16  ;;  %v3737_v23 = vadd.f32 %v11790_v29, %v11676_v25  ;;  %v4790_v30 = vshrl.u32 %v11771_v50, 16  ;;  %v3984_v39 = vpop.permute.xlu1 %3983 }
 0x38d   : > { %v4417_v2 = vsel %vm11529_vm7, %v4408_v8, %v4416_v51  ;;  %v4418_v48 = vrot.slane %v4416_v51, 4  ;;  %v4460_v38 = vshrl.u32 %v8750_v40, 16  ;;  %v4463_v55 = vshll.u32 %v8750_v40, 16 }
 0x38e   : > { %4583 = vst.msk [vmem:[#allocation2 + $0x6c] sm:$0xf] %vm4032_vm6, %v4417_v2  ;;  %v4024_v5 = vmul.f32 %v11752_v36, %v3772_v12  ;;  %v4027_v16 = vmul.f32 %v3974_v35, %v3775_v52  ;;  %v4788_v45 = vrot.slane %v4786_v54, 1  ;;  %v3773_v6 = vmax.f32 %v3737_v23, 0.0  ;;  %v11815_v52 = vld [vmem:[#allocation2 + $0x48] sm:$0xff]  }
 0x38f   : > { %v4427_v25 = vsel %vm11529_vm7, %v4418_v48, %v4426_v56  ;;  %v4462_v18 = vrot.slane %v4460_v38, 6  ;;  %v4465_v13 = vrot.slane %v4463_v55, 7  ;;  %v4794_v57 = vshll.u32 %v11784_v20, 16  ;;  %v11826_v38 = vld [vmem:[#allocation2 + $0x50] sm:$0xff]  }
 0x390   : > { %4584 = vst.msk [vmem:[#allocation2 + $0x70] sm:$0xf] %vm4032_vm6, %v4427_v25  ;;  %v8748_v7 = vpack.c.bf16 %v4024_v5, %v4024_v5  ;;  %v8751_v41 = vpack.c.bf16 %v4027_v16, %v4027_v16  ;;  %v4789_v58 = vsel %vm386_vm1, %v4784_v11, %v4788_v45  ;;  %v4025_v21 = vmul.f32 %v3964_v49, %v3773_v6 }
 0x391   : > { %v4466_v37 = vor.u32 %v4465_v13, %v4462_v18  ;;  %9454 = vmatprep.mubr.msk.bf16.mxu1 %vm4878_vm10, %v4789_v58  ;;  %v4792_v36 = vor.u32 %v4790_v30, %v4788_v45  ;;  %v4796_v17 = vrot.slane %v4794_v57, 1  ;;  %v3742_v27 = vadd.f32 %v11790_v29, %v11702_v1  ;;  %v3994_v18 = vpop.permute.xlu1 %3993 }
 0x392   : > { %v4440_v56 = vshrl.u32 %v8748_v7, 16  ;;  %v4443_v43 = vshll.u32 %v8748_v7, 16  ;;  %v4470_v26 = vshrl.u32 %v8751_v41, 16  ;;  %v4473_v44 = vshll.u32 %v8751_v41, 16 }
 0x393   : > { %v4468_v4 = vrot.slane %v4466_v37, 4  ;;  %v8749_v34 = vpack.c.bf16 %v4025_v21, %v4025_v21  ;;  %v4797_v59 = vsel %vm386_vm1, %v4792_v36, %v4796_v17  ;;  %v3778_v3 = vmax.f32 %v3742_v27, 0.0 }
 0x394   : > { %v4442_v33 = vrot.slane %v4440_v56, 6  ;;  %v4445_v49 = vrot.slane %v4443_v43, 7  ;;  %v4472_v46 = vrot.slane %v4470_v26, 6  ;;  %v4475_v32 = vrot.slane %v4473_v44, 7  ;;  %9455 = vmatmul.mubr.msk.bf16.gmra.mrb[12].mxu1 %vm4878_vm10, %v4797_v59  ;;  %v11842_v56 = vld [vmem:[#allocation2 + $0x58] sm:$0xff]  }
 0x395   : > { %v4450_v15 = vshrl.u32 %v8749_v34, 16  ;;  %v4453_v8 = vshll.u32 %v8749_v34, 16  ;;  %v4030_v1 = vmul.f32 %v3989_v53, %v3778_v3  ;;  %v3740_v60 = vadd.f32 %v11790_v29, %v11705_v19  ;;  %v11848_v53 = vld [vmem:[#allocation2 + $0x60] sm:$0xff]  }
 0x396   : > { %v4446_v51 = vor.u32 %v4445_v49, %v4442_v33  ;;  %v11811_v40 = vor.u32 %v4475_v32, %v4472_v46  ;;  %v3743_v12 = vadd.f32 %v11790_v29, %v11711_v10  ;;  %v4798_v11 = vshrl.u32 %v11784_v20, 16 }
 0x397   : > { %v4452_v54 = vrot.slane %v4450_v15, 6  ;;  %v4455_v23 = vrot.slane %v4453_v8, 7  ;;  %v8754_v30 = vpack.c.bf16 %v4030_v1, %v4030_v1  ;;  %v3776_v35 = vmax.f32 %v3740_v60, 0.0 }
 0x398   : > { %v4447_v2 = vsel %vm11529_vm7, %v4438_v22, %v4446_v51  ;;  %v4448_v19 = vrot.slane %v4446_v51, 4  ;;  %v4477_v48 = vsel %vm11529_vm7, %v4468_v4, %v11811_v40  ;;  %v4478_v10 = vrot.slane %v11811_v40, 4 }
 0x399   : > { %4586 = vst.msk [vmem:[#allocation2 + $0x78] sm:$0xf] %vm4032_vm6, %v4447_v2  ;;  %4589 = vst.msk [vmem:[#allocation2 + $0x84] sm:$0xf] %vm4032_vm6, %v4477_v48  ;;  %v4456_v55 = vor.u32 %v4455_v23, %v4452_v54  ;;  %v4500_v5 = vshrl.u32 %v8754_v30, 16  ;;  %v4503_v16 = vshll.u32 %v8754_v30, 16  ;;  %v4028_v63 = vmul.f32 %v3979_v42, %v3776_v35 }
 0x39a   : > { %v3779_v45 = vmax.f32 %v3743_v12, 0.0  ;;  %v4800_v6 = vor.u32 %v4798_v11, %v4796_v17  ;;  %v4802_v22 = vshll.u32 %v11815_v52, 16  ;;  %v3741_v25 = vadd.f32 %v11790_v29, %v11717_v28  ;;  %v11855_v11 = vld [vmem:[#allocation2 + $0x68] sm:$0xff]   ;;  %v11857_v2 = vld [vmem:[#allocation2 + $0x70] sm:$0xff]  }
 0x39b   : > { %v4457_v13 = vsel %vm11529_vm7, %v4448_v19, %v4456_v55  ;;  %v4458_v57 = vrot.slane %v4456_v55, 4  ;;  %v4502_v7 = vrot.slane %v4500_v5, 6  ;;  %v4505_v41 = vrot.slane %v4503_v16, 7  ;;  %v4594_v16 = vld [vmem:[#allocation2 + $0x98] sm:$0x3] }
 0x39c   : > { %4587 = vst.msk [vmem:[#allocation2 + $0x7c] sm:$0xf] %vm4032_vm6, %v4457_v13  ;;  %v8752_v58 = vpack.c.bf16 %v4028_v63, %v4028_v63  ;;  %v4031_v21 = vmul.f32 %v3994_v18, %v3779_v45  ;;  %v4804_v36 = vrot.slane %v4802_v22, 1  ;;  %v3777_v42 = vmax.f32 %v3741_v25, 0.0 }
 0x39d   : > { %v4467_v17 = vsel %vm11529_vm7, %v4458_v57, %v4466_v37  ;;  %v11838_v27 = vor.u32 %v4505_v41, %v4502_v7  ;;  %v4806_v28 = vshrl.u32 %v11815_v52, 16  ;;  %v4810_v29 = vshll.u32 %v11826_v38, 16 }
 0x39e   : > { %4588 = vst.msk [vmem:[#allocation2 + $0x80] sm:$0xf] %vm4032_vm6, %v4467_v17  ;;  %v4480_v43 = vshrl.u32 %v8752_v58, 16  ;;  %v4483_v26 = vshll.u32 %v8752_v58, 16  ;;  %v8755_v44 = vpack.c.bf16 %v4031_v21, %v4031_v21  ;;  %v4805_v4 = vsel %vm386_vm1, %v4800_v6, %v4804_v36 }
 0x39f   : > { %v4508_v34 = vrot.slane %v11838_v27, 4  ;;  %9458 = vmatprep.mubr.msk.bf16.mxu1 %vm4878_vm10, %v4805_v4  ;;  %v4029_v37 = vmul.f32 %v3984_v39, %v3777_v42  ;;  %v4808_v59 = vor.u32 %v4806_v28, %v4804_v36  ;;  %v4812_v3 = vrot.slane %v4810_v29, 1 }
 0x3a0   : > { %v4482_v33 = vrot.slane %v4480_v43, 6  ;;  %v4485_v49 = vrot.slane %v4483_v26, 7  ;;  %v4510_v46 = vshrl.u32 %v8755_v44, 16  ;;  %v4513_v32 = vshll.u32 %v8755_v44, 16 }
 0x3a1   : > { %v8753_v15 = vpack.c.bf16 %v4029_v37, %v4029_v37  ;;  %v4813_v8 = vsel %vm386_vm1, %v4808_v59, %v4812_v3  ;;  %v4814_v1 = vshrl.u32 %v11826_v38, 16  ;;  %v4818_v60 = vshll.u32 %v11842_v56, 16 }
 0x3a2   : > { %v4486_v51 = vor.u32 %v4485_v49, %v4482_v33  ;;  %v4512_v40 = vrot.slane %v4510_v46, 6  ;;  %v4515_v12 = vrot.slane %v4513_v32, 7  ;;  %9459 = vmatmul.mubr.msk.bf16.gmra.mrb[16].mxu1 %vm4878_vm10, %v4813_v8  ;;  %v4822_v39 = vshrl.u32 %v11842_v56, 16 }
 0x3a3   : > { %v4490_v54 = vshrl.u32 %v8753_v15, 16  ;;  %v4493_v23 = vshll.u32 %v8753_v15, 16  ;;  %v4816_v30 = vor.u32 %v4814_v1, %v4812_v3  ;;  %v4820_v35 = vrot.slane %v4818_v60, 1 }
 0x3a4   : > { %v4487_v19 = vsel %vm11529_vm7, %v4478_v10, %v4486_v51  ;;  %v4488_v48 = vrot.slane %v4486_v51, 4  ;;  %v4516_v55 = vor.u32 %v4515_v12, %v4512_v40  ;;  %v4826_v5 = vshll.u32 %v11848_v53, 16  ;;  %v11867_v10 = vld [vmem:[#allocation2 + $0x78] sm:$0xff]  }
 0x3a5   : > { %4590 = vst.msk [vmem:[#allocation2 + $0x88] sm:$0xf] %vm4032_vm6, %v4487_v19  ;;  %v4492_v63 = vrot.slane %v4490_v54, 6  ;;  %v4495_v45 = vrot.slane %v4493_v23, 7  ;;  %v4821_v6 = vsel %vm386_vm1, %v4816_v30, %v4820_v35  ;;  %v4824_v22 = vor.u32 %v4822_v39, %v4820_v35  ;;  %v11879_v26 = vld [vmem:[#allocation2 + $0x80] sm:$0xff]  }
 0x3a6   : > { %v4517_v25 = vsel %vm11529_vm7, %v4508_v34, %v4516_v55  ;;  %v4518_v18 = vrot.slane %v4516_v55, 4  ;;  %9462 = vmatprep.mubr.msk.bf16.mxu1 %vm4878_vm10, %v4821_v6  ;;  %v4828_v13 = vrot.slane %v4826_v5, 1  ;;  %v4830_v7 = vshrl.u32 %v11848_v53, 16  ;;  %v5643_v55 = vld [vmem:[#allocation2 + $0x8] sm:$0xe]  ;;  %v11919_v6 = vld [vmem:[#allocation2 + $0x20] sm:$0xff]  }
 0x3a7   : > { %4593 = vst.msk [vmem:[#allocation2 + $0x94] sm:$0xf] %vm4032_vm6, %v4517_v25  ;;  %v4496_v57 = vor.u32 %v4495_v45, %v4492_v63  ;;  %v4834_v41 = vshll.u32 %v11855_v11, 16  ;;  %v4842_v58 = vshll.u32 %v11857_v2, 16  ;;  %v4838_v42 = vshrl.u32 %v11855_v11, 16  ;;  %v11917_v45 = vld [vmem:[#allocation2 + $0x18] sm:$0xff]  }
 0x3a8   : > { %v4595_v21 = vsel %vm11484_vm12, %v4518_v18, %v4594_v16  ;;  %v4829_v36 = vsel %vm386_vm1, %v4824_v22, %v4828_v13  ;;  %v4832_v29 = vor.u32 %v4830_v7, %v4828_v13  ;;  %v4850_v24 = vshll.u32 %v11867_v10, 16  ;;  %v11914_v16 = vld [vmem:[#allocation2 + $0x10] sm:$0xff]   ;;  %v11922_v22 = vld [vmem:[#allocation2 + $0x28] sm:$0xff]  }
 0x3a9   : > { %4596 = vst [vmem:[#allocation2 + $0x98] sm:$0x3] %v4595_v21  ;;  %v4497_v17 = vsel %vm11529_vm7, %v4488_v48, %v4496_v57  ;;  %v4498_v28 = vrot.slane %v4496_v57, 4  ;;  %v4836_v43 = vrot.slane %v4834_v41, 1  ;;  %v4844_v44 = vrot.slane %v4842_v58, 1  ;;  %v11931_v7 = vld [vmem:[#allocation2 + $0x30] sm:$0xff]  }
 0x3aa   : > { %4591 = vst.msk [vmem:[#allocation2 + $0x8c] sm:$0xf] %vm4032_vm6, %v4497_v17  ;;  %9463 = vmatmul.mubr.msk.bf16.gmra.mrb[20].mxu1 %vm4878_vm10, %v4829_v36  ;;  %v4846_v59 = vshrl.u32 %v11857_v2, 16  ;;  %v4852_v3 = vrot.slane %v4850_v24, 1  ;;  %v4858_v33 = vshll.u32 %v11879_v26, 16  ;;  %v4854_v14 = vshrl.u32 %v11867_v10, 16 }
 0x3ab   : > { %v4507_v4 = vsel %vm11529_vm7, %v4498_v28, %v11838_v27  ;;  %v4837_v34 = vsel %vm386_vm1, %v4832_v29, %v4836_v43  ;;  %v4840_v37 = vor.u32 %v4838_v42, %v4836_v43  ;;  %v4862_v51 = vshrl.u32 %v11879_v26, 16  ;;  %v11909_v48 = vld [vmem:[#allocation2 + $0xc] sm:$0xf]  ;;  %v11936_v28 = vld [vmem:[#allocation2 + $0x38] sm:$0xff]  }
 0x3ac   : > { %4592 = vst.msk [vmem:[#allocation2 + $0x90] sm:$0xf] %vm4032_vm6, %v4507_v4  ;;  %9466 = vmatprep.mubr.msk.bf16.mxu1 %vm4878_vm10, %v4837_v34  ;;  %v4848_v49 = vor.u32 %v4846_v59, %v4844_v44  ;;  %v4860_v15 = vrot.slane %v4858_v33, 1  ;;  %v4856_v8 = vor.u32 %v4854_v14, %v4852_v3  ;;  %v11912_v5 = vcombine.low %v5643_v55, %v11909_v48 }
 0x3ad   : > { %v4845_v46 = vsel %vm386_vm1, %v4840_v37, %v4844_v44  ;;  %v6097_v13 = vshrl.u32 %v11914_v16, 16  ;;  %v5428_v57 = vsel %vm4933_vm0, %v11668_v62, 0  ;;  %v6100_v41 = vshll.u32 %v11914_v16, 16  ;;  %v11942_v37 = vld [vmem:[#allocation2 + $0x40] sm:$0xff]  }
 0x3ae   : > { %v4853_v32 = vsel %vm386_vm1, %v4848_v49, %v4852_v3  ;;  %v4864_v12 = vor.u32 %v4862_v51, %v4860_v15  ;;  %v4861_v39 = vsel %vm386_vm1, %v4856_v8, %v4860_v15  ;;  %v6089_v25 = vshrl.u32 %v11912_v5, 16  ;;  %v11953_v51 = vld [vmem:[#allocation2 + $0x50] sm:$0xff]  }
 0x3af   : > { %v6092_v18 = vshll.u32 %v11912_v5, 16  ;;  %v6106_v58 = vshrl.u32 %v11917_v45, 16  ;;  %v6099_v42 = vrot.slane %v6097_v13, 1  ;;  %v6109_v17 = vshll.u32 %v11917_v45, 16 }
 0x3b0   : > { %v6091_v21 = vrot.slane %v6089_v25, 1  ;;  %v6102_v29 = vrot.slane %v6100_v41, 2  ;;  %v6118_v44 = vshll.u32 %v11919_v6, 16  ;;  %v6124_v4 = vshrl.u32 %v11922_v22, 16  ;;  %v11971_v25 = vld [vmem:[#allocation2 + $0x58] sm:$0xff]  }
 0x3b1   : > { %v11895_v27 = vld [vmem:[#allocation2 + $0x88] sm:$0xff]   ;;  %v6094_v36 = vrot.slane %v6092_v18, 2  ;;  %v6108_v43 = vrot.slane %v6106_v58, 1  ;;  %v6111_v24 = vrot.slane %v6109_v17, 2  ;;  %v6127_v34 = vshll.u32 %v11922_v22, 16 }
 0x3b2   : > { %9467 = vmatmul.mubr.msk.bf16.gmra.mrb[24].mxu1 %vm4878_vm10, %v4845_v46  ;;  %v4866_v1 = vshll.u32 %v11895_v27, 16  ;;  %v4870_v30 = vshrl.u32 %v11895_v27, 16  ;;  %v6103_v59 = vor.u32 %v6102_v29, %v6099_v42  ;;  %v6120_v33 = vrot.slane %v6118_v44, 2  ;;  %v11945_v46 = vld [vmem:[#allocation2 + $0x48] sm:$0xff]  }
 0x3b3   : > { %9470 = vmatprep.mubr.msk.bf16.mxu1 %vm4878_vm10, %v4853_v32  ;;  %v11900_v60 = vld [vmem:[#allocation2 + $0x90] ss:$0 sps:$4 sm:$0x11]   ;;  %v6095_v62 = vor.u32 %v6094_v36, %v6091_v21  ;;  %v6133_v49 = vshrl.u32 %v11931_v7, 16  ;;  %v6112_v32 = vor.u32 %v6111_v24, %v6108_v43  ;;  %v6126_v14 = vrot.slane %v6124_v4, 1  ;;  %v11980_v21 = vld [vmem:[#allocation2 + $0x60] sm:$0xff]  }
 0x3b4   : > { %v4868_v40 = vrot.slane %v4866_v1, 1  ;;  %v4874_v54 = vshll.u32 %v11900_v60, 16  ;;  %v6129_v15 = vrot.slane %v6127_v34, 2  ;;  %v6136_v8 = vshll.u32 %v11931_v7, 16  ;;  %v11951_v1 = vld [vmem:[%s12845_s3 + $0x6] sm:$0x3] }
 0x3b5   : > { %v6145_v55 = vshll.u32 %v11936_v28, 16  ;;  %v6151_v41 = vshrl.u32 %v11942_v37, 16  ;;  %v6154_v58 = vshll.u32 %v11942_v37, 16  ;;  %v6160_v17 = vshrl.u32 %v11945_v46, 16 }
 0x3b6   : > { %v4869_v23 = vsel %vm386_vm1, %v4864_v12, %v4868_v40  ;;  %v4872_v35 = vor.u32 %v4870_v30, %v4868_v40  ;;  %v4876_v19 = vrot.slane %v4874_v54, 1  ;;  %v11956_v40 = vsel %vm1746_vm4, %v6095_v62, %v6103_v59  ;;  %v11988_v62 = vld [vmem:[#allocation2 + $0x68] sm:$0xff]  }
 0x3b7   : > { %12864 = vst [vmem:[#allocation3_spill] sm:$0xff] %v11956_v40  ;;  %v6142_v54 = vshrl.u32 %v11936_v28, 16  ;;  %v11964_v30 = vsel %vm1746_vm4, %v6103_v59, %v6112_v32  ;;  %v6147_v42 = vrot.slane %v6145_v55, 2  ;;  %v6153_v29 = vrot.slane %v6151_v41, 1  ;;  %v12010_v41 = vld [vmem:[#allocation2 + $0x80] sm:$0xff]  }
 0x3b8   : > { %v4877_v63 = vsel %vm386_vm1, %v4872_v35, %v4876_v19  ;;  %12865 = vst [vmem:[#allocation4_spill] sm:$0xff] %v11964_v30  ;;  %v6130_v35 = vor.u32 %v6129_v15, %v6126_v14  ;;  %v6138_v19 = vrot.slane %v6136_v8, 2  ;;  %v6156_v43 = vrot.slane %v6154_v58, 2  ;;  %12873 = vst [vmem:[#allocation12_spill] sm:$0xff] %v12010_v41 }
 0x3b9   : > { %v6144_v13 = vrot.slane %v6142_v54, 1  ;;  %v6169_v44 = vshrl.u32 %v11953_v51, 16  ;;  %v6162_v34 = vrot.slane %v6160_v17, 1  ;;  %v6172_v59 = vshll.u32 %v11953_v51, 16  ;;  %v12002_v54 = vld [vmem:[#allocation2 + $0x78] sm:$0xff]  }
 0x3ba   : > { %9471 = vmatmul.mubr.msk.bf16.gmra.mrb[28].mxu1 %vm4878_vm10, %v4861_v39  ;;  %v6135_v39 = vrot.slane %v6133_v49, 1  ;;  %v6178_v14 = vshrl.u32 %v11971_v25, 16  ;;  %12871 = vst [vmem:[#allocation10_spill] sm:$0xff] %v12002_v54  ;;  %v6196_v17 = vshrl.u32 %v11988_v62, 16 }
 0x3bb   : > { %9474 = vmatprep.mubr.msk.bf16.mxu1 %vm4878_vm10, %v4869_v23  ;;  %v11959_v23 = vld [vmem:[#allocation2 + $0x8] sm:$0xff]   ;;  %v6148_v4 = vor.u32 %v6147_v42, %v6144_v13  ;;  %v6174_v8 = vrot.slane %v6172_v59, 2  ;;  %v6190_v13 = vshll.u32 %v11980_v21, 16 }
 0x3bc   : > { %v6139_v36 = vor.u32 %v6138_v19, %v6135_v39  ;;  %v6187_v39 = vshrl.u32 %v11980_v21, 16  ;;  %v6180_v55 = vrot.slane %v6178_v14, 1  ;;  %v6198_v59 = vrot.slane %v6196_v17, 1 }
 0x3be   : > { %v11991_v24 = vsel %vm1746_vm4, %v6130_v35, %v6139_v36  ;;  %v11998_v15 = vsel %vm1746_vm4, %v6139_v36, %v6148_v4  ;;  %v6189_v42 = vrot.slane %v6187_v39, 1 }
 0x3bf   : > { %12868 = vst [vmem:[#allocation7_spill] sm:$0xff] %v11991_v24  ;;  %12870 = vst [vmem:[#allocation9_spill] sm:$0xff] %v11998_v15 }
 0x3c2   : > { %9475 = vmatmul.mubr.msk.bf16.gmra.mrb[32].mxu1 %vm4878_vm10, %v4877_v63  ;;  %v11967_v63 = vld [vmem:[#allocation2 + $0x10] sm:$0xff]  }
 0x3c3   : > { %9480 = vmatprep.mubr.msk.bf16.mxu1 %vm4878_vm10, %v11505_v47  ;;  %v6115_v47 = vshrl.u32 %v11919_v6, 16 }
 0x3c5   : > { %v6117_v3 = vrot.slane %v6115_v47, 1  ;;  %v6163_v47 = vshll.u32 %v11945_v46, 16 }
 0x3c7   : > { %v6121_v12 = vor.u32 %v6120_v33, %v6117_v3  ;;  %v11994_v3 = vld [vmem:[#allocation2 + $0x70] sm:$0xff]   ;;  %v6157_v33 = vor.u32 %v6156_v43, %v6153_v29  ;;  %v6165_v49 = vrot.slane %v6163_v47, 2  ;;  %v6192_v43 = vrot.slane %v6190_v13, 2 }
 0x3c8   : > { %12869 = vst [vmem:[#allocation8_spill] sm:$0xff] %v11994_v3  ;;  %v6199_v47 = vshll.u32 %v11988_v62, 16  ;;  %v6217_v13 = vshll.u32 %v12002_v54, 16 }
 0x3c9   : > { %v11974_v18 = vsel %vm1746_vm4, %v6112_v32, %v6121_v12  ;;  %v6171_v32 = vrot.slane %v6169_v44, 1  ;;  %v6166_v19 = vor.u32 %v6165_v49, %v6162_v34  ;;  %v6205_v44 = vshrl.u32 %v11994_v3, 16 }
 0x3ca   : > { %9481 = vmatmul.mubr.msk.bf16.vlgmr.msra.gmra.mrb[0].mxu1 %vm4878_vm10, %v11959_v23  ;;  %12866 = vst [vmem:[#allocation5_spill] sm:$0xff] %v11974_v18  ;;  %v6208_v49 = vshll.u32 %v11994_v3, 16  ;;  %v6201_v14 = vrot.slane %v6199_v47, 2 }
 0x3cb   : > { %9517 = vmatpush3.bf16.msra.mxu1 %v5428_v57  ;;  %9484 = vmatprep.mubr.msk.bf16.mxu1 %vm4878_vm10, %v11967_v63  ;;  %v11983_v57 = vsel %vm1746_vm4, %v6121_v12, %v6130_v35  ;;  %v6181_v12 = vshll.u32 %v11971_v25, 16  ;;  %v12005_v35 = vsel %vm1746_vm4, %v6148_v4, %v6157_v33  ;;  %v6175_v58 = vor.u32 %v6174_v8, %v6171_v32  ;;  %v12020_v4 = vld [vmem:[#allocation2 + $0x88] sm:$0xff]   ;;  %v12026_v32 = vld [vmem:[#allocation2 + $0x90] sm:$0xff]  }
 0x3cc   : > { %10370 = vmatprep.subr.msk.bf16.mxu1 %vm4933_vm0, %v11951_v1  ;;  %12867 = vst [vmem:[#allocation6_spill] sm:$0xff] %v11983_v57  ;;  %12872 = vst [vmem:[#allocation11_spill] sm:$0xff] %v12005_v35  ;;  %v12016_v29 = vsel %vm1746_vm4, %v6157_v33, %v6166_v19  ;;  %v6207_v33 = vrot.slane %v6205_v44, 1  ;;  %v6214_v8 = vshrl.u32 %v12002_v54, 16  ;;  %v6210_v39 = vrot.slane %v6208_v49, 2 }
 0x3cd   : > { %v6183_v36 = vrot.slane %v6181_v12, 2  ;;  %12874 = vst [vmem:[#allocation13_spill] sm:$0xff] %v12016_v29  ;;  %12875 = vst [vmem:[#allocation14_spill] sm:$0xff] %v12020_v4  ;;  %v6232_v44 = vshrl.u32 %v12020_v4, 16  ;;  %v6241_v29 = vshrl.u32 %v12026_v32, 16 }
 0x3ce   : > { %12877 = vst [vmem:[#allocation16_spill] sm:$0xff] %v12026_v32  ;;  %v6216_v17 = vrot.slane %v6214_v8, 1 }
 0x3cf   : > { %v6184_v34 = vor.u32 %v6183_v36, %v6180_v55  ;;  %v6202_v36 = vor.u32 %v6201_v14, %v6198_v59  ;;  %v6234_v14 = vrot.slane %v6232_v44, 1 }
 0x3d1   : > { %v12030_v12 = vsel %vm1746_vm4, %v6175_v58, %v6184_v34 }
 0x3d2   : > { %9485 = vmatmul.mubr.msk.bf16.gmra.mrb[4].mxu1 %vm4878_vm10, %v11674_v31  ;;  %v12023_v31 = vsel %vm1746_vm4, %v6166_v19, %v6175_v58  ;;  %12878 = vst [vmem:[#allocation17_spill] sm:$0xff] %v12030_v12  ;;  %v6223_v19 = vshrl.u32 %v12010_v41, 16  ;;  %v6235_v12 = vshll.u32 %v12020_v4, 16 }
 0x3d3   : > { %9488 = vmatprep.mubr.msk.bf16.mxu1 %vm4878_vm10, %v11688_v61  ;;  %12876 = vst [vmem:[#allocation15_spill] sm:$0xff] %v12023_v31  ;;  %v6193_v61 = vor.u32 %v6192_v43, %v6189_v42  ;;  %v6226_v31 = vshll.u32 %v12010_v41, 16  ;;  %v6211_v42 = vor.u32 %v6210_v39, %v6207_v33  ;;  %v6219_v43 = vrot.slane %v6217_v13, 2  ;;  %v6528_v39 = vld [vmem:[#allocation2 + $0x8] sm:$0xc] }
 0x3d4   : > { %v6225_v47 = vrot.slane %v6223_v19, 1  ;;  %v6237_v8 = vrot.slane %v6235_v12, 2  ;;  %v8620_v19 = vcombine.low %v6528_v39, %v11909_v48  ;;  %v6547_v39 = vrot.slane %v11942_v37, 2 }
 0x3d5   : > { %v12035_v55 = vsel %vm1746_vm4, %v6184_v34, %v6193_v61  ;;  %v12040_v58 = vsel %vm1746_vm4, %v6193_v61, %v6202_v36  ;;  %v6228_v49 = vrot.slane %v6226_v31, 2  ;;  %v12047_v34 = vsel %vm1746_vm4, %v6202_v36, %v6211_v42 }
 0x3d6   : > { %12879 = vst [vmem:[#allocation18_spill] sm:$0xff] %v12035_v55  ;;  %12880 = vst [vmem:[#allocation19_spill] sm:$0xff] %v12040_v58  ;;  %v6220_v59 = vor.u32 %v6219_v43, %v6216_v17  ;;  %v6243_v61 = vrot.slane %v6241_v29, 1  ;;  %v6244_v31 = vshll.u32 %v12026_v32, 16  ;;  %v6238_v36 = vor.u32 %v6237_v8, %v6234_v14  ;;  %v12190_v55 = vld [vmem:[#allocation2 + $0x50] sm:$0xff]  }
 0x3d7   : > { %12881 = vst [vmem:[#allocation20_spill] sm:$0xff] %v12047_v34  ;;  %v6229_v33 = vor.u32 %v6228_v49, %v6225_v47  ;;  %v6535_v43 = vrot.slane %v11914_v16, 2  ;;  %v6534_v44 = vrot.slane %v8620_v19, 2  ;;  %v6541_v47 = vrot.slane %v11922_v22, 2 }
 0x3d8   : > { %v12053_v13 = vsel %vm1746_vm4, %v6211_v42, %v6220_v59  ;;  %v6246_v17 = vrot.slane %v6244_v31, 2  ;;  %v6539_v42 = vrot.slane %v11919_v6, 2  ;;  %v6549_v19 = vrot.slane %v11945_v46, 2 }
 0x3d9   : > { %12882 = vst [vmem:[#allocation21_spill] sm:$0xff] %v12053_v13  ;;  %v12062_v29 = vsel %vm1746_vm4, %v6229_v33, %v6238_v36  ;;  %v12069_v48 = vsel %vm2193_vm5, %v6534_v44, %v6535_v43  ;;  %v6553_v44 = vrot.slane %v11971_v25, 2 }
 0x3da   : > { %9489 = vmatmul.mubr.msk.bf16.gmra.mrb[8].mxu1 %vm4878_vm10, %v11731_v0  ;;  %v12057_v0 = vsel %vm1746_vm4, %v6220_v59, %v6229_v33  ;;  %12884 = vst [vmem:[#allocation23_spill] sm:$0xff] %v12062_v29  ;;  %v12064_v12 = vor.u32 %v6246_v17, %v6243_v61  ;;  %12886 = vst [vmem:[#allocation25_spill] sm:$0xff] %v12069_v48  ;;  %v6543_v59 = vrot.slane %v11931_v7, 2  ;;  %v6545_v61 = vrot.slane %v11936_v28, 2 }
 0x3db   : > { %9492 = vmatprep.mubr.msk.bf16.mxu1 %vm4878_vm10, %v11747_v9  ;;  %12883 = vst [vmem:[#allocation22_spill] sm:$0xff] %v12057_v0  ;;  %v6537_v9 = vrot.slane %v11917_v45, 2  ;;  %v12083_v8 = vsel %vm2193_vm5, %v6539_v42, %v6541_v47  ;;  %v12187_v0 = vld [vmem:[#allocation2 + $0x48] sm:$0xff]  }
 0x3dc   : > { %12885 = vst [vmem:[#allocation24_spill] sm:$0xff] %v12064_v12  ;;  %v12077_v14 = vsel %vm1746_vm4, %v6238_v36, %v12064_v12  ;;  %12890 = vst [vmem:[#allocation29_spill] sm:$0xff] %v12083_v8  ;;  %v12089_v31 = vsel %vm2193_vm5, %v6541_v47, %v6543_v59  ;;  %v12095_v36 = vld [vmem:[#allocation2 + $0x98] ss:$0 sps:$4 sm:$0x33]   ;;  %v12098_v17 = vsel %vm2193_vm5, %v6543_v59, %v6545_v61  ;;  %v6557_v47 = vrot.slane %v11988_v62, 2 }
 0x3dd   : > { %v12072_v49 = vsel %vm2193_vm5, %v6535_v43, %v6537_v9  ;;  %12888 = vst [vmem:[#allocation27_spill] sm:$0xff] %v12077_v14  ;;  %v12080_v33 = vsel %vm2193_vm5, %v6537_v9, %v6539_v42  ;;  %12891 = vst [vmem:[#allocation30_spill] sm:$0xff] %v12089_v31  ;;  %v6551_v43 = vrot.slane %v11953_v51, 2  ;;  %v12104_v9 = vsel %vm2193_vm5, %v6545_v61, %v6547_v39 }
 0x3de   : > { %12887 = vst [vmem:[#allocation26_spill] sm:$0xff] %v12072_v49  ;;  %12889 = vst [vmem:[#allocation28_spill] sm:$0xff] %v12080_v33  ;;  %v12107_v42 = vsel %vm2193_vm5, %v6547_v39, %v6549_v19  ;;  %v6561_v8 = vrot.slane %v12002_v54, 2  ;;  %v12182_v33 = vld [vmem:[#allocation2 + $0x40] sm:$0xff]  }
 0x3df   : > { %12892 = vst [vmem:[#allocation31_spill] sm:$0xff] %v12095_v36  ;;  %12893 = vst [vmem:[#allocation32_spill] sm:$0xff] %v12098_v17  ;;  %v12112_v31 = vsel %vm2193_vm5, %v6549_v19, %v6551_v43  ;;  %v12115_v59 = vsel %vm2193_vm5, %v6551_v43, %v6553_v44  ;;  %v6567_v43 = vrot.slane %v12026_v32, 2  ;;  %v7340_v24 = vshrl.u32 %v12182_v33, 16 }
 0x3e0   : > { %12894 = vst [vmem:[#allocation33_spill] sm:$0xff] %v12104_v9  ;;  %12895 = vst [vmem:[#allocation34_spill] sm:$0xff] %v12107_v42  ;;  %v6563_v42 = vrot.slane %v12010_v41, 2  ;;  %v6565_v9 = vrot.slane %v12020_v4, 2 }
 0x3e1   : > { %12896 = vst [vmem:[#allocation35_spill] sm:$0xff] %v12112_v31  ;;  %12897 = vst [vmem:[#allocation36_spill] sm:$0xff] %v12115_v59  ;;  %v12178_v59 = vld [vmem:[#allocation2 + $0x38] sm:$0xff]  }
 0x3e2   : > { %9493 = vmatmul.mubr.msk.bf16.gmra.mrb[12].mxu1 %vm4878_vm10, %v11771_v50  ;;  %v6555_v50 = vrot.slane %v11980_v21, 2  ;;  %v7331_v35 = vshrl.u32 %v12178_v59, 16  ;;  %v7334_v15 = vshll.u32 %v12178_v59, 16 }
 0x3e3   : > { %9496 = vmatprep.mubr.msk.bf16.mxu1 %vm4878_vm10, %v11784_v20  ;;  %v6559_v20 = vrot.slane %v11994_v3, 2 }
 0x3e4   : > { %v12118_v17 = vsel %vm2193_vm5, %v6553_v44, %v6555_v50  ;;  %v12122_v61 = vsel %vm2193_vm5, %v6555_v50, %v6557_v47  ;;  %v6569_v44 = vrot.slane %v12095_v36, 2  ;;  %v12138_v50 = vsel %vm2193_vm5, %v6563_v42, %v6565_v9 }
 0x3e5   : > { %12898 = vst [vmem:[#allocation37_spill] sm:$0xff] %v12118_v17  ;;  %12899 = vst [vmem:[#allocation38_spill] sm:$0xff] %v12122_v61  ;;  %v12125_v39 = vsel %vm2193_vm5, %v6557_v47, %v6559_v20  ;;  %v12130_v19 = vsel %vm2193_vm5, %v6559_v20, %v6561_v8  ;;  %v12135_v17 = vsel %vm2193_vm5, %v6561_v8, %v6563_v42  ;;  %v5330_v20 = vld [vmem:[#allocation2] sm:$0xe]  ;;  %v12150_v61 = vld [vmem:[#allocation2 + $0x14] sm:$0xf] }
 0x3e6   : > { %12900 = vst [vmem:[#allocation39_spill] sm:$0xff] %v12125_v39  ;;  %12901 = vst [vmem:[#allocation40_spill] sm:$0xff] %v12130_v19  ;;  %v12141_v47 = vsel %vm2193_vm5, %v6565_v9, %v6567_v43  ;;  %v12144_v39 = vsel %vm2193_vm5, %v6567_v43, %v6569_v44  ;;  %v6841_v19 = vld [vmem:[#allocation2 + $0x10] sm:$0xc]  ;;  %v10515_v8 = vld [vmem:[#allocation2 + $0x4] sm:$0xf] }
 0x3e7   : > { %12902 = vst [vmem:[#allocation41_spill] sm:$0xff] %v12135_v17  ;;  %12903 = vst [vmem:[#allocation42_spill] sm:$0xff] %v12138_v50  ;;  %v8542_v17 = vcombine.low %v5330_v20, %v10515_v8  ;;  %v12153_v42 = vcombine.low %v6841_v19, %v12150_v61  ;;  %v12155_v9 = vld [vmem:[#allocation2 + $0x18] sm:$0xff]   ;;  %v12159_v43 = vld [vmem:[#allocation2 + $0x28] sm:$0xff]  }
 0x3e8   : > { %12904 = vst [vmem:[#allocation43_spill] sm:$0xff] %v12141_v47  ;;  %12905 = vst [vmem:[#allocation44_spill] sm:$0xff] %v12144_v39  ;;  %v12157_v47 = vld [vmem:[#allocation2 + $0x20] sm:$0xff]   ;;  %v12164_v39 = vld [vmem:[#allocation2 + $0x30] sm:$0xff]   ;;  %v7295_v8 = vshrl.u32 %v12155_v9, 16  ;;  %v7298_v50 = vshll.u32 %v12155_v9, 16 }
 0x3e9   : > { %12906 = vst [vmem:[#allocation45_spill] sm:$0xff] %v12153_v42  ;;  %v12161_v44 = vrot.slane %v8542_v17, 1  ;;  %v7290_v20 = vshll.u32 %v12153_v42, 16  ;;  %v12175_v17 = vld [vmem:[#allocation2 + $0x18] sm:$0xff]   ;;  %v7307_v19 = vshll.u32 %v12157_v47, 16  ;;  %v7313_v12 = vshrl.u32 %v12159_v43, 16 }
 0x3ea   : > { %9497 = vmatmul.mubr.msk.bf16.gmra.mrb[16].mxu1 %vm4878_vm10, %v11815_v52  ;;  %v7297_v49 = vrot.slane %v7295_v8, 2  ;;  %v7300_v48 = vrot.slane %v7298_v50, 3  ;;  %v7316_v36 = vshll.u32 %v12159_v43, 16  ;;  %v7322_v52 = vshrl.u32 %v12164_v39, 16 }
 0x3eb   : > { %9500 = vmatprep.mubr.msk.bf16.mxu1 %vm4878_vm10, %v11826_v38  ;;  %v7287_v38 = vshrl.u32 %v12153_v42, 16  ;;  %v7292_v42 = vrot.slane %v7290_v20, 3  ;;  %v7309_v29 = vrot.slane %v7307_v19, 3  ;;  %v7315_v34 = vrot.slane %v7313_v12, 2 }
 0x3ec   : > { %v7301_v13 = vor.u32 %v7300_v48, %v7297_v49  ;;  %v7325_v58 = vshll.u32 %v12164_v39, 16  ;;  %v7318_v8 = vrot.slane %v7316_v36, 3  ;;  %v7324_v50 = vrot.slane %v7322_v52, 2 }
 0x3ed   : > { %v7289_v31 = vrot.slane %v7287_v38, 2  ;;  %v7333_v49 = vrot.slane %v7331_v35, 2  ;;  %v7349_v52 = vshrl.u32 %v12187_v0, 16  ;;  %v7352_v35 = vshll.u32 %v12187_v0, 16 }
 0x3ee   : > { %v7319_v48 = vor.u32 %v7318_v8, %v7315_v34  ;;  %v12216_v8 = vld [vmem:[#allocation2 + $0x68] sm:$0xff]  }
 0x3ef   : > { %v7293_v38 = vor.u32 %v7292_v42, %v7289_v31  ;;  %v12198_v31 = vld [vmem:[#allocation2 + $0x58] sm:$0xff]   ;;  %v7342_v42 = vrot.slane %v7340_v24, 2  ;;  %v7351_v24 = vrot.slane %v7349_v52, 2  ;;  %v7354_v57 = vrot.slane %v7352_v35, 3 }
 0x3f0   : > { %v7370_v30 = vshll.u32 %v12198_v31, 16  ;;  %v7388_v32 = vshll.u32 %v12216_v8, 16 }
 0x3f1   : > { %v12194_v19 = vsel %vm2946_vm8, %v7293_v38, %v7301_v13  ;;  %v7358_v38 = vshrl.u32 %v12190_v55, 16 }
 0x3f2   : > { %9501 = vmatmul.mubr.msk.bf16.gmra.mrb[20].mxu1 %vm4878_vm10, %v11842_v56  ;;  %v7304_v56 = vshrl.u32 %v12157_v47, 16  ;;  %12907 = vst [vmem:[#allocation46_spill] sm:$0xff] %v12194_v19 }
 0x3f3   : > { %9504 = vmatprep.mubr.msk.bf16.mxu1 %vm4878_vm10, %v11848_v53 }
 0x3f4   : > { %v7306_v14 = vrot.slane %v7304_v56, 2  ;;  %v7327_v56 = vrot.slane %v7325_v58, 3  ;;  %v7336_v58 = vrot.slane %v7334_v15, 3 }
 0x3f6   : > { %v7310_v20 = vor.u32 %v7309_v29, %v7306_v14  ;;  %v7343_v29 = vshll.u32 %v12182_v33, 16  ;;  %v12206_v14 = vld [vmem:[#allocation2 + $0x60] sm:$0xff]   ;;  %v7328_v36 = vor.u32 %v7327_v56, %v7324_v50  ;;  %v7337_v15 = vor.u32 %v7336_v58, %v7333_v49  ;;  %v12222_v56 = vld [vmem:[#allocation2 + $0x70] sm:$0xff]  }
 0x3f7   : > { %v7361_v50 = vshll.u32 %v12190_v55, 16  ;;  %v7355_v58 = vor.u32 %v7354_v57, %v7351_v24  ;;  %v12246_v57 = vld [vmem:[#allocation2 + $0x88] sm:$0xff]  }
 0x3f8   : > { %v12201_v12 = vsel %vm2946_vm8, %v7301_v13, %v7310_v20  ;;  %v12212_v13 = vsel %vm2946_vm8, %v7310_v20, %v7319_v48  ;;  %v7345_v34 = vrot.slane %v7343_v29, 3  ;;  %v7360_v20 = vrot.slane %v7358_v38, 2 }
 0x3f9   : > { %12908 = vst [vmem:[#allocation47_spill] sm:$0xff] %v12201_v12  ;;  %12909 = vst [vmem:[#allocation48_spill] sm:$0xff] %v12212_v13  ;;  %v12219_v12 = vsel %vm2946_vm8, %v7319_v48, %v7328_v36  ;;  %v7367_v29 = vshrl.u32 %v12198_v31, 16  ;;  %v12226_v13 = vsel %vm2946_vm8, %v7328_v36, %v7337_v15  ;;  %v7363_v18 = vrot.slane %v7361_v50, 3 }
 0x3fa   : > { %9505 = vmatmul.mubr.msk.bf16.gmra.mrb[24].mxu1 %vm4878_vm10, %v11855_v11  ;;  %12910 = vst [vmem:[#allocation49_spill] sm:$0xff] %v12219_v12  ;;  %v7346_v19 = vor.u32 %v7345_v34, %v7342_v42  ;;  %12911 = vst [vmem:[#allocation50_spill] sm:$0xff] %v12226_v13  ;;  %v7376_v48 = vshrl.u32 %v12206_v14, 16  ;;  %v12230_v12 = vld [vmem:[#allocation2 + $0x78] sm:$0xff]   ;;  %v7379_v42 = vshll.u32 %v12206_v14, 16  ;;  %v12236_v34 = vld [vmem:[#allocation2 + $0x80] sm:$0xff]  }
 0x3fb   : > { %9508 = vmatprep.mubr.msk.bf16.mxu1 %vm4878_vm10, %v11857_v2  ;;  %v7369_v52 = vrot.slane %v7367_v29, 2  ;;  %v7364_v35 = vor.u32 %v7363_v18, %v7360_v20  ;;  %v7372_v38 = vrot.slane %v7370_v30, 3  ;;  %v7385_v50 = vshrl.u32 %v12216_v8, 16 }
 0x3fc   : > { %v12233_v49 = vsel %vm2946_vm8, %v7337_v15, %v7346_v19  ;;  %v7378_v36 = vrot.slane %v7376_v48, 2  ;;  %v12240_v13 = vsel %vm2946_vm8, %v7346_v19, %v7355_v58  ;;  %v7381_v40 = vrot.slane %v7379_v42, 3  ;;  %v12254_v19 = vld [vmem:[#allocation2 + $0x90] sm:$0xff]  }
 0x3fd   : > { %12912 = vst [vmem:[#allocation51_spill] sm:$0xff] %v12233_v49  ;;  %12913 = vst [vmem:[#allocation52_spill] sm:$0xff] %v12240_v13  ;;  %v7394_v15 = vshrl.u32 %v12222_v56, 16  ;;  %v12249_v24 = vsel %vm2946_vm8, %v7355_v58, %v7364_v35  ;;  %v7373_v30 = vor.u32 %v7372_v38, %v7369_v52  ;;  %v7387_v18 = vrot.slane %v7385_v50, 2  ;;  %v12262_v38 = vld [vmem:[#allocation2 + $0x98] sm:$0xff]  }
 0x3fe   : > { %12914 = vst [vmem:[#allocation53_spill] sm:$0xff] %v12249_v24  ;;  %v7397_v20 = vshll.u32 %v12222_v56, 16  ;;  %v7382_v29 = vor.u32 %v7381_v40, %v7378_v36  ;;  %v7390_v48 = vrot.slane %v7388_v32, 3  ;;  %v7403_v13 = vshrl.u32 %v12230_v12, 16 }
 0x3ff   : > { %v7396_v42 = vrot.slane %v7394_v15, 2  ;;  %v12258_v49 = vsel %vm2946_vm8, %v7364_v35, %v7373_v30  ;;  %v7406_v58 = vshll.u32 %v12230_v12, 16  ;;  %v7412_v52 = vshrl.u32 %v12236_v34, 16 }
 0x400   : > { %12915 = vst [vmem:[#allocation54_spill] sm:$0xff] %v12258_v49  ;;  %v7399_v4 = vrot.slane %v7397_v20, 3  ;;  %v12265_v50 = vsel %vm2946_vm8, %v7373_v30, %v7382_v29  ;;  %v7391_v24 = vor.u32 %v7390_v48, %v7387_v18  ;;  %v7405_v41 = vrot.slane %v7403_v13, 2 }
 0x401   : > { %12916 = vst [vmem:[#allocation55_spill] sm:$0xff] %v12265_v50  ;;  %v7415_v40 = vshll.u32 %v12236_v34, 16  ;;  %v7408_v36 = vrot.slane %v7406_v58, 3  ;;  %v7414_v15 = vrot.slane %v7412_v52, 2  ;;  %v7421_v35 = vshrl.u32 %v12246_v57, 16 }
 0x402   : > { %9509 = vmatmul.mubr.msk.bf16.gmra.mrb[28].mxu1 %vm4878_vm10, %v11867_v10  ;;  %v7400_v32 = vor.u32 %v7399_v4, %v7396_v42  ;;  %v12270_v20 = vsel %vm2946_vm8, %v7382_v29, %v7391_v24  ;;  %v7424_v54 = vshll.u32 %v12246_v57, 16  ;;  %v7430_v3 = vshrl.u32 %v12254_v19, 16  ;;  %v7726_v50 = vld [vmem:[#allocation2 + $0x10] sm:$0x8] }
 0x403   : > { %9512 = vmatprep.mubr.msk.bf16.mxu1 %vm4878_vm10, %v11879_v26  ;;  %v7417_v49 = vrot.slane %v7415_v40, 3  ;;  %v7409_v18 = vor.u32 %v7408_v36, %v7405_v41  ;;  %v7423_v13 = vrot.slane %v7421_v35, 2  ;;  %v7433_v48 = vshll.u32 %v12254_v19, 16 }
 0x404   : > { %v12275_v30 = vsel %vm2946_vm8, %v7391_v24, %v7400_v32  ;;  %v7426_v42 = vrot.slane %v7424_v54, 3  ;;  %v7432_v58 = vrot.slane %v7430_v3, 2  ;;  %v7439_v52 = vshrl.u32 %v12262_v38, 16 }
 0x405   : > { %12917 = vst [vmem:[#allocation56_spill] sm:$0xff] %v12275_v30  ;;  %v7418_v4 = vor.u32 %v7417_v49, %v7414_v15  ;;  %v12918_v29 = vrot.slane %v11959_v23, 1  ;;  %v12286_v24 = vsel %vm2946_vm8, %v7400_v32, %v7409_v18  ;;  %v7435_v41 = vrot.slane %v7433_v48, 3 }
 0x406   : > { %12919 = vst [vmem:[#allocation57_spill] sm:$0xff] %v12286_v24  ;;  %v7442_v36 = vshll.u32 %v12262_v38, 16  ;;  %v5867_v3 = vsel %vm4933_vm0, %v11951_v1, 0  ;;  %v7427_v49 = vor.u32 %v7426_v42, %v7423_v13  ;;  %v7441_v15 = vrot.slane %v7439_v52, 2 }
 0x407   : > { %v5338_v40 = vsel %vm993_vm3, %v12161_v44, %v12918_v29  ;;  %v12293_v54 = vsel %vm2946_vm8, %v7409_v18, %v7418_v4  ;;  %v12920_v35 = vrot.slane %v11967_v63, 1  ;;  %v12921_v44 = vmov %v12918_v29 }
 0x408   : > { %v7436_v29 = vor.u32 %v7435_v41, %v7432_v58  ;;  %v7444_v48 = vrot.slane %v7442_v36, 3  ;;  %v8698_v24 = vcombine.low %v7726_v50, %v12150_v61  ;;  %v12307_v18 = vsel %vm2946_vm8, %v7418_v4, %v7427_v49  ;;  %v10517_v50 = vld [vmem:[#allocation2 + $0x20] sm:$0xff]  }
 0x409   : > { %v5340_v32 = vsel %vm993_vm3, %v12921_v44, %v12920_v35  ;;  %v12923_v30 = vmov %v12920_v35  ;;  %v7733_v13 = vrot.slane %v12155_v9, 3  ;;  %v7735_v42 = vrot.slane %v12157_v47, 3  ;;  %v10518_v35 = vld [vmem:[#allocation2 + $0x28] sm:$0xff]  }
 0x40a   : > { %9513 = vmatmul.mubr.msk.bf16.gmra.mrb[32].mxu1 %vm4878_vm10, %v11895_v27  ;;  %v12312_v23 = vsel %vm2946_vm8, %v7427_v49, %v7436_v29  ;;  %v12314_v58 = vor.u32 %v7444_v48, %v7441_v15  ;;  %v7732_v52 = vrot.slane %v8698_v24, 3  ;;  %v7737_v61 = vrot.slane %v12159_v43, 3  ;;  %v12336_v48 = vld [vmem:[%s12845_s3 + $0x8] sm:$0x3] }
 0x40b   : > { %9518 = vmatprep.mubr.msk.bf16.mxu1 %vm4878_vm10, %v5338_v40  ;;  %v12922_v40 = vrot.slane %v12175_v17, 1  ;;  %v5343_v41 = vrot.slane %v10517_v50, 1  ;;  %v12318_v63 = vsel %vm3393_vm9, %v7733_v13, %v7735_v42  ;;  %v7741_v4 = vrot.slane %v12178_v59, 3 }
 0x40c   : > { %v12324_v36 = vsel %vm2946_vm8, %v7436_v29, %v12314_v58  ;;  %v12327_v49 = vsel %vm3393_vm9, %v7732_v52, %v7733_v13  ;;  %v12330_v24 = vsel %vm3393_vm9, %v7735_v42, %v7737_v61  ;;  %v7743_v15 = vrot.slane %v12182_v33, 3  ;;  %v12346_v42 = vld [vmem:[#allocation2 + $0xa0] ss:$0 sps:$4 sm:$0x77]  }
 0x40d   : > { %v5342_v1 = vsel %vm993_vm3, %v12923_v30, %v12922_v40  ;;  %v7739_v30 = vrot.slane %v12164_v39, 3  ;;  %12924 = vst [vmem:[#allocation58_spill] sm:$0xff] %v12330_v24  ;;  %v5345_v44 = vrot.slane %v10518_v35, 1  ;;  %v7745_v13 = vrot.slane %v12187_v0, 3 }
 0x40e   : > { %v12349_v52 = vsel %vm3393_vm9, %v7741_v4, %v7743_v15  ;;  %v7747_v50 = vrot.slane %v12190_v55, 3  ;;  %v7749_v35 = vrot.slane %v12198_v31, 3  ;;  %v7751_v24 = vrot.slane %v12206_v14, 3 }
 0x40f   : > { %v12339_v40 = vsel %vm3393_vm9, %v7737_v61, %v7739_v30  ;;  %v12342_v29 = vsel %vm3393_vm9, %v7739_v30, %v7741_v4  ;;  %12927 = vst [vmem:[#allocation61_spill] sm:$0xff] %v12349_v52  ;;  %v12356_v61 = vsel %vm3393_vm9, %v7743_v15, %v7745_v13  ;;  %v7753_v30 = vrot.slane %v12216_v8, 3 }
 0x410   : > { %12925 = vst [vmem:[#allocation59_spill] sm:$0xff] %v12339_v40  ;;  %12926 = vst [vmem:[#allocation60_spill] sm:$0xff] %v12342_v29  ;;  %v7757_v29 = vrot.slane %v12230_v12, 3  ;;  %v12364_v4 = vsel %vm3393_vm9, %v7745_v13, %v7747_v50  ;;  %v12367_v52 = vsel %vm3393_vm9, %v7747_v50, %v7749_v35  ;;  %v7761_v13 = vrot.slane %v12246_v57, 3 }
 0x411   : > { %12928 = vst [vmem:[#allocation62_spill] sm:$0xff] %v12356_v61  ;;  %12929 = vst [vmem:[#allocation63_spill] sm:$0xff] %v12364_v4  ;;  %v12374_v15 = vsel %vm3393_vm9, %v7751_v24, %v7753_v30  ;;  %v7763_v50 = vrot.slane %v12254_v19, 3 }
 0x412   : > { %9519 = vmatmul.mubr.msk.bf16.vlgmr.msra.gmra.mrb[0].mxu1 %vm4878_vm10, %v5340_v32  ;;  %v7755_v32 = vrot.slane %v12222_v56, 3 }
 0x413   : > { %9555 = vmatpush3.bf16.msra.mxu1 %v5867_v3  ;;  %9522 = vmatprep.mubr.msk.bf16.mxu1 %vm4878_vm10, %v5342_v1  ;;  %v12370_v3 = vsel %vm3393_vm9, %v7749_v35, %v7751_v24  ;;  %v7759_v1 = vrot.slane %v12236_v34, 3  ;;  %v7765_v35 = vrot.slane %v12262_v38, 3 }
 0x414   : > { %10371 = vmatprep.subr.msk.bf16.mxu1 %vm4933_vm0, %v12336_v48  ;;  %12930 = vst [vmem:[#allocation64_spill] sm:$0xff] %v12370_v3  ;;  %v12377_v61 = vsel %vm3393_vm9, %v7753_v30, %v7755_v32  ;;  %v12380_v40 = vsel %vm3393_vm9, %v7755_v32, %v7757_v29  ;;  %v7767_v3 = vrot.slane %v12346_v42, 3  ;;  %v12393_v30 = vsel %vm3393_vm9, %v7761_v13, %v7763_v50 }
 0x415   : > { %12931 = vst [vmem:[#allocation65_spill] sm:$0xff] %v12377_v61  ;;  %12932 = vst [vmem:[#allocation66_spill] sm:$0xff] %v12380_v40  ;;  %v12384_v4 = vsel %vm3393_vm9, %v7757_v29, %v7759_v1  ;;  %v12390_v24 = vsel %vm3393_vm9, %v7759_v1, %v7761_v13  ;;  %v12396_v32 = vsel %vm3393_vm9, %v7763_v50, %v7765_v35  ;;  %v12936_v29 = vrot.slane %v12175_v17, 1  ;;  %v10519_v1 = vld [vmem:[#allocation2 + $0x30] sm:$0xff]   ;;  %v10520_v13 = vld [vmem:[#allocation2 + $0x38] sm:$0xff]  }
 0x416   : > { %12933 = vst [vmem:[#allocation67_spill] sm:$0xff] %v12384_v4  ;;  %12934 = vst [vmem:[#allocation68_spill] sm:$0xff] %v12390_v24  ;;  %v12399_v40 = vsel %vm3393_vm9, %v7765_v35, %v7767_v3  ;;  %v5346_v61 = vsel %vm993_vm3, %v5343_v41, %v5345_v44  ;;  %v5347_v24 = vrot.slane %v10519_v1, 1  ;;  %v10521_v17 = vld [vmem:[#allocation2 + $0x40] sm:$0xff]   ;;  %v10523_v1 = vld [vmem:[#allocation2 + $0x50] sm:$0xff]  }
 0x417   : > { %12935 = vst [vmem:[#allocation69_spill] sm:$0xff] %v12393_v30  ;;  %v5344_v4 = vsel %vm993_vm3, %v12936_v29, %v5343_v41  ;;  %v5349_v30 = vrot.slane %v10520_v13, 1  ;;  %v5351_v35 = vrot.slane %v10521_v17, 1  ;;  %v10522_v29 = vld [vmem:[#allocation2 + $0x48] sm:$0xff]   ;;  %v10524_v13 = vld [vmem:[#allocation2 + $0x58] sm:$0xff]   ;;  %v5361_v17 = vrot.slane %v11855_v11, 1 }
 0x418   : > { %v5348_v50 = vsel %vm993_vm3, %v5345_v44, %v5347_v24  ;;  %v5355_v44 = vrot.slane %v10523_v1, 1  ;;  %v5367_v11 = vrot.slane %v11879_v26, 1  ;;  %v5369_v1 = vrot.slane %v11895_v27, 1 }
 0x419   : > { %v5350_v3 = vsel %vm993_vm3, %v5347_v24, %v5349_v30  ;;  %v5352_v41 = vsel %vm993_vm3, %v5349_v30, %v5351_v35  ;;  %v5359_v30 = vrot.slane %v11848_v53, 1  ;;  %v5778_v27 = vrot.slane %v11917_v45, 1 }
 0x41a   : > { %9523 = vmatmul.mubr.msk.bf16.gmra.mrb[4].mxu1 %vm4878_vm10, %v5344_v4  ;;  %v5353_v4 = vrot.slane %v10522_v29, 1  ;;  %v5782_v45 = vrot.slane %v11922_v22, 1 }
 0x41b   : > { %9526 = vmatprep.mubr.msk.bf16.mxu1 %vm4878_vm10, %v5346_v61  ;;  %v5362_v29 = vsel %vm993_vm3, %v5359_v30, %v5361_v17 }
 0x41c   : > { %v5354_v61 = vsel %vm993_vm3, %v5351_v35, %v5353_v4  ;;  %v5356_v24 = vsel %vm993_vm3, %v5353_v4, %v5355_v44  ;;  %v5363_v4 = vrot.slane %v11857_v2, 1  ;;  %v5370_v2 = vsel %vm993_vm3, %v5367_v11, %v5369_v1 }
 0x422   : > { %9527 = vmatmul.mubr.msk.bf16.gmra.mrb[8].mxu1 %vm4878_vm10, %v5348_v50  ;;  %v5357_v50 = vrot.slane %v10524_v13, 1  ;;  %v5775_v13 = vrot.slane %v11912_v5, 1  ;;  %v8619_v5 = vld [vmem:[%s12845_s3 + $0xa] sm:$0x3] }
 0x423   : > { %9530 = vmatprep.mubr.msk.bf16.mxu1 %vm4878_vm10, %v5350_v3 }
 0x424   : > { %v5358_v3 = vsel %vm993_vm3, %v5355_v44, %v5357_v50  ;;  %v5360_v35 = vsel %vm993_vm3, %v5357_v50, %v5359_v30  ;;  %v5776_v50 = vrot.slane %v11914_v16, 1  ;;  %v6313_v30 = vsel %vm4933_vm0, %v12336_v48, 0 }
 0x426   : > { %v5777_v26 = vsel %vm993_vm3, %v5775_v13, %v5776_v50  ;;  %v12939_v13 = vld [vmem:[#allocation12_spill] sm:$0xff] }
 0x42a   : > { %9531 = vmatmul.mubr.msk.bf16.gmra.mrb[12].mxu1 %vm4878_vm10, %v5352_v41  ;;  %v5365_v41 = vrot.slane %v11867_v10, 1  ;;  %v5371_v10 = vrot.slane %v11900_v60, 1  ;;  %v5779_v60 = vsel %vm993_vm3, %v5776_v50, %v5778_v27  ;;  %v5804_v50 = vrot.slane %v12939_v13, 1 }
 0x42b   : > { %9534 = vmatprep.mubr.msk.bf16.mxu1 %vm4878_vm10, %v5354_v61  ;;  %v5364_v61 = vsel %vm993_vm3, %v5361_v17, %v5363_v4 }
 0x42c   : > { %v5366_v53 = vsel %vm993_vm3, %v5363_v4, %v5365_v41  ;;  %v5368_v44 = vsel %vm993_vm3, %v5365_v41, %v5367_v11  ;;  %v5792_v41 = vrot.slane %v11953_v51, 1  ;;  %v5798_v51 = vrot.slane %v11988_v62, 1 }
 0x432   : > { %9535 = vmatmul.mubr.msk.bf16.gmra.mrb[16].mxu1 %vm4878_vm10, %v5356_v24  ;;  %v5372_v24 = vsel %vm993_vm3, %v5369_v1, %v5371_v10  ;;  %v12937_v1 = vld [vmem:[#allocation8_spill] sm:$0xff] }
 0x433   : > { %9538 = vmatprep.mubr.msk.bf16.mxu1 %vm4878_vm10, %v5358_v3  ;;  %v5780_v3 = vrot.slane %v11919_v6, 1  ;;  %v5784_v6 = vrot.slane %v11931_v7, 1  ;;  %v5790_v7 = vrot.slane %v11945_v46, 1 }
 0x435   : > { %v5781_v16 = vsel %vm993_vm3, %v5778_v27, %v5780_v3  ;;  %v5783_v48 = vsel %vm993_vm3, %v5780_v3, %v5782_v45  ;;  %v5785_v17 = vsel %vm993_vm3, %v5782_v45, %v5784_v6  ;;  %v12941_v3 = vld [vmem:[#allocation16_spill] sm:$0xff] }
 0x43a   : > { %9539 = vmatmul.mubr.msk.bf16.gmra.mrb[20].mxu1 %vm4878_vm10, %v5360_v35  ;;  %v5786_v35 = vrot.slane %v11936_v28, 1  ;;  %v5793_v28 = vsel %vm993_vm3, %v5790_v7, %v5792_v41 }
 0x43b   : > { %9542 = vmatprep.mubr.msk.bf16.mxu1 %vm4878_vm10, %v5362_v29  ;;  %v5788_v29 = vrot.slane %v11942_v37, 1  ;;  %v5794_v37 = vrot.slane %v11971_v25, 1 }
 0x43c   : > { %v5787_v4 = vsel %vm993_vm3, %v5784_v6, %v5786_v35 }
 0x43d   : > { %v5789_v22 = vsel %vm993_vm3, %v5786_v35, %v5788_v29  ;;  %v5795_v11 = vsel %vm993_vm3, %v5792_v41, %v5794_v37  ;;  %v6626_v35 = vsel %vm4933_vm0, %v8619_v5, 0  ;;  %v12946_v41 = vld [vmem:[#allocation7_spill] sm:$0xff] }
 0x442   : > { %9543 = vmatmul.mubr.msk.bf16.gmra.mrb[24].mxu1 %vm4878_vm10, %v5364_v61  ;;  %v5791_v61 = vsel %vm993_vm3, %v5788_v29, %v5790_v7  ;;  %v8639_v29 = vld [vmem:[%s12845_s3 + $0xc] sm:$0x3]  ;;  %v12945_v7 = vld [vmem:[#allocation6_spill] sm:$0xff] }
 0x443   : > { %9546 = vmatprep.mubr.msk.bf16.mxu1 %vm4878_vm10, %v5366_v53  ;;  %v5796_v53 = vrot.slane %v11980_v21, 1  ;;  %v12938_v21 = vld [vmem:[#allocation10_spill] sm:$0xff] }
 0x444   : > { %v5802_v10 = vrot.slane %v12938_v21, 1 }
 0x445   : > { %v5797_v46 = vsel %vm993_vm3, %v5794_v37, %v5796_v53  ;;  %v12950_v37 = vld [vmem:[#allocation15_spill] sm:$0xff] }
 0x446   : > { %v5805_v62 = vsel %vm993_vm3, %v5802_v10, %v5804_v50 }
 0x44a   : > { %9547 = vmatmul.mubr.msk.bf16.gmra.mrb[28].mxu1 %vm4878_vm10, %v5368_v44  ;;  %v5800_v44 = vrot.slane %v12937_v1, 1  ;;  %v12955_v1 = vld [vmem:[#allocation21_spill] sm:$0xff] }
 0x44b   : > { %9550 = vmatprep.mubr.msk.bf16.mxu1 %vm4878_vm10, %v5370_v2  ;;  %v5799_v2 = vsel %vm993_vm3, %v5796_v53, %v5798_v51  ;;  %v12951_v53 = vld [vmem:[#allocation17_spill] sm:$0xff] }
 0x44c   : > { %v5801_v25 = vsel %vm993_vm3, %v5798_v51, %v5800_v44  ;;  %v12954_v51 = vld [vmem:[#allocation20_spill] sm:$0xff] }
 0x452   : > { %9551 = vmatmul.mubr.msk.bf16.gmra.mrb[32].mxu1 %vm4878_vm10, %v5372_v24  ;;  %v5803_v24 = vsel %vm993_vm3, %v5800_v44, %v5802_v10  ;;  %v12956_v44 = vld [vmem:[#allocation22_spill] sm:$0xff] }
 0x453   : > { %9556 = vmatprep.mubr.msk.bf16.mxu1 %vm4878_vm10, %v5777_v26  ;;  %v12940_v26 = vld [vmem:[#allocation14_spill] sm:$0xff] }
 0x454   : > { %v5806_v27 = vrot.slane %v12940_v26, 1  ;;  %v12960_v26 = vld [vmem:[#allocation24_spill] sm:$0xff] }
 0x45a   : > { %9557 = vmatmul.mubr.msk.bf16.vlgmr.msra.gmra.mrb[0].mxu1 %vm4878_vm10, %v5779_v60  ;;  %v5807_v60 = vsel %vm993_vm3, %v5804_v50, %v5806_v27  ;;  %v12958_v50 = vld [vmem:[#allocation23_spill] sm:$0xff] }
 0x45b   : > { %9593 = vmatpush3.bf16.msra.mxu1 %v6313_v30  ;;  %9560 = vmatprep.mubr.msk.bf16.mxu1 %vm4878_vm10, %v5781_v16  ;;  %v5808_v30 = vrot.slane %v12941_v3, 1  ;;  %v10488_v16 = vld [vmem:[#allocation2 + $0x98] ss:$0 sps:$4 sm:$0x11]  }
 0x45c   : > { %10372 = vmatprep.subr.msk.bf16.mxu1 %vm4933_vm0, %v8619_v5  ;;  %v5810_v6 = vrot.slane %v10488_v16, 1  ;;  %v12947_v5 = vld [vmem:[#allocation9_spill] sm:$0xff]  ;;  %v12962_v16 = vld [vmem:[#allocation26_spill] sm:$0xff] }
 0x45d   : > { %v5809_v45 = vsel %vm993_vm3, %v5806_v27, %v5808_v30  ;;  %v12961_v3 = vld [vmem:[#allocation25_spill] sm:$0xff] }
 0x462   : > { %9561 = vmatmul.mubr.msk.bf16.gmra.mrb[4].mxu1 %vm4878_vm10, %v5783_v48  ;;  %v5811_v48 = vsel %vm993_vm3, %v5808_v30, %v5810_v6  ;;  %v7065_v30 = vsel %vm4933_vm0, %v8639_v29, 0  ;;  %v12964_v6 = vld [vmem:[#allocation29_spill] sm:$0xff] }
 0x463   : > { %9564 = vmatprep.mubr.msk.bf16.mxu1 %vm4878_vm10, %v5785_v17  ;;  %v12942_v17 = vld [vmem:[#allocation3_spill] sm:$0xff] }
 0x46a   : > { %9565 = vmatmul.mubr.msk.bf16.gmra.mrb[8].mxu1 %vm4878_vm10, %v5787_v4  ;;  %v12943_v4 = vld [vmem:[#allocation4_spill] sm:$0xff] }
 0x46b   : > { %9568 = vmatprep.mubr.msk.bf16.mxu1 %vm4878_vm10, %v5789_v22  ;;  %v12944_v22 = vld [vmem:[#allocation5_spill] sm:$0xff] }
 0x472   : > { %9569 = vmatmul.mubr.msk.bf16.gmra.mrb[12].mxu1 %vm4878_vm10, %v5791_v61  ;;  %v12948_v61 = vld [vmem:[#allocation11_spill] sm:$0xff] }
 0x473   : > { %9572 = vmatprep.mubr.msk.bf16.mxu1 %vm4878_vm10, %v5793_v28  ;;  %v12949_v28 = vld [vmem:[#allocation13_spill] sm:$0xff] }
 0x47a   : > { %9573 = vmatmul.mubr.msk.bf16.gmra.mrb[16].mxu1 %vm4878_vm10, %v5795_v11  ;;  %v12952_v11 = vld [vmem:[#allocation18_spill] sm:$0xff] }
 0x47b   : > { %9576 = vmatprep.mubr.msk.bf16.mxu1 %vm4878_vm10, %v5797_v46  ;;  %v12953_v46 = vld [vmem:[#allocation19_spill] sm:$0xff] }
 0x482   : > { %9577 = vmatmul.mubr.msk.bf16.gmra.mrb[20].mxu1 %vm4878_vm10, %v5799_v2  ;;  %v12957_v2 = vld [vmem:[#allocation31_spill] sm:$0xff] }
 0x483   : > { %9580 = vmatprep.mubr.msk.bf16.mxu1 %vm4878_vm10, %v5801_v25  ;;  %v6250_v25 = vshrl.u32 %v12957_v2, 16  ;;  %v6253_v21 = vshll.u32 %v12957_v2, 16  ;;  %v6976_v2 = vrot.slane %v12157_v47, 2  ;;  %v6980_v47 = vrot.slane %v12164_v39, 2 }
 0x485   : > { %v6252_v10 = vrot.slane %v6250_v25, 1  ;;  %v6255_v13 = vrot.slane %v6253_v21, 2  ;;  %v6978_v25 = vrot.slane %v12159_v43, 2  ;;  %v6982_v43 = vrot.slane %v12178_v59, 2 }
 0x486   : > { %v6988_v59 = vrot.slane %v12190_v55, 2 }
 0x48a   : > { %9581 = vmatmul.mubr.msk.bf16.gmra.mrb[24].mxu1 %vm4878_vm10, %v5803_v24  ;;  %v12959_v24 = vld [vmem:[#allocation27_spill] sm:$0xff] }
 0x48b   : > { %9584 = vmatprep.mubr.msk.bf16.mxu1 %vm4878_vm10, %v5805_v62  ;;  %v6256_v62 = vor.u32 %v6255_v13, %v6252_v10  ;;  %v6979_v13 = vsel %vm2193_vm5, %v6976_v2, %v6978_v25 }
 0x48d   : > { %v6257_v27 = vsel %vm1746_vm4, %v12960_v26, %v6256_v62  ;;  %v6984_v62 = vrot.slane %v12182_v33, 2  ;;  %v6986_v26 = vrot.slane %v12187_v0, 2  ;;  %v6992_v0 = vrot.slane %v12206_v14, 2 }
 0x48f   : > { %v6987_v39 = vsel %vm2193_vm5, %v6984_v62, %v6986_v26 }
 0x492   : > { %9585 = vmatmul.mubr.msk.bf16.gmra.mrb[28].mxu1 %vm4878_vm10, %v5807_v60  ;;  %v8677_v60 = vld [vmem:[%s12845_s3 + $0xe] sm:$0x3] }
 0x493   : > { %9588 = vmatprep.mubr.msk.bf16.mxu1 %vm4878_vm10, %v5809_v45  ;;  %v12963_v45 = vld [vmem:[#allocation28_spill] sm:$0xff]  ;;  %v7511_v21 = vsel %vm4933_vm0, %v8677_v60, 0 }
 0x49a   : > { %9589 = vmatmul.mubr.msk.bf16.gmra.mrb[32].mxu1 %vm4878_vm10, %v5811_v48  ;;  %v12965_v48 = vld [vmem:[#allocation30_spill] sm:$0xff] }
 0x49b   : > { %9594 = vmatprep.mubr.msk.bf16.mxu1 %vm4878_vm10, %v12942_v17  ;;  %v12966_v17 = vld [vmem:[#allocation32_spill] sm:$0xff] }
 0x4a2   : > { %9595 = vmatmul.mubr.msk.bf16.vlgmr.msra.gmra.mrb[0].mxu1 %vm4878_vm10, %v12943_v4  ;;  %v12969_v4 = vld [vmem:[#allocation35_spill] sm:$0xff] }
 0x4a3   : > { %9631 = vmatpush3.bf16.msra.mxu1 %v6626_v35  ;;  %9598 = vmatprep.mubr.msk.bf16.mxu1 %vm4878_vm10, %v12944_v22  ;;  %v12967_v35 = vld [vmem:[#allocation33_spill] sm:$0xff]  ;;  %v12970_v22 = vld [vmem:[#allocation36_spill] sm:$0xff] }
 0x4a4   : > { %10373 = vmatprep.subr.msk.bf16.mxu1 %vm4933_vm0, %v8639_v29  ;;  %v12968_v29 = vld [vmem:[#allocation34_spill] sm:$0xff] }
 0x4aa   : > { %9599 = vmatmul.mubr.msk.bf16.gmra.mrb[4].mxu1 %vm4878_vm10, %v12945_v7  ;;  %v12971_v7 = vld [vmem:[#allocation37_spill] sm:$0xff] }
 0x4ab   : > { %9602 = vmatprep.mubr.msk.bf16.mxu1 %vm4878_vm10, %v12946_v41  ;;  %v12972_v41 = vld [vmem:[#allocation38_spill] sm:$0xff] }
 0x4b2   : > { %9603 = vmatmul.mubr.msk.bf16.gmra.mrb[8].mxu1 %vm4878_vm10, %v12947_v5  ;;  %v12973_v5 = vld [vmem:[#allocation39_spill] sm:$0xff] }
 0x4b3   : > { %9606 = vmatprep.mubr.msk.bf16.mxu1 %vm4878_vm10, %v12948_v61  ;;  %v12974_v61 = vld [vmem:[#allocation40_spill] sm:$0xff] }
 0x4ba   : > { %9607 = vmatmul.mubr.msk.bf16.gmra.mrb[12].mxu1 %vm4878_vm10, %v12949_v28  ;;  %v12975_v28 = vld [vmem:[#allocation41_spill] sm:$0xff] }
 0x4bb   : > { %9610 = vmatprep.mubr.msk.bf16.mxu1 %vm4878_vm10, %v12950_v37  ;;  %v12976_v37 = vld [vmem:[#allocation42_spill] sm:$0xff] }
 0x4c2   : > { %9611 = vmatmul.mubr.msk.bf16.gmra.mrb[16].mxu1 %vm4878_vm10, %v12951_v53  ;;  %v12977_v53 = vld [vmem:[#allocation43_spill] sm:$0xff] }
 0x4c3   : > { %9614 = vmatprep.mubr.msk.bf16.mxu1 %vm4878_vm10, %v12952_v11  ;;  %v6974_v11 = vrot.slane %v12155_v9, 2  ;;  %v8697_v9 = vld [vmem:[%s12845_s3 + $0x10] sm:$0x3] }
 0x4c5   : > { %v6977_v10 = vsel %vm2193_vm5, %v6974_v11, %v6976_v2  ;;  %v7451_v2 = vshll.u32 %v12346_v42, 16 }
 0x4ca   : > { %9615 = vmatmul.mubr.msk.bf16.gmra.mrb[20].mxu1 %vm4878_vm10, %v12953_v46  ;;  %v12978_v46 = vld [vmem:[#allocation45_spill] sm:$0xff] }
 0x4cb   : > { %9618 = vmatprep.mubr.msk.bf16.mxu1 %vm4878_vm10, %v12954_v51  ;;  %v6973_v51 = vrot.slane %v12978_v46, 2  ;;  %v12989_v46 = vld [vmem:[#allocation55_spill] sm:$0xff] }
 0x4d2   : > { %9619 = vmatmul.mubr.msk.bf16.gmra.mrb[24].mxu1 %vm4878_vm10, %v12955_v1  ;;  %v12979_v1 = vld [vmem:[#allocation44_spill] sm:$0xff] }
 0x4d3   : > { %9622 = vmatprep.mubr.msk.bf16.mxu1 %vm4878_vm10, %v12956_v44  ;;  %v6975_v44 = vsel %vm2193_vm5, %v6973_v51, %v6974_v11  ;;  %v12988_v11 = vld [vmem:[#allocation54_spill] sm:$0xff]  ;;  %v12990_v51 = vld [vmem:[#allocation56_spill] sm:$0xff] }
 0x4da   : > { %9623 = vmatmul.mubr.msk.bf16.gmra.mrb[28].mxu1 %vm4878_vm10, %v12958_v50  ;;  %v6981_v50 = vsel %vm2193_vm5, %v6978_v25, %v6980_v47 }
 0x4db   : > { %9626 = vmatprep.mubr.msk.bf16.mxu1 %vm4878_vm10, %v12959_v24  ;;  %v6983_v24 = vsel %vm2193_vm5, %v6980_v47, %v6982_v43  ;;  %v13002_v47 = vld [vmem:[#allocation68_spill] sm:$0xff] }
 0x4e2   : > { %9627 = vmatmul.mubr.msk.bf16.gmra.mrb[32].mxu1 %vm4878_vm10, %v6257_v27  ;;  %v6985_v27 = vsel %vm2193_vm5, %v6982_v43, %v6984_v62  ;;  %v13003_v43 = vld [vmem:[#allocation69_spill] sm:$0xff] }
 0x4e3   : > { %9632 = vmatprep.mubr.msk.bf16.mxu1 %vm4878_vm10, %v12961_v3  ;;  %v6990_v3 = vrot.slane %v12198_v31, 2  ;;  %v6996_v31 = vrot.slane %v12222_v56, 2 }
 0x4e5   : > { %v6991_v33 = vsel %vm2193_vm5, %v6988_v59, %v6990_v3 }
 0x4ea   : > { %9633 = vmatmul.mubr.msk.bf16.vlgmr.msra.gmra.mrb[0].mxu1 %vm4878_vm10, %v12962_v16  ;;  %v6993_v16 = vsel %vm2193_vm5, %v6990_v3, %v6992_v0 }
 0x4eb   : > { %9669 = vmatpush3.bf16.msra.mxu1 %v7065_v30  ;;  %9636 = vmatprep.mubr.msk.bf16.mxu1 %vm4878_vm10, %v12963_v45  ;;  %v6989_v30 = vsel %vm2193_vm5, %v6986_v26, %v6988_v59  ;;  %v6998_v45 = vrot.slane %v12230_v12, 2  ;;  %v7004_v12 = vrot.slane %v12254_v19, 2  ;;  %v7824_v19 = vsel %vm4933_vm0, %v8697_v9, 0 }
 0x4ec   : > { %10374 = vmatprep.subr.msk.bf16.mxu1 %vm4933_vm0, %v8677_v60  ;;  %v6994_v60 = vrot.slane %v12216_v8, 2  ;;  %v7000_v8 = vrot.slane %v12236_v34, 2 }
 0x4ed   : > { %v6999_v14 = vsel %vm2193_vm5, %v6996_v31, %v6998_v45 }
 0x4ee   : > { %v6995_v55 = vsel %vm2193_vm5, %v6992_v0, %v6994_v60 }
 0x4f2   : > { %9637 = vmatmul.mubr.msk.bf16.gmra.mrb[4].mxu1 %vm4878_vm10, %v12964_v6  ;;  %v6997_v6 = vsel %vm2193_vm5, %v6994_v60, %v6996_v31 }
 0x4f3   : > { %9640 = vmatprep.mubr.msk.bf16.mxu1 %vm4878_vm10, %v12965_v48  ;;  %v7002_v48 = vrot.slane %v12246_v57, 2 }
 0x4f5   : > { %v7003_v56 = vsel %vm2193_vm5, %v7000_v8, %v7002_v48 }
 0x4fa   : > { %9641 = vmatmul.mubr.msk.bf16.gmra.mrb[8].mxu1 %vm4878_vm10, %v12966_v17  ;;  %v7001_v17 = vsel %vm2193_vm5, %v6998_v45, %v7000_v8 }
 0x4fb   : > { %9644 = vmatprep.mubr.msk.bf16.mxu1 %vm4878_vm10, %v12967_v35  ;;  %v7006_v35 = vrot.slane %v12262_v38, 2  ;;  %v12981_v38 = vld [vmem:[#allocation47_spill] sm:$0xff] }
 0x4fd   : > { %v7007_v34 = vsel %vm2193_vm5, %v7004_v12, %v7006_v35 }
 0x502   : > { %9645 = vmatmul.mubr.msk.bf16.gmra.mrb[12].mxu1 %vm4878_vm10, %v12968_v29  ;;  %v7005_v29 = vsel %vm2193_vm5, %v7002_v48, %v7004_v12 }
 0x503   : > { %9648 = vmatprep.mubr.msk.bf16.mxu1 %vm4878_vm10, %v12969_v4  ;;  %v10509_v4 = vld [vmem:[#allocation2 + $0xa0] ss:$0 sps:$4 sm:$0x33]  }
 0x504   : > { %v7008_v57 = vrot.slane %v10509_v4, 2 }
 0x50a   : > { %9649 = vmatmul.mubr.msk.bf16.gmra.mrb[16].mxu1 %vm4878_vm10, %v12970_v22  ;;  %v7009_v22 = vsel %vm2193_vm5, %v7006_v35, %v7008_v57 }
 0x50b   : > { %9652 = vmatprep.mubr.msk.bf16.mxu1 %vm4878_vm10, %v12971_v7  ;;  %v12980_v7 = vld [vmem:[#allocation46_spill] sm:$0xff] }
 0x512   : > { %9653 = vmatmul.mubr.msk.bf16.gmra.mrb[20].mxu1 %vm4878_vm10, %v12972_v41  ;;  %v12982_v41 = vld [vmem:[#allocation48_spill] sm:$0xff] }
 0x513   : > { %9656 = vmatprep.mubr.msk.bf16.mxu1 %vm4878_vm10, %v12973_v5  ;;  %v12983_v5 = vld [vmem:[#allocation49_spill] sm:$0xff] }
 0x51a   : > { %9657 = vmatmul.mubr.msk.bf16.gmra.mrb[24].mxu1 %vm4878_vm10, %v12974_v61  ;;  %v12984_v61 = vld [vmem:[#allocation50_spill] sm:$0xff] }
 0x51b   : > { %9660 = vmatprep.mubr.msk.bf16.mxu1 %vm4878_vm10, %v12975_v28  ;;  %v12985_v28 = vld [vmem:[#allocation51_spill] sm:$0xff] }
 0x522   : > { %9661 = vmatmul.mubr.msk.bf16.gmra.mrb[28].mxu1 %vm4878_vm10, %v12976_v37  ;;  %v12986_v37 = vld [vmem:[#allocation52_spill] sm:$0xff] }
 0x523   : > { %9664 = vmatprep.mubr.msk.bf16.mxu1 %vm4878_vm10, %v12977_v53  ;;  %v12987_v53 = vld [vmem:[#allocation53_spill] sm:$0xff] }
 0x52a   : > { %9665 = vmatmul.mubr.msk.bf16.gmra.mrb[32].mxu1 %vm4878_vm10, %v12979_v1  ;;  %v12991_v1 = vld [vmem:[#allocation57_spill] sm:$0xff] }
 0x52b   : > { %9670 = vmatprep.mubr.msk.bf16.mxu1 %vm4878_vm10, %v6975_v44  ;;  %v7448_v44 = vshrl.u32 %v12346_v42, 16  ;;  %v12999_v42 = vld [vmem:[#allocation65_spill] sm:$0xff] }
 0x52d   : > { %v7450_v25 = vrot.slane %v7448_v44, 2 }
 0x532   : > { %9671 = vmatmul.mubr.msk.bf16.vlgmr.msra.gmra.mrb[0].mxu1 %vm4878_vm10, %v6977_v10 }
 0x533   : > { %9707 = vmatpush3.bf16.msra.mxu1 %v7511_v21  ;;  %9674 = vmatprep.mubr.msk.bf16.mxu1 %vm4878_vm10, %v6979_v13  ;;  %v7453_v21 = vrot.slane %v7451_v2, 3  ;;  %v13001_v13 = vld [vmem:[#allocation67_spill] sm:$0xff] }
 0x534   : > { %10375 = vmatprep.subr.msk.bf16.mxu1 %vm4933_vm0, %v8697_v9  ;;  %v13000_v9 = vld [vmem:[#allocation66_spill] sm:$0xff] }
 0x53a   : > { %9675 = vmatmul.mubr.msk.bf16.gmra.mrb[4].mxu1 %vm4878_vm10, %v6981_v50 }
 0x53b   : > { %9678 = vmatprep.mubr.msk.bf16.mxu1 %vm4878_vm10, %v6983_v24 }
 0x542   : > { %9679 = vmatmul.mubr.msk.bf16.gmra.mrb[8].mxu1 %vm4878_vm10, %v6985_v27 }
 0x543   : > { %9682 = vmatprep.mubr.msk.bf16.mxu1 %vm4878_vm10, %v6987_v39 }
 0x54a   : > { %9683 = vmatmul.mubr.msk.bf16.gmra.mrb[12].mxu1 %vm4878_vm10, %v6989_v30 }
 0x54b   : > { %9686 = vmatprep.mubr.msk.bf16.mxu1 %vm4878_vm10, %v6991_v33 }
 0x552   : > { %9687 = vmatmul.mubr.msk.bf16.gmra.mrb[16].mxu1 %vm4878_vm10, %v6993_v16 }
 0x553   : > { %9690 = vmatprep.mubr.msk.bf16.mxu1 %vm4878_vm10, %v6995_v55 }
 0x55a   : > { %9691 = vmatmul.mubr.msk.bf16.gmra.mrb[20].mxu1 %vm4878_vm10, %v6997_v6 }
 0x55b   : > { %9694 = vmatprep.mubr.msk.bf16.mxu1 %vm4878_vm10, %v6999_v14 }
 0x562   : > { %9695 = vmatmul.mubr.msk.bf16.gmra.mrb[24].mxu1 %vm4878_vm10, %v7001_v17 }
 0x563   : > { %9698 = vmatprep.mubr.msk.bf16.mxu1 %vm4878_vm10, %v7003_v56 }
 0x56a   : > { %9699 = vmatmul.mubr.msk.bf16.gmra.mrb[28].mxu1 %vm4878_vm10, %v7005_v29 }
 0x56b   : > { %9702 = vmatprep.mubr.msk.bf16.mxu1 %vm4878_vm10, %v7007_v34 }
 0x572   : > { %9703 = vmatmul.mubr.msk.bf16.gmra.mrb[32].mxu1 %vm4878_vm10, %v7009_v22 }
 0x573   : > { %9708 = vmatprep.mubr.msk.bf16.mxu1 %vm4878_vm10, %v12980_v7 }
 0x57a   : > { %9709 = vmatmul.mubr.msk.bf16.vlgmr.msra.gmra.mrb[0].mxu1 %vm4878_vm10, %v12981_v38 }
 0x57b   : > { %9745 = vmatpush3.bf16.msra.mxu1 %v7824_v19  ;;  %9712 = vmatprep.mubr.msk.bf16.mxu1 %vm4878_vm10, %v12982_v41 }
 0x582   : > { %9713 = vmatmul.mubr.msk.bf16.gmra.mrb[4].mxu1 %vm4878_vm10, %v12983_v5 }
 0x583   : > { %9716 = vmatprep.mubr.msk.bf16.mxu1 %vm4878_vm10, %v12984_v61 }
 0x58a   : > { %9717 = vmatmul.mubr.msk.bf16.gmra.mrb[8].mxu1 %vm4878_vm10, %v12985_v28 }
 0x58b   : > { %9720 = vmatprep.mubr.msk.bf16.mxu1 %vm4878_vm10, %v12986_v37 }
 0x592   : > { %9721 = vmatmul.mubr.msk.bf16.gmra.mrb[12].mxu1 %vm4878_vm10, %v12987_v53 }
 0x593   : > { %9724 = vmatprep.mubr.msk.bf16.mxu1 %vm4878_vm10, %v12988_v11 }
 0x59a   : > { %9725 = vmatmul.mubr.msk.bf16.gmra.mrb[16].mxu1 %vm4878_vm10, %v12989_v46 }
 0x59b   : > { %9728 = vmatprep.mubr.msk.bf16.mxu1 %vm4878_vm10, %v12270_v20  ;;  %v7454_v20 = vor.u32 %v7453_v21, %v7450_v25 }
 0x59d   : > { %v7455_v10 = vsel %vm2946_vm8, %v12314_v58, %v7454_v20  ;;  %v12996_v58 = vld [vmem:[#allocation62_spill] sm:$0xff] }
 0x5a2   : > { %9729 = vmatmul.mubr.msk.bf16.gmra.mrb[20].mxu1 %vm4878_vm10, %v12990_v51 }
 0x5a3   : > { %9732 = vmatprep.mubr.msk.bf16.mxu1 %vm4878_vm10, %v12991_v1 }
 0x5aa   : > { %9733 = vmatmul.mubr.msk.bf16.gmra.mrb[24].mxu1 %vm4878_vm10, %v12293_v54  ;;  %v12992_v54 = vld [vmem:[#allocation58_spill] sm:$0xff] }
 0x5ab   : > { %9736 = vmatprep.mubr.msk.bf16.mxu1 %vm4878_vm10, %v12307_v18  ;;  %v12993_v18 = vld [vmem:[#allocation59_spill] sm:$0xff] }
 0x5b2   : > { %9737 = vmatmul.mubr.msk.bf16.gmra.mrb[28].mxu1 %vm4878_vm10, %v12312_v23  ;;  %v12994_v23 = vld [vmem:[#allocation60_spill] sm:$0xff] }
 0x5b3   : > { %9740 = vmatprep.mubr.msk.bf16.mxu1 %vm4878_vm10, %v12324_v36  ;;  %v12995_v36 = vld [vmem:[#allocation61_spill] sm:$0xff] }
 0x5ba   : > { %9741 = vmatmul.mubr.msk.bf16.gmra.mrb[32].mxu1 %vm4878_vm10, %v7455_v10 }
 0x5bb   : > { %9746 = vmatprep.mubr.msk.bf16.mxu1 %vm4878_vm10, %v12327_v49  ;;  %v12997_v49 = vld [vmem:[#allocation63_spill] sm:$0xff] }
 0x5c2   : > { %9747 = vmatmul.mubr.msk.bf16.vlgmr.msra.gmra.mrb[0].mxu1 %vm4878_vm10, %v12318_v63  ;;  %v12998_v63 = vld [vmem:[#allocation64_spill] sm:$0xff] }
 0x5c3   : > { %9750 = vmatprep.mubr.msk.bf16.mxu1 %vm4878_vm10, %v12992_v54 }
 0x5ca   : > { %9751 = vmatmul.mubr.msk.bf16.gmra.mrb[4].mxu1 %vm4878_vm10, %v12993_v18 }
 0x5cb   : > { %9754 = vmatprep.mubr.msk.bf16.mxu1 %vm4878_vm10, %v12994_v23 }
 0x5d2   : > { %9755 = vmatmul.mubr.msk.bf16.gmra.mrb[8].mxu1 %vm4878_vm10, %v12995_v36 }
 0x5d3   : > { %9758 = vmatprep.mubr.msk.bf16.mxu1 %vm4878_vm10, %v12996_v58 }
 0x5da   : > { %9759 = vmatmul.mubr.msk.bf16.gmra.mrb[12].mxu1 %vm4878_vm10, %v12997_v49 }
 0x5db   : > { %9762 = vmatprep.mubr.msk.bf16.mxu1 %vm4878_vm10, %v12367_v52  ;;  %v12724_v52 = vld [vmem:[%s12846_s4] ss:$0 sm:$0xff] }
 0x5e2   : > { %9763 = vmatmul.mubr.msk.bf16.gmra.mrb[16].mxu1 %vm4878_vm10, %v12998_v63 }
 0x5e3   : > { %9766 = vmatprep.mubr.msk.bf16.mxu1 %vm4878_vm10, %v12374_v15 }
 0x5ea   : > { %9767 = vmatmul.mubr.msk.bf16.gmra.mrb[20].mxu1 %vm4878_vm10, %v12999_v42 }
 0x5eb   : > { %9770 = vmatprep.mubr.msk.bf16.mxu1 %vm4878_vm10, %v13000_v9 }
 0x5f2   : > { %9771 = vmatmul.mubr.msk.bf16.gmra.mrb[24].mxu1 %vm4878_vm10, %v13001_v13 }
 0x5f3   : > { %9774 = vmatprep.mubr.msk.bf16.mxu1 %vm4878_vm10, %v13002_v47 }
 0x5fa   : > { %9775 = vmatmul.mubr.msk.bf16.gmra.mrb[28].mxu1 %vm4878_vm10, %v13003_v43 }
 0x5fb   : > { %9778 = vmatprep.mubr.msk.bf16.mxu1 %vm4878_vm10, %v12396_v32 }
 0x602   : > { %9779 = vmatmul.mubr.msk.bf16.gmra.mrb[32].mxu1 %vm4878_vm10, %v12399_v40 }
 0x695   : > { %v9748_v15 = vpop.f32.mrb[0].mxu1 }
 0x696   : > { %v8048_v50 = vadd.f32 %v9748_v15, %v12724_v52  ;;  %v7860_v24 = vpop.f32.mrb[1].mxu1 }
 0x697   : > { %v8046_v40 = vadd.f32 %v12724_v52, %v7860_v24  ;;  %v9749_v32 = vpop.f32.mrb[2].mxu1 }
 0x698   : > { %v8084_v62 = vmax.f32 %v8048_v50, 0.0  ;;  %v8049_v26 = vadd.f32 %v9749_v32, %v12724_v52  ;;  %v7863_v27 = vpop.f32.mrb[3].mxu1 }
 0x699   : > { %v8082_v39 = vmax.f32 %v8046_v40, 0.0  ;;  %v8047_v59 = vadd.f32 %v12724_v52, %v7863_v27 }
 0x69a   : > { %8120 = vst.msk [vmem:[%s12730_s13 + $0x10] sm:$0xff] %vm4878_vm10, %v8084_v62  ;;  %v8085_v3 = vmax.f32 %v8049_v26, 0.0 }
 0x69b   : > { %8118 = vst.msk [vmem:[%s12730_s13] sm:$0xff] %vm4878_vm10, %v8082_v39  ;;  %v8083_v30 = vmax.f32 %v8047_v59, 0.0 }
 0x69c   : > { %8121 = vst.msk [vmem:[%s12730_s13 + $0x18] sm:$0xff] %vm4878_vm10, %v8085_v3 }
 0x69d   : > { %8119 = vst.msk [vmem:[%s12730_s13 + $0x8] sm:$0xff] %vm4878_vm10, %v8083_v30  ;;  %v9752_v33 = vpop.f32.mrb[4].mxu1 }
 0x69e   : > { %v8052_v0 = vadd.f32 %v9752_v33, %v12724_v52  ;;  %v7876_v60 = vpop.f32.mrb[5].mxu1 }
 0x69f   : > { %v8050_v16 = vadd.f32 %v12724_v52, %v7876_v60  ;;  %v9753_v55 = vpop.f32.mrb[6].mxu1 }
 0x6a0   : > { %v8088_v31 = vmax.f32 %v8052_v0, 0.0  ;;  %v8053_v45 = vadd.f32 %v9753_v55, %v12724_v52  ;;  %v7879_v6 = vpop.f32.mrb[7].mxu1 }
 0x6a1   : > { %v8086_v14 = vmax.f32 %v8050_v16, 0.0  ;;  %v8051_v8 = vadd.f32 %v12724_v52, %v7879_v6 }
 0x6a2   : > { %8124 = vst.msk [vmem:[%s12730_s13 + $0x30] sm:$0xff] %vm4878_vm10, %v8088_v31  ;;  %v8089_v48 = vmax.f32 %v8053_v45, 0.0 }
 0x6a3   : > { %8122 = vst.msk [vmem:[%s12730_s13 + $0x20] sm:$0xff] %vm4878_vm10, %v8086_v14  ;;  %v8087_v17 = vmax.f32 %v8051_v8, 0.0 }
 0x6a4   : > { %8125 = vst.msk [vmem:[%s12730_s13 + $0x38] sm:$0xff] %vm4878_vm10, %v8089_v48 }
 0x6a5   : > { %8123 = vst.msk [vmem:[%s12730_s13 + $0x28] sm:$0xff] %vm4878_vm10, %v8087_v17  ;;  %v9756_v56 = vpop.f32.mrb[8].mxu1 }
 0x6a6   : > { %v8056_v12 = vadd.f32 %v9756_v56, %v12724_v52  ;;  %v7892_v35 = vpop.f32.mrb[9].mxu1 }
 0x6a7   : > { %v8054_v29 = vadd.f32 %v12724_v52, %v7892_v35  ;;  %v9757_v4 = vpop.f32.mrb[10].mxu1 }
 0x6a8   : > { %v8092_v34 = vmax.f32 %v8056_v12, 0.0  ;;  %v8057_v57 = vadd.f32 %v9757_v4, %v12724_v52  ;;  %v7895_v22 = vpop.f32.mrb[11].mxu1 }
 0x6a9   : > { %v8090_v7 = vmax.f32 %v8054_v29, 0.0  ;;  %v8055_v19 = vadd.f32 %v12724_v52, %v7895_v22 }
 0x6aa   : > { %8128 = vst.msk [vmem:[%s12730_s13 + $0x50] sm:$0xff] %vm4878_vm10, %v8092_v34  ;;  %v8093_v38 = vmax.f32 %v8057_v57, 0.0 }
 0x6ab   : > { %8126 = vst.msk [vmem:[%s12730_s13 + $0x40] sm:$0xff] %vm4878_vm10, %v8090_v7  ;;  %v8091_v41 = vmax.f32 %v8055_v19, 0.0 }
 0x6ac   : > { %8129 = vst.msk [vmem:[%s12730_s13 + $0x58] sm:$0xff] %vm4878_vm10, %v8093_v38 }
 0x6ad   : > { %8127 = vst.msk [vmem:[%s12730_s13 + $0x48] sm:$0xff] %vm4878_vm10, %v8091_v41  ;;  %v9760_v5 = vpop.f32.mrb[12].mxu1 }
 0x6ae   : > { %v8060_v61 = vadd.f32 %v9760_v5, %v12724_v52  ;;  %v7908_v28 = vpop.f32.mrb[13].mxu1 }
 0x6af   : > { %v8058_v37 = vadd.f32 %v12724_v52, %v7908_v28  ;;  %v9761_v53 = vpop.f32.mrb[14].mxu1 }
 0x6b0   : > { %v8096_v11 = vmax.f32 %v8060_v61, 0.0  ;;  %v8061_v46 = vadd.f32 %v9761_v53, %v12724_v52  ;;  %v7911_v51 = vpop.f32.mrb[15].mxu1 }
 0x6b1   : > { %v8094_v1 = vmax.f32 %v8058_v37, 0.0  ;;  %v8059_v44 = vadd.f32 %v12724_v52, %v7911_v51 }
 0x6b2   : > { %8132 = vst.msk [vmem:[%s12730_s13 + $0x70] sm:$0xff] %vm4878_vm10, %v8096_v11  ;;  %v8097_v2 = vmax.f32 %v8061_v46, 0.0 }
 0x6b3   : > { %8130 = vst.msk [vmem:[%s12730_s13 + $0x60] sm:$0xff] %vm4878_vm10, %v8094_v1  ;;  %v8095_v25 = vmax.f32 %v8059_v44, 0.0 }
 0x6b4   : > { %8133 = vst.msk [vmem:[%s12730_s13 + $0x78] sm:$0xff] %vm4878_vm10, %v8097_v2 }
 0x6b5   : > { %8131 = vst.msk [vmem:[%s12730_s13 + $0x68] sm:$0xff] %vm4878_vm10, %v8095_v25  ;;  %v9764_v21 = vpop.f32.mrb[16].mxu1 }
 0x6b6   : > { %v8064_v20 = vadd.f32 %v9764_v21, %v12724_v52  ;;  %v7924_v10 = vpop.f32.mrb[17].mxu1 }
 0x6b7   : > { %v8062_v54 = vadd.f32 %v12724_v52, %v7924_v10  ;;  %v9765_v18 = vpop.f32.mrb[18].mxu1 }
 0x6b8   : > { %v8100_v23 = vmax.f32 %v8064_v20, 0.0  ;;  %v8065_v36 = vadd.f32 %v9765_v18, %v12724_v52  ;;  %v7927_v58 = vpop.f32.mrb[19].mxu1 }
 0x6b9   : > { %v8098_v49 = vmax.f32 %v8062_v54, 0.0  ;;  %v8063_v63 = vadd.f32 %v12724_v52, %v7927_v58 }
 0x6ba   : > { %8136 = vst.msk [vmem:[%s12730_s13 + $0x90] sm:$0xff] %vm4878_vm10, %v8100_v23  ;;  %v8101_v42 = vmax.f32 %v8065_v36, 0.0 }
 0x6bb   : > { %8134 = vst.msk [vmem:[%s12730_s13 + $0x80] sm:$0xff] %vm4878_vm10, %v8098_v49  ;;  %v8099_v9 = vmax.f32 %v8063_v63, 0.0 }
 0x6bc   : > { %8137 = vst.msk [vmem:[%s12730_s13 + $0x98] sm:$0xff] %vm4878_vm10, %v8101_v42 }
 0x6bd   : > { %8135 = vst.msk [vmem:[%s12730_s13 + $0x88] sm:$0xff] %vm4878_vm10, %v8099_v9  ;;  %v9768_v13 = vpop.f32.mrb[20].mxu1 }
 0x6be   : > { %v8068_v47 = vadd.f32 %v9768_v13, %v12724_v52  ;;  %v7940_v43 = vpop.f32.mrb[21].mxu1 }
 0x6bf   : > { %v8066_v15 = vadd.f32 %v12724_v52, %v7940_v43  ;;  %v9769_v50 = vpop.f32.mrb[22].mxu1 }
 0x6c0   : > { %v8104_v24 = vmax.f32 %v8068_v47, 0.0  ;;  %v8069_v40 = vadd.f32 %v9769_v50, %v12724_v52  ;;  %v7943_v32 = vpop.f32.mrb[23].mxu1 }
 0x6c1   : > { %v8102_v62 = vmax.f32 %v8066_v15, 0.0  ;;  %v8067_v26 = vadd.f32 %v12724_v52, %v7943_v32 }
 0x6c2   : > { %8140 = vst.msk [vmem:[%s12730_s13 + $0xb0] sm:$0xff] %vm4878_vm10, %v8104_v24  ;;  %v8105_v27 = vmax.f32 %v8069_v40, 0.0 }
 0x6c3   : > { %8138 = vst.msk [vmem:[%s12730_s13 + $0xa0] sm:$0xff] %vm4878_vm10, %v8102_v62  ;;  %v8103_v39 = vmax.f32 %v8067_v26, 0.0 }
 0x6c4   : > { %8141 = vst.msk [vmem:[%s12730_s13 + $0xb8] sm:$0xff] %vm4878_vm10, %v8105_v27 }
 0x6c5   : > { %8139 = vst.msk [vmem:[%s12730_s13 + $0xa8] sm:$0xff] %vm4878_vm10, %v8103_v39  ;;  %v9772_v59 = vpop.f32.mrb[24].mxu1 }
 0x6c6   : > { %v8072_v3 = vadd.f32 %v9772_v59, %v12724_v52  ;;  %v7956_v30 = vpop.f32.mrb[25].mxu1 }
 0x6c7   : > { %v8070_v33 = vadd.f32 %v12724_v52, %v7956_v30  ;;  %v9773_v0 = vpop.f32.mrb[26].mxu1 }
 0x6c8   : > { %v8108_v60 = vmax.f32 %v8072_v3, 0.0  ;;  %v8073_v16 = vadd.f32 %v9773_v0, %v12724_v52  ;;  %v7959_v55 = vpop.f32.mrb[27].mxu1 }
 0x6c9   : > { %v8106_v31 = vmax.f32 %v8070_v33, 0.0  ;;  %v8071_v45 = vadd.f32 %v12724_v52, %v7959_v55 }
 0x6ca   : > { %8144 = vst.msk [vmem:[%s12730_s13 + $0xd0] sm:$0xff] %vm4878_vm10, %v8108_v60  ;;  %v8109_v6 = vmax.f32 %v8073_v16, 0.0 }
 0x6cb   : > { %8142 = vst.msk [vmem:[%s12730_s13 + $0xc0] sm:$0xff] %vm4878_vm10, %v8106_v31  ;;  %v8107_v14 = vmax.f32 %v8071_v45, 0.0 }
 0x6cc   : > { %8145 = vst.msk [vmem:[%s12730_s13 + $0xd8] sm:$0xff] %vm4878_vm10, %v8109_v6 }
 0x6cd   : > { %8143 = vst.msk [vmem:[%s12730_s13 + $0xc8] sm:$0xff] %vm4878_vm10, %v8107_v14  ;;  %v9776_v8 = vpop.f32.mrb[28].mxu1 }
 0x6ce   : > { %v8076_v48 = vadd.f32 %v9776_v8, %v12724_v52  ;;  %v7972_v17 = vpop.f32.mrb[29].mxu1 }
 0x6cf   : > { %v8074_v56 = vadd.f32 %v12724_v52, %v7972_v17  ;;  %v9777_v12 = vpop.f32.mrb[30].mxu1 }
 0x6d0   : > { %v8112_v35 = vmax.f32 %v8076_v48, 0.0  ;;  %v8077_v29 = vadd.f32 %v9777_v12, %v12724_v52  ;;  %v7975_v4 = vpop.f32.mrb[31].mxu1 }
 0x6d1   : > { %v8110_v34 = vmax.f32 %v8074_v56, 0.0  ;;  %v8075_v57 = vadd.f32 %v12724_v52, %v7975_v4 }
 0x6d2   : > { %8148 = vst.msk [vmem:[%s12730_s13 + $0xf0] sm:$0xff] %vm4878_vm10, %v8112_v35  ;;  %v8113_v22 = vmax.f32 %v8077_v29, 0.0 }
 0x6d3   : > { %8146 = vst.msk [vmem:[%s12730_s13 + $0xe0] sm:$0xff] %vm4878_vm10, %v8110_v34  ;;  %v8111_v7 = vmax.f32 %v8075_v57, 0.0 }
 0x6d4   : > { %8149 = vst.msk [vmem:[%s12730_s13 + $0xf8] sm:$0xff] %vm4878_vm10, %v8113_v22 }
 0x6d5   : > { %8147 = vst.msk [vmem:[%s12730_s13 + $0xe8] sm:$0xff] %vm4878_vm10, %v8111_v7  ;;  %v9780_v19 = vpop.f32.mrb[32].mxu1 }
 0x6d6   : > { %v8080_v38 = vadd.f32 %v9780_v19, %v12724_v52  ;;  %v7988_v41 = vpop.f32.mrb[33].mxu1 }
 0x6d7   : > { %v8078_v5 = vadd.f32 %v12724_v52, %v7988_v41  ;;  %v9781_v61 = vpop.f32.mrb[34].mxu1 }
 0x6d8   : > { %v8116_v28 = vmax.f32 %v8080_v38, 0.0  ;;  %v8081_v37 = vadd.f32 %v9781_v61, %v12724_v52  ;;  %v7991_v53 = vpop.f32.mrb[35].mxu1 }
 0x6d9   : > { %v8114_v11 = vmax.f32 %v8078_v5, 0.0  ;;  %v8079_v46 = vadd.f32 %v12724_v52, %v7991_v53 }
 0x6da   : > { %8152 = vst.msk [vmem:[%s12730_s13 + $0x110] sm:$0xff] %vm4878_vm10, %v8116_v28  ;;  %v8117_v51 = vmax.f32 %v8081_v37, 0.0 }
 0x6db   : > { %8150 = vst.msk [vmem:[%s12730_s13 + $0x100] sm:$0xff] %vm4878_vm10, %v8114_v11  ;;  %v8115_v1 = vmax.f32 %v8079_v46, 0.0 }
 0x6dc   : > { %8153 = vst.msk [vmem:[%s12730_s13 + $0x118] sm:$0xff] %vm4878_vm10, %v8117_v51 }
 0x6dd   : > { %8151 = vst.msk [vmem:[%s12730_s13 + $0x108] sm:$0xff] %vm4878_vm10, %v8115_v1 }
 0x6de PF: > { %s16_s21 = sadd.s32 1, %s10531_s21  }
 0x6df   : > { %p13_p4 = scmp.ge.s32.totalorder %s16_s21, 4  }
 0x6e1   :  { %15 = sbr.rel (!%p13_p4) target bundleno = 1 (0x1), region = 90 }

</bundles_post_ra>
